<compile_context>
chip_gen: v7x
topology: tpu7x:2x2x1
jax: 0.10.0
libtpu: 0.0.40
codegen_flags: <defaults>
</compile_context>

<pallas_src>
import functools

import jax
import jax.numpy as jnp
from jax.experimental import pallas as pl
from jax.experimental.pallas import tpu as pltpu


def primal_block_kernel(x_ref,      # VMEM (2C, ncols)  rows [0,C) primal, [C,2C) image
                        aux_ref,    # VMEM (27, ncols)  per-column psf*mask rows (see header)
                        w1_ref,     # VMEM (4C, 9*2C)   conv1 weight, fused-im2col form
                        b1_ref,     # VMEM (4C, 1)
                        w2_ref,     # VMEM (C, 4C)      conv2 (1x1) weight, transposed
                        b2_ref,     # VMEM (C, 1)
                        out_ref,    # VMEM (2C, ncols)  rows [0,C) primal out, [C,2C) dual
                        stage_ref,  # VMEM scratch (2C, ncols)
                        r_ref,      # VMEM scratch (9*2C, ncols) fused im2col matrix
                        *, H, W, C):
    ncols = x_ref.shape[1]
    taps = [(oy, ox) for oy in (-1, 0, 1) for ox in (-1, 0, 1)]   # t = (oy+1)*3 + (ox+1)

    def rolled(arr, t):
        # rolled(arr)[:, (n, h, w)] = arr[:, (n, h+oy, w+ox)] (lane wrap; wrapped or
        # out-of-image columns are killed by the zero-valued multipliers/masks in aux).
        oy, ox = taps[t]
        s = oy * W + ox
        return arr if s == 0 else pltpu.roll(arr, shift=(-s) % ncols, axis=1)

    primal_t = x_ref[pl.ds(0, C), :]          # (C, ncols)
    image_t = x_ref[pl.ds(C, C), :]           # (C, ncols)

    # ---- camera.forward: per-color 3x3 zero-padded correlation (roll -> fma) ----
    dual_fwd = None
    for t in range(9):
        term = aux_ref[pl.ds(t, 1), :] * rolled(primal_t, t)
        dual_fwd = term if dual_fwd is None else dual_fwd + term
    dual_t = image_t - dual_fwd

    # ---- camera.adjoint: correlation with the 180-flipped PSF (exact adjoint) ----
    padj = None
    for t in range(9):
        term = aux_ref[pl.ds(9 + t, 1), :] * rolled(dual_t, t)
        padj = term if padj is None else padj + term

    # ---- fused im2col on the full (2C)-sublane stack [padj ; primal]:
    #      one roll + one multiply + one unmasked full-tile store per tap.
    #      Row (t*2C + ci): ci<C -> adjoint channel, ci>=C -> primal channel.
    stage_ref[pl.ds(0, C), :] = padj
    stage_ref[pl.ds(C, C), :] = primal_t
    stack = stage_ref[...]                    # (2C, ncols)
    for t in range(9):
        v = rolled(stack, t)
        if taps[t] != (0, 0):                 # centre tap needs no boundary mask
            v = v * aux_ref[pl.ds(18 + t, 1), :]
        r_ref[pl.ds(2 * C * t, 2 * C), :] = v

    # ---- Conv2d(2C->4C, k=3, pad=1) as ONE MXU matmul (K = 9*2C), then ReLU ----
    y = jnp.dot(w1_ref[...], r_ref[...], preferred_element_type=jnp.float32)
    y = jnp.maximum(y + b1_ref[...], 0.0)

    # ---- Conv2d(4C->C, k=1) + residual ----
    o = jnp.dot(w2_ref[...], y, preferred_element_type=jnp.float32) + b2_ref[...]

    # ---- single unmasked full-tile output store ([primal + o ; dual]) ----
    stage_ref[pl.ds(0, C), :] = x_ref[pl.ds(0, C), :] + o
    stage_ref[pl.ds(C, C), :] = dual_t
    out_ref[...] = stage_ref[...]


def _num_tensorcores_per_chip():
    kind = (getattr(jax.devices()[0], "device_kind", "") or "").lower()
    return 2 if "v7" in kind else 1


@jax.jit
def primal_block(primal, image, psf_per_color, w1, b1, w2, b2):
    """primal, image: (N, H, W, C) float32, N = batch*3 (colors packed, color = n % 3)."""
    N, H, W, C = primal.shape
    P = H * W
    assert N % 3 == 0, "color_pack requires batch dim to be a multiple of 3"

    # Grid = TensorCores per chip: 1 on v5e/v6e (no pointless serial steps, widest
    # lane-dense block), 2 "parallel" on v7x so each core takes one block.
    n_blocks = _num_tensorcores_per_chip()
    if N % n_blocks != 0:
        n_blocks = 1
    NB = N // n_blocks
    ncols = NB * P
    # Every block covers whole samples, so pltpu.roll's lane wrap is always masked.
    assert n_blocks * NB == N and ncols % P == 0

    # --- layout plumbing: channels-major, lane-dense (rows, N*H*W) ---
    # TODO(synk): if PrimalBlock is iterated (unrolled primal-dual), keep activations in
    # this (2C, N*P) layout between iterations and only transpose at the chain ends.
    pt = jnp.transpose(primal, (3, 0, 1, 2)).reshape(C, N * P)
    it = jnp.transpose(image, (3, 0, 1, 2)).reshape(C, N * P)
    x = jnp.concatenate([pt, it], axis=0).astype(jnp.float32)        # (2C, N*P)

    # Per-column PSF multipliers & boundary masks, precomputed once outside the kernel
    # (hoists the iota / % / compare / select chain out of every grid step).
    taps = [(oy, ox) for oy in (-1, 0, 1) for ox in (-1, 0, 1)]
    hh = jnp.arange(H, dtype=jnp.int32)[:, None]
    ww = jnp.arange(W, dtype=jnp.int32)[None, :]
    mask_list = []
    for oy, ox in taps:
        m = jnp.ones((H, W), jnp.float32)
        if oy == -1:
            m = m * (hh >= 1)
        elif oy == 1:
            m = m * (hh < H - 1)
        if ox == -1:
            m = m * (ww >= 1)
        elif ox == 1:
            m = m * (ww < W - 1)
        mask_list.append(m.reshape(-1))
    mask_p = jnp.stack(mask_list, axis=0).astype(jnp.float32)        # (9, P)
    mask_cols = jnp.tile(mask_p, (1, N))                             # (9, N*P)

    # Colors are packed in the batch dim as n % 3 (color_pack).  aux is built per column
    # from that rule and sliced with the SAME index_map as x, so a different batching
    # order only ever needs a change here, never in the kernel.
    psf_n = psf_per_color[jnp.arange(N) % 3].reshape(N, 9).astype(jnp.float32)   # (N, 9)
    psf_cols = jnp.repeat(psf_n.T, P, axis=1)                        # (9, N*P)  psf[n, t]
    psf_flip_cols = jnp.repeat(psf_n[:, ::-1].T, P, axis=1)          # (9, N*P)  psf[n, 8-t]
    aux = jnp.concatenate([psf_cols * mask_cols,                     # forward multipliers
                           psf_flip_cols * mask_cols,                # adjoint multipliers
                           mask_cols], axis=0)                       # im2col boundary masks

    # conv1 weight (kh, kw, cin=2C, cout=4C) -> (cout, 9*2C) matching the im2col rows.
    w1mat = jnp.transpose(w1, (3, 0, 1, 2)).reshape(4 * C, 9 * 2 * C).astype(jnp.float32)
    w2t = jnp.transpose(w2).astype(jnp.float32)                      # (C, 4C)
    b1c = b1.reshape(4 * C, 1).astype(jnp.float32)
    b2c = b2.reshape(C, 1).astype(jnp.float32)

    kernel = functools.partial(primal_block_kernel, H=H, W=W, C=C)
    out = pl.pallas_call(
        kernel,
        out_shape=jax.ShapeDtypeStruct((2 * C, N * P), jnp.float32),
        grid=(n_blocks,),
        in_specs=[
            pl.BlockSpec((2 * C, ncols), lambda j: (0, j)),
            pl.BlockSpec((27, ncols), lambda j: (0, j)),
            pl.BlockSpec((4 * C, 9 * 2 * C), lambda j: (0, 0)),
            pl.BlockSpec((4 * C, 1), lambda j: (0, 0)),
            pl.BlockSpec((C, 4 * C), lambda j: (0, 0)),
            pl.BlockSpec((C, 1), lambda j: (0, 0)),
        ],
        out_specs=pl.BlockSpec((2 * C, ncols), lambda j: (0, j)),
        scratch_shapes=[pltpu.VMEM((2 * C, ncols), jnp.float32),
                        pltpu.VMEM((9 * 2 * C, ncols), jnp.float32)],
        input_output_aliases={0: 0},          # donate x's HBM buffer (same shape/layout)
        compiler_params=pltpu.CompilerParams(
            dimension_semantics=("parallel",)),
    )(x, aux, w1mat, b1c, w2t, b2c)

    primal_out = out[:C].reshape(C, N, H, W).transpose(1, 2, 3, 0)
    dual_out = out[C:].reshape(C, N, H, W).transpose(1, 2, 3, 0)
    return primal_out, dual_out


def primal_block_reference(primal, image, psf_per_color, w1, b1, w2, b2):
    """Pure-JAX reference (NHWC layout, same synthetic camera), HIGHEST precision."""
    N, H, W, C = primal.shape
    prec = jax.lax.Precision.HIGHEST
    psf_n = psf_per_color[jnp.arange(N) % 3]                      # (N, 3, 3)

    xp = jnp.pad(primal, ((0, 0), (1, 1), (1, 1), (0, 0)))
    dual_fwd = jnp.zeros_like(primal)
    for dy in range(3):
        for dx in range(3):
            dual_fwd = dual_fwd + (psf_n[:, dy, dx][:, None, None, None]
                                   * xp[:, dy:dy + H, dx:dx + W, :])
    dual = image - dual_fwd

    dp = jnp.pad(dual, ((0, 0), (1, 1), (1, 1), (0, 0)))
    primal_adj = jnp.zeros_like(primal)
    for dy in range(3):
        for dx in range(3):
            primal_adj = primal_adj + (psf_n[:, 2 - dy, 2 - dx][:, None, None, None]
                                       * dp[:, dy:dy + H, dx:dx + W, :])

    cat = jnp.concatenate([primal_adj, primal], axis=-1)
    cp = jnp.pad(cat, ((0, 0), (1, 1), (1, 1), (0, 0)))
    acc = jnp.zeros((N, H, W, 4 * C), jnp.float32)
    for dy in range(3):
        for dx in range(3):
            acc = acc + jnp.einsum('nhwi,io->nhwo', cp[:, dy:dy + H, dx:dx + W, :],
                                   w1[dy, dx], precision=prec)
    acc = jnp.maximum(acc + b1, 0.0)
    out = jnp.einsum('nhwi,io->nhwo', acc, w2, precision=prec) + b2
    return primal + out, dual


if __name__ == "__main__":
    # Small shapes consistent with the module: batch=2, colors=3, width=4, 16x16 spatial.
    B, COLORS, WIDTH, H, W = 2, 3, 4, 16, 16
    N = B * COLORS          # packed batch (color_pack)
    C = WIDTH

    key = jax.random.PRNGKey(0)
    k_primal, k_image, k_psf, k_w1, k_b1, k_w2, k_b2 = jax.random.split(key, 7)

    primal = jax.random.normal(k_primal, (N, H, W, C), jnp.float32)
    image = jax.random.normal(k_image, (N, H, W, C), jnp.float32)

    # Synthetic camera PSFs: one 3x3 kernel per color, deterministic & normalized.
    psf = jax.random.normal(k_psf, (COLORS, 3, 3), jnp.float32)
    psf = psf / jnp.sum(jnp.abs(psf), axis=(1, 2), keepdims=True)

    # primal_conv parameters (torch shapes: w1 (4C,2C,3,3), w2 (C,4C,1,1)); stored here
    # in (kh, kw, cin, cout) / (cin, cout) form.
    w1 = 0.1 * jax.random.normal(k_w1, (3, 3, 2 * C, 4 * C), jnp.float32)
    b1 = 0.1 * jax.random.normal(k_b1, (4 * C,), jnp.float32)
    w2 = 0.1 * jax.random.normal(k_w2, (4 * C, C), jnp.float32)
    b2 = 0.1 * jax.random.normal(k_b2, (C,), jnp.float32)

    primal_out, dual_out = primal_block(primal, image, psf, w1, b1, w2, b2)
    jax.block_until_ready((primal_out, dual_out))

    ref_primal, ref_dual = primal_block_reference(primal, image, psf, w1, b1, w2, b2)
    assert primal_out.shape == (N, H, W, C) and dual_out.shape == (N, H, W, C)
    assert jnp.allclose(dual_out, ref_dual, atol=1e-3, rtol=1e-3), "dual mismatch"
    assert jnp.allclose(primal_out, ref_primal, atol=1e-2, rtol=1e-2), "primal mismatch"

    print("KERNEL_OK")
</pallas_src>

<mosaic_0001>
module attributes {stable_mosaic.version = 11 : i64} {
  func.func @primal_block_kernel(%arg0: i32, %arg1: memref<8x1536xf32, #tpu.memory_space<vmem>>, %arg2: memref<27x1536xf32, #tpu.memory_space<vmem>>, %arg3: memref<16x72xf32, #tpu.memory_space<vmem>>, %arg4: memref<16x1xf32, #tpu.memory_space<vmem>>, %arg5: memref<4x16xf32, #tpu.memory_space<vmem>>, %arg6: memref<4x1xf32, #tpu.memory_space<vmem>>, %arg7: memref<8x1536xf32, #tpu.memory_space<vmem>>, %arg8: memref<8x1536xf32, #tpu.memory_space<vmem>>, %arg9: memref<72x1536xf32, #tpu.memory_space<vmem>>) attributes {dimension_semantics = [#tpu.dimension_semantics<parallel>], iteration_bounds = array<i64: 1>, scalar_prefetch = 0 : i64, scratch_operands = 2 : i64, tpu.core_type = #tpu.core_type<tc>, window_params = [{transform_indices = @transform_0, window_bounds = array<i64: 8, 1536>}, {transform_indices = @transform_1, window_bounds = array<i64: 27, 1536>}, {pipeline_mode = #tpu.pipeline_mode<synchronous>, transform_indices = @transform_2, window_bounds = array<i64: 16, 72>}, {pipeline_mode = #tpu.pipeline_mode<synchronous>, transform_indices = @transform_3, window_bounds = array<i64: 16, 1>}, {pipeline_mode = #tpu.pipeline_mode<synchronous>, transform_indices = @transform_4, window_bounds = array<i64: 4, 16>}, {pipeline_mode = #tpu.pipeline_mode<synchronous>, transform_indices = @transform_5, window_bounds = array<i64: 4, 1>}, {transform_indices = @transform_6, window_bounds = array<i64: 8, 1536>}]} {
    %c0 = arith.constant 0 : index
    %c0_0 = arith.constant 0 : index
    %0 = vector.load %arg1[%c0, %c0_0] : memref<8x1536xf32, #tpu.memory_space<vmem>>, vector<4x1536xf32>
    %c4 = arith.constant 4 : index
    %c0_1 = arith.constant 0 : index
    %1 = vector.load %arg1[%c4, %c0_1] : memref<8x1536xf32, #tpu.memory_space<vmem>>, vector<4x1536xf32>
    %c0_2 = arith.constant 0 : index
    %c0_3 = arith.constant 0 : index
    %2 = vector.load %arg2[%c0_2, %c0_3] : memref<27x1536xf32, #tpu.memory_space<vmem>>, vector<1x1536xf32>
    %c17_i32 = arith.constant 17 : i32
    %3 = tpu.dynamic_rotate %0 by %c17_i32 dim 1 : vector<4x1536xf32>, i32 -> vector<4x1536xf32>
    %4 = vector.broadcast %2 : vector<1x1536xf32> to vector<4x1536xf32>
    %5 = arith.mulf %4, %3 : vector<4x1536xf32>
    %c1 = arith.constant 1 : index
    %c0_4 = arith.constant 0 : index
    %6 = vector.load %arg2[%c1, %c0_4] : memref<27x1536xf32, #tpu.memory_space<vmem>>, vector<1x1536xf32>
    %c16_i32 = arith.constant 16 : i32
    %7 = tpu.dynamic_rotate %0 by %c16_i32 dim 1 : vector<4x1536xf32>, i32 -> vector<4x1536xf32>
    %8 = vector.broadcast %6 : vector<1x1536xf32> to vector<4x1536xf32>
    %9 = arith.mulf %8, %7 : vector<4x1536xf32>
    %10 = arith.addf %5, %9 : vector<4x1536xf32>
    %c2 = arith.constant 2 : index
    %c0_5 = arith.constant 0 : index
    %11 = vector.load %arg2[%c2, %c0_5] : memref<27x1536xf32, #tpu.memory_space<vmem>>, vector<1x1536xf32>
    %c15_i32 = arith.constant 15 : i32
    %12 = tpu.dynamic_rotate %0 by %c15_i32 dim 1 : vector<4x1536xf32>, i32 -> vector<4x1536xf32>
    %13 = vector.broadcast %11 : vector<1x1536xf32> to vector<4x1536xf32>
    %14 = arith.mulf %13, %12 : vector<4x1536xf32>
    %15 = arith.addf %10, %14 : vector<4x1536xf32>
    %c3 = arith.constant 3 : index
    %c0_6 = arith.constant 0 : index
    %16 = vector.load %arg2[%c3, %c0_6] : memref<27x1536xf32, #tpu.memory_space<vmem>>, vector<1x1536xf32>
    %c1_i32 = arith.constant 1 : i32
    %17 = tpu.dynamic_rotate %0 by %c1_i32 dim 1 : vector<4x1536xf32>, i32 -> vector<4x1536xf32>
    %18 = vector.broadcast %16 : vector<1x1536xf32> to vector<4x1536xf32>
    %19 = arith.mulf %18, %17 : vector<4x1536xf32>
    %20 = arith.addf %15, %19 : vector<4x1536xf32>
    %c4_7 = arith.constant 4 : index
    %c0_8 = arith.constant 0 : index
    %21 = vector.load %arg2[%c4_7, %c0_8] : memref<27x1536xf32, #tpu.memory_space<vmem>>, vector<1x1536xf32>
    %22 = vector.broadcast %21 : vector<1x1536xf32> to vector<4x1536xf32>
    %23 = arith.mulf %22, %0 : vector<4x1536xf32>
    %24 = arith.addf %20, %23 : vector<4x1536xf32>
    %c5 = arith.constant 5 : index
    %c0_9 = arith.constant 0 : index
    %25 = vector.load %arg2[%c5, %c0_9] : memref<27x1536xf32, #tpu.memory_space<vmem>>, vector<1x1536xf32>
    %c1535_i32 = arith.constant 1535 : i32
    %26 = tpu.dynamic_rotate %0 by %c1535_i32 dim 1 : vector<4x1536xf32>, i32 -> vector<4x1536xf32>
    %27 = vector.broadcast %25 : vector<1x1536xf32> to vector<4x1536xf32>
    %28 = arith.mulf %27, %26 : vector<4x1536xf32>
    %29 = arith.addf %24, %28 : vector<4x1536xf32>
    %c6 = arith.constant 6 : index
    %c0_10 = arith.constant 0 : index
    %30 = vector.load %arg2[%c6, %c0_10] : memref<27x1536xf32, #tpu.memory_space<vmem>>, vector<1x1536xf32>
    %c1521_i32 = arith.constant 1521 : i32
    %31 = tpu.dynamic_rotate %0 by %c1521_i32 dim 1 : vector<4x1536xf32>, i32 -> vector<4x1536xf32>
    %32 = vector.broadcast %30 : vector<1x1536xf32> to vector<4x1536xf32>
    %33 = arith.mulf %32, %31 : vector<4x1536xf32>
    %34 = arith.addf %29, %33 : vector<4x1536xf32>
    %c7 = arith.constant 7 : index
    %c0_11 = arith.constant 0 : index
    %35 = vector.load %arg2[%c7, %c0_11] : memref<27x1536xf32, #tpu.memory_space<vmem>>, vector<1x1536xf32>
    %c1520_i32 = arith.constant 1520 : i32
    %36 = tpu.dynamic_rotate %0 by %c1520_i32 dim 1 : vector<4x1536xf32>, i32 -> vector<4x1536xf32>
    %37 = vector.broadcast %35 : vector<1x1536xf32> to vector<4x1536xf32>
    %38 = arith.mulf %37, %36 : vector<4x1536xf32>
    %39 = arith.addf %34, %38 : vector<4x1536xf32>
    %c8 = arith.constant 8 : index
    %c0_12 = arith.constant 0 : index
    %40 = vector.load %arg2[%c8, %c0_12] : memref<27x1536xf32, #tpu.memory_space<vmem>>, vector<1x1536xf32>
    %c1519_i32 = arith.constant 1519 : i32
    %41 = tpu.dynamic_rotate %0 by %c1519_i32 dim 1 : vector<4x1536xf32>, i32 -> vector<4x1536xf32>
    %42 = vector.broadcast %40 : vector<1x1536xf32> to vector<4x1536xf32>
    %43 = arith.mulf %42, %41 : vector<4x1536xf32>
    %44 = arith.addf %39, %43 : vector<4x1536xf32>
    %45 = arith.subf %1, %44 : vector<4x1536xf32>
    %c9 = arith.constant 9 : index
    %c0_13 = arith.constant 0 : index
    %46 = vector.load %arg2[%c9, %c0_13] : memref<27x1536xf32, #tpu.memory_space<vmem>>, vector<1x1536xf32>
    %c17_i32_14 = arith.constant 17 : i32
    %47 = tpu.dynamic_rotate %45 by %c17_i32_14 dim 1 : vector<4x1536xf32>, i32 -> vector<4x1536xf32>
    %48 = vector.broadcast %46 : vector<1x1536xf32> to vector<4x1536xf32>
    %49 = arith.mulf %48, %47 : vector<4x1536xf32>
    %c10 = arith.constant 10 : index
    %c0_15 = arith.constant 0 : index
    %50 = vector.load %arg2[%c10, %c0_15] : memref<27x1536xf32, #tpu.memory_space<vmem>>, vector<1x1536xf32>
    %c16_i32_16 = arith.constant 16 : i32
    %51 = tpu.dynamic_rotate %45 by %c16_i32_16 dim 1 : vector<4x1536xf32>, i32 -> vector<4x1536xf32>
    %52 = vector.broadcast %50 : vector<1x1536xf32> to vector<4x1536xf32>
    %53 = arith.mulf %52, %51 : vector<4x1536xf32>
    %54 = arith.addf %49, %53 : vector<4x1536xf32>
    %c11 = arith.constant 11 : index
    %c0_17 = arith.constant 0 : index
    %55 = vector.load %arg2[%c11, %c0_17] : memref<27x1536xf32, #tpu.memory_space<vmem>>, vector<1x1536xf32>
    %c15_i32_18 = arith.constant 15 : i32
    %56 = tpu.dynamic_rotate %45 by %c15_i32_18 dim 1 : vector<4x1536xf32>, i32 -> vector<4x1536xf32>
    %57 = vector.broadcast %55 : vector<1x1536xf32> to vector<4x1536xf32>
    %58 = arith.mulf %57, %56 : vector<4x1536xf32>
    %59 = arith.addf %54, %58 : vector<4x1536xf32>
    %c12 = arith.constant 12 : index
    %c0_19 = arith.constant 0 : index
    %60 = vector.load %arg2[%c12, %c0_19] : memref<27x1536xf32, #tpu.memory_space<vmem>>, vector<1x1536xf32>
    %c1_i32_20 = arith.constant 1 : i32
    %61 = tpu.dynamic_rotate %45 by %c1_i32_20 dim 1 : vector<4x1536xf32>, i32 -> vector<4x1536xf32>
    %62 = vector.broadcast %60 : vector<1x1536xf32> to vector<4x1536xf32>
    %63 = arith.mulf %62, %61 : vector<4x1536xf32>
    %64 = arith.addf %59, %63 : vector<4x1536xf32>
    %c13 = arith.constant 13 : index
    %c0_21 = arith.constant 0 : index
    %65 = vector.load %arg2[%c13, %c0_21] : memref<27x1536xf32, #tpu.memory_space<vmem>>, vector<1x1536xf32>
    %66 = vector.broadcast %65 : vector<1x1536xf32> to vector<4x1536xf32>
    %67 = arith.mulf %66, %45 : vector<4x1536xf32>
    %68 = arith.addf %64, %67 : vector<4x1536xf32>
    %c14 = arith.constant 14 : index
    %c0_22 = arith.constant 0 : index
    %69 = vector.load %arg2[%c14, %c0_22] : memref<27x1536xf32, #tpu.memory_space<vmem>>, vector<1x1536xf32>
    %c1535_i32_23 = arith.constant 1535 : i32
    %70 = tpu.dynamic_rotate %45 by %c1535_i32_23 dim 1 : vector<4x1536xf32>, i32 -> vector<4x1536xf32>
    %71 = vector.broadcast %69 : vector<1x1536xf32> to vector<4x1536xf32>
    %72 = arith.mulf %71, %70 : vector<4x1536xf32>
    %73 = arith.addf %68, %72 : vector<4x1536xf32>
    %c15 = arith.constant 15 : index
    %c0_24 = arith.constant 0 : index
    %74 = vector.load %arg2[%c15, %c0_24] : memref<27x1536xf32, #tpu.memory_space<vmem>>, vector<1x1536xf32>
    %c1521_i32_25 = arith.constant 1521 : i32
    %75 = tpu.dynamic_rotate %45 by %c1521_i32_25 dim 1 : vector<4x1536xf32>, i32 -> vector<4x1536xf32>
    %76 = vector.broadcast %74 : vector<1x1536xf32> to vector<4x1536xf32>
    %77 = arith.mulf %76, %75 : vector<4x1536xf32>
    %78 = arith.addf %73, %77 : vector<4x1536xf32>
    %c16 = arith.constant 16 : index
    %c0_26 = arith.constant 0 : index
    %79 = vector.load %arg2[%c16, %c0_26] : memref<27x1536xf32, #tpu.memory_space<vmem>>, vector<1x1536xf32>
    %c1520_i32_27 = arith.constant 1520 : i32
    %80 = tpu.dynamic_rotate %45 by %c1520_i32_27 dim 1 : vector<4x1536xf32>, i32 -> vector<4x1536xf32>
    %81 = vector.broadcast %79 : vector<1x1536xf32> to vector<4x1536xf32>
    %82 = arith.mulf %81, %80 : vector<4x1536xf32>
    %83 = arith.addf %78, %82 : vector<4x1536xf32>
    %c17 = arith.constant 17 : index
    %c0_28 = arith.constant 0 : index
    %84 = vector.load %arg2[%c17, %c0_28] : memref<27x1536xf32, #tpu.memory_space<vmem>>, vector<1x1536xf32>
    %c1519_i32_29 = arith.constant 1519 : i32
    %85 = tpu.dynamic_rotate %45 by %c1519_i32_29 dim 1 : vector<4x1536xf32>, i32 -> vector<4x1536xf32>
    %86 = vector.broadcast %84 : vector<1x1536xf32> to vector<4x1536xf32>
    %87 = arith.mulf %86, %85 : vector<4x1536xf32>
    %88 = arith.addf %83, %87 : vector<4x1536xf32>
    %c0_30 = arith.constant 0 : index
    %c0_31 = arith.constant 0 : index
    %89 = vector.load %arg8[%c0_30, %c0_31] : memref<8x1536xf32, #tpu.memory_space<vmem>>, vector<4x1536xf32>
    tpu.vector_store %arg8[%c0_30, %c0_31], %88 {strides = array<i32>} : memref<8x1536xf32, #tpu.memory_space<vmem>>, vector<4x1536xf32>,
    %c4_32 = arith.constant 4 : index
    %c0_33 = arith.constant 0 : index
    %90 = vector.load %arg8[%c4_32, %c0_33] : memref<8x1536xf32, #tpu.memory_space<vmem>>, vector<4x1536xf32>
    tpu.vector_store %arg8[%c4_32, %c0_33], %0 {strides = array<i32>} : memref<8x1536xf32, #tpu.memory_space<vmem>>, vector<4x1536xf32>,
    %c0_34 = arith.constant 0 : index
    %c0_35 = arith.constant 0 : index
    %91 = vector.load %arg8[%c0_34, %c0_35] : memref<8x1536xf32, #tpu.memory_space<vmem>>, vector<8x1536xf32>
    %c17_i32_36 = arith.constant 17 : i32
    %92 = tpu.dynamic_rotate %91 by %c17_i32_36 dim 1 : vector<8x1536xf32>, i32 -> vector<8x1536xf32>
    %c18 = arith.constant 18 : index
    %c0_37 = arith.constant 0 : index
    %93 = vector.load %arg2[%c18, %c0_37] : memref<27x1536xf32, #tpu.memory_space<vmem>>, vector<1x1536xf32>
    %94 = vector.broadcast %93 : vector<1x1536xf32> to vector<8x1536xf32>
    %95 = arith.mulf %92, %94 : vector<8x1536xf32>
    %c0_38 = arith.constant 0 : index
    %c0_39 = arith.constant 0 : index
    %96 = vector.load %arg9[%c0_38, %c0_39] : memref<72x1536xf32, #tpu.memory_space<vmem>>, vector<8x1536xf32>
    tpu.vector_store %arg9[%c0_38, %c0_39], %95 {strides = array<i32>} : memref<72x1536xf32, #tpu.memory_space<vmem>>, vector<8x1536xf32>,
    %c16_i32_40 = arith.constant 16 : i32
    %97 = tpu.dynamic_rotate %91 by %c16_i32_40 dim 1 : vector<8x1536xf32>, i32 -> vector<8x1536xf32>
    %c19 = arith.constant 19 : index
    %c0_41 = arith.constant 0 : index
    %98 = vector.load %arg2[%c19, %c0_41] : memref<27x1536xf32, #tpu.memory_space<vmem>>, vector<1x1536xf32>
    %99 = vector.broadcast %98 : vector<1x1536xf32> to vector<8x1536xf32>
    %100 = arith.mulf %97, %99 : vector<8x1536xf32>
    %c8_42 = arith.constant 8 : index
    %c0_43 = arith.constant 0 : index
    %101 = vector.load %arg9[%c8_42, %c0_43] : memref<72x1536xf32, #tpu.memory_space<vmem>>, vector<8x1536xf32>
    tpu.vector_store %arg9[%c8_42, %c0_43], %100 {strides = array<i32>} : memref<72x1536xf32, #tpu.memory_space<vmem>>, vector<8x1536xf32>,
    %c15_i32_44 = arith.constant 15 : i32
    %102 = tpu.dynamic_rotate %91 by %c15_i32_44 dim 1 : vector<8x1536xf32>, i32 -> vector<8x1536xf32>
    %c20 = arith.constant 20 : index
    %c0_45 = arith.constant 0 : index
    %103 = vector.load %arg2[%c20, %c0_45] : memref<27x1536xf32, #tpu.memory_space<vmem>>, vector<1x1536xf32>
    %104 = vector.broadcast %103 : vector<1x1536xf32> to vector<8x1536xf32>
    %105 = arith.mulf %102, %104 : vector<8x1536xf32>
    %c16_46 = arith.constant 16 : index
    %c0_47 = arith.constant 0 : index
    %106 = vector.load %arg9[%c16_46, %c0_47] : memref<72x1536xf32, #tpu.memory_space<vmem>>, vector<8x1536xf32>
    tpu.vector_store %arg9[%c16_46, %c0_47], %105 {strides = array<i32>} : memref<72x1536xf32, #tpu.memory_space<vmem>>, vector<8x1536xf32>,
    %c1_i32_48 = arith.constant 1 : i32
    %107 = tpu.dynamic_rotate %91 by %c1_i32_48 dim 1 : vector<8x1536xf32>, i32 -> vector<8x1536xf32>
    %c21 = arith.constant 21 : index
    %c0_49 = arith.constant 0 : index
    %108 = vector.load %arg2[%c21, %c0_49] : memref<27x1536xf32, #tpu.memory_space<vmem>>, vector<1x1536xf32>
    %109 = vector.broadcast %108 : vector<1x1536xf32> to vector<8x1536xf32>
    %110 = arith.mulf %107, %109 : vector<8x1536xf32>
    %c24 = arith.constant 24 : index
    %c0_50 = arith.constant 0 : index
    %111 = vector.load %arg9[%c24, %c0_50] : memref<72x1536xf32, #tpu.memory_space<vmem>>, vector<8x1536xf32>
    tpu.vector_store %arg9[%c24, %c0_50], %110 {strides = array<i32>} : memref<72x1536xf32, #tpu.memory_space<vmem>>, vector<8x1536xf32>,
    %c32 = arith.constant 32 : index
    %c0_51 = arith.constant 0 : index
    %112 = vector.load %arg9[%c32, %c0_51] : memref<72x1536xf32, #tpu.memory_space<vmem>>, vector<8x1536xf32>
    tpu.vector_store %arg9[%c32, %c0_51], %91 {strides = array<i32>} : memref<72x1536xf32, #tpu.memory_space<vmem>>, vector<8x1536xf32>,
    %c1535_i32_52 = arith.constant 1535 : i32
    %113 = tpu.dynamic_rotate %91 by %c1535_i32_52 dim 1 : vector<8x1536xf32>, i32 -> vector<8x1536xf32>
    %c23 = arith.constant 23 : index
    %c0_53 = arith.constant 0 : index
    %114 = vector.load %arg2[%c23, %c0_53] : memref<27x1536xf32, #tpu.memory_space<vmem>>, vector<1x1536xf32>
    %115 = vector.broadcast %114 : vector<1x1536xf32> to vector<8x1536xf32>
    %116 = arith.mulf %113, %115 : vector<8x1536xf32>
    %c40 = arith.constant 40 : index
    %c0_54 = arith.constant 0 : index
    %117 = vector.load %arg9[%c40, %c0_54] : memref<72x1536xf32, #tpu.memory_space<vmem>>, vector<8x1536xf32>
    tpu.vector_store %arg9[%c40, %c0_54], %116 {strides = array<i32>} : memref<72x1536xf32, #tpu.memory_space<vmem>>, vector<8x1536xf32>,
    %c1521_i32_55 = arith.constant 1521 : i32
    %118 = tpu.dynamic_rotate %91 by %c1521_i32_55 dim 1 : vector<8x1536xf32>, i32 -> vector<8x1536xf32>
    %c24_56 = arith.constant 24 : index
    %c0_57 = arith.constant 0 : index
    %119 = vector.load %arg2[%c24_56, %c0_57] : memref<27x1536xf32, #tpu.memory_space<vmem>>, vector<1x1536xf32>
    %120 = vector.broadcast %119 : vector<1x1536xf32> to vector<8x1536xf32>
    %121 = arith.mulf %118, %120 : vector<8x1536xf32>
    %c48 = arith.constant 48 : index
    %c0_58 = arith.constant 0 : index
    %122 = vector.load %arg9[%c48, %c0_58] : memref<72x1536xf32, #tpu.memory_space<vmem>>, vector<8x1536xf32>
    tpu.vector_store %arg9[%c48, %c0_58], %121 {strides = array<i32>} : memref<72x1536xf32, #tpu.memory_space<vmem>>, vector<8x1536xf32>,
    %c1520_i32_59 = arith.constant 1520 : i32
    %123 = tpu.dynamic_rotate %91 by %c1520_i32_59 dim 1 : vector<8x1536xf32>, i32 -> vector<8x1536xf32>
    %c25 = arith.constant 25 : index
    %c0_60 = arith.constant 0 : index
    %124 = vector.load %arg2[%c25, %c0_60] : memref<27x1536xf32, #tpu.memory_space<vmem>>, vector<1x1536xf32>
    %125 = vector.broadcast %124 : vector<1x1536xf32> to vector<8x1536xf32>
    %126 = arith.mulf %123, %125 : vector<8x1536xf32>
    %c56 = arith.constant 56 : index
    %c0_61 = arith.constant 0 : index
    %127 = vector.load %arg9[%c56, %c0_61] : memref<72x1536xf32, #tpu.memory_space<vmem>>, vector<8x1536xf32>
    tpu.vector_store %arg9[%c56, %c0_61], %126 {strides = array<i32>} : memref<72x1536xf32, #tpu.memory_space<vmem>>, vector<8x1536xf32>,
    %c1519_i32_62 = arith.constant 1519 : i32
    %128 = tpu.dynamic_rotate %91 by %c1519_i32_62 dim 1 : vector<8x1536xf32>, i32 -> vector<8x1536xf32>
    %c26 = arith.constant 26 : index
    %c0_63 = arith.constant 0 : index
    %129 = vector.load %arg2[%c26, %c0_63] : memref<27x1536xf32, #tpu.memory_space<vmem>>, vector<1x1536xf32>
    %130 = vector.broadcast %129 : vector<1x1536xf32> to vector<8x1536xf32>
    %131 = arith.mulf %128, %130 : vector<8x1536xf32>
    %c64 = arith.constant 64 : index
    %c0_64 = arith.constant 0 : index
    %132 = vector.load %arg9[%c64, %c0_64] : memref<72x1536xf32, #tpu.memory_space<vmem>>, vector<8x1536xf32>
    tpu.vector_store %arg9[%c64, %c0_64], %131 {strides = array<i32>} : memref<72x1536xf32, #tpu.memory_space<vmem>>, vector<8x1536xf32>,
    %c0_65 = arith.constant 0 : index
    %c0_66 = arith.constant 0 : index
    %133 = vector.load %arg3[%c0_65, %c0_66] : memref<16x72xf32, #tpu.memory_space<vmem>>, vector<16x72xf32>
    %c0_67 = arith.constant 0 : index
    %c0_68 = arith.constant 0 : index
    %134 = vector.load %arg9[%c0_67, %c0_68] : memref<72x1536xf32, #tpu.memory_space<vmem>>, vector<72x1536xf32>
    %cst = arith.constant dense<0.000000e+00> : vector<16x1536xf32>
    %135 = tpu.matmul %133, %134, %cst {dimension_numbers = #tpu.dot_dimension_numbers<[1], [0], [0], [1], [0, 0, 1, 1], [], []>} : vector<16x72xf32>, vector<72x1536xf32>, vector<16x1536xf32> -> vector<16x1536xf32>
    %c0_69 = arith.constant 0 : index
    %c0_70 = arith.constant 0 : index
    %136 = vector.load %arg4[%c0_69, %c0_70] : memref<16x1xf32, #tpu.memory_space<vmem>>, vector<16x1xf32>
    %137 = vector.broadcast %136 : vector<16x1xf32> to vector<16x1536xf32>
    %138 = arith.addf %135, %137 : vector<16x1536xf32>
    %cst_71 = arith.constant 0.000000e+00 : f32
    %139 = vector.broadcast %cst_71 : f32 to vector<16x1536xf32>
    %140 = arith.maximumf %138, %139 : vector<16x1536xf32>
    %c0_72 = arith.constant 0 : index
    %c0_73 = arith.constant 0 : index
    %141 = vector.load %arg5[%c0_72, %c0_73] : memref<4x16xf32, #tpu.memory_space<vmem>>, vector<4x16xf32>
    %cst_74 = arith.constant dense<0.000000e+00> : vector<4x1536xf32>
    %142 = tpu.matmul %141, %140, %cst_74 {dimension_numbers = #tpu.dot_dimension_numbers<[1], [0], [0], [1], [0, 0, 1, 1], [], []>} : vector<4x16xf32>, vector<16x1536xf32>, vector<4x1536xf32> -> vector<4x1536xf32>
    %c0_75 = arith.constant 0 : index
    %c0_76 = arith.constant 0 : index
    %143 = vector.load %arg6[%c0_75, %c0_76] : memref<4x1xf32, #tpu.memory_space<vmem>>, vector<4x1xf32>
    %144 = vector.broadcast %143 : vector<4x1xf32> to vector<4x1536xf32>
    %145 = arith.addf %142, %144 : vector<4x1536xf32>
    %c0_77 = arith.constant 0 : index
    %c0_78 = arith.constant 0 : index
    %146 = vector.load %arg1[%c0_77, %c0_78] : memref<8x1536xf32, #tpu.memory_space<vmem>>, vector<4x1536xf32>
    %147 = arith.addf %146, %145 : vector<4x1536xf32>
    %c0_79 = arith.constant 0 : index
    %c0_80 = arith.constant 0 : index
    %148 = vector.load %arg8[%c0_79, %c0_80] : memref<8x1536xf32, #tpu.memory_space<vmem>>, vector<4x1536xf32>
    tpu.vector_store %arg8[%c0_79, %c0_80], %147 {strides = array<i32>} : memref<8x1536xf32, #tpu.memory_space<vmem>>, vector<4x1536xf32>,
    %c4_81 = arith.constant 4 : index
    %c0_82 = arith.constant 0 : index
    %149 = vector.load %arg8[%c4_81, %c0_82] : memref<8x1536xf32, #tpu.memory_space<vmem>>, vector<4x1536xf32>
    tpu.vector_store %arg8[%c4_81, %c0_82], %45 {strides = array<i32>} : memref<8x1536xf32, #tpu.memory_space<vmem>>, vector<4x1536xf32>,
    %c0_83 = arith.constant 0 : index
    %c0_84 = arith.constant 0 : index
    %150 = vector.load %arg8[%c0_83, %c0_84] : memref<8x1536xf32, #tpu.memory_space<vmem>>, vector<8x1536xf32>
    %c0_85 = arith.constant 0 : index
    %c0_86 = arith.constant 0 : index
    %151 = vector.load %arg7[%c0_85, %c0_86] : memref<8x1536xf32, #tpu.memory_space<vmem>>, vector<8x1536xf32>
    tpu.vector_store %arg7[%c0_85, %c0_86], %150 {strides = array<i32>} : memref<8x1536xf32, #tpu.memory_space<vmem>>, vector<8x1536xf32>,
    return
  }
  func.func @transform_0(%arg0: i32) -> (i32, i32) {
    %c0_i32 = arith.constant 0 : i32
    %c0_i32_0 = arith.constant 0 : i32
    return %c0_i32, %arg0 : i32, i32
  }
  func.func @transform_1(%arg0: i32) -> (i32, i32) {
    %c0_i32 = arith.constant 0 : i32
    %c0_i32_0 = arith.constant 0 : i32
    return %c0_i32, %arg0 : i32, i32
  }
  func.func @transform_2(%arg0: i32) -> (i32, i32) {
    %c0_i32 = arith.constant 0 : i32
    %c0_i32_0 = arith.constant 0 : i32
    %c0_i32_1 = arith.constant 0 : i32
    return %c0_i32, %c0_i32_0 : i32, i32
  }
  func.func @transform_3(%arg0: i32) -> (i32, i32) {
    %c0_i32 = arith.constant 0 : i32
    %c0_i32_0 = arith.constant 0 : i32
    %c0_i32_1 = arith.constant 0 : i32
    return %c0_i32, %c0_i32_0 : i32, i32
  }
  func.func @transform_4(%arg0: i32) -> (i32, i32) {
    %c0_i32 = arith.constant 0 : i32
    %c0_i32_0 = arith.constant 0 : i32
    %c0_i32_1 = arith.constant 0 : i32
    return %c0_i32, %c0_i32_0 : i32, i32
  }
  func.func @transform_5(%arg0: i32) -> (i32, i32) {
    %c0_i32 = arith.constant 0 : i32
    %c0_i32_0 = arith.constant 0 : i32
    %c0_i32_1 = arith.constant 0 : i32
    return %c0_i32, %c0_i32_0 : i32, i32
  }
  func.func @transform_6(%arg0: i32) -> (i32, i32) {
    %c0_i32 = arith.constant 0 : i32
    %c0_i32_0 = arith.constant 0 : i32
    return %c0_i32, %arg0 : i32, i32
  }
}

</mosaic_0001>

<bundles_post_ra>
// kernel: primal_block.1
= control target key start
LH: loop header
LB: loop body
LE: loop exit
PB: predicated region body
PF: predicated region fallthrough
CT: control target
= control target key end

     0   :  { %s4859_s27 = smov 17   ;;  %s4860_s20 = smov 16   ;;  %v76_v50 = vlaneseq  ;;  %vm3614_vm8 = vcmask 588800   ;;  %vm4114_vm9 = vcmask 130048   ;;  %s8536_s0 = inlined_call_operand.vmem [shape: f32[8,1536], index: 0, kind: input, shape index: {}, may-alias: {0,6}]   ;;  %s8537_s1 = inlined_call_operand.vmem [shape: f32[27,1536], index: 1, kind: input, shape index: {}]   ;;  %s8538_s3 = inlined_call_operand.vmem [shape: f32[16,1], index: 3, kind: input, shape index: {}]   ;;  %s8539_s5 = inlined_call_operand.vmem [shape: f32[4,1], index: 5, kind: input, shape index: {}]   ;;  %s8540_s2 = inlined_call_operand.vmem [shape: f32[16,72], index: 2, kind: input, shape index: {}]   ;;  %s8541_s4 = inlined_call_operand.vmem [shape: f32[4,16], index: 4, kind: input, shape index: {}]   ;;  %s8542_s6 = inlined_call_operand.vmem [shape: f32[8,1536], index: 6, kind: output, shape index: {}, may-alias: {0,6}]  }
   0x1   :  { %v4907_v0 = vld [vmem:[%s8536_s0 + $0x10] sm:$0xf]  ;;  %v4912_v1 = vld [vmem:[%s8536_s0] sm:$0xf]  ;;  %v4917_v2 = vld [vmem:[%s8536_s0 + $0x18] sm:$0xf] }
   0x2   :  { %56 = vrot.lane.b32.xlu1 %v4907_v0, %s4859_s27  ;;  %v2410_v3 = vrot.slane %v4907_v0, 4  ;;  %52 = vrot.lane.b32.xlu0 %v4912_v1, %s4859_s27  ;;  %v2408_v4 = vrot.slane %v4912_v1, 4  ;;  %v2411_v5 = vrot.slane %v4917_v2, 4  ;;  %v4929_v6 = vld [vmem:[%s8536_s0 + $0x8] sm:$0xf]  ;;  %s4861_s23 = smov 15  }
   0x3   :  { %v2409_v7 = vrot.slane %v4929_v6, 4  ;;  %v4935_v8 = vld [vmem:[%s8536_s0 + $0x58] sm:$0xf]  ;;  %v4940_v9 = vld [vmem:[%s8536_s0 + $0x50] sm:$0xf]  ;;  %s4862_s24 = smov 1  }
   0x4   :  { %2434 = vst [vmem:[#allocation2 + $0x10] sm:$0xf0] %v2410_v3  ;;  %2432 = vst [vmem:[#allocation2] sm:$0xf0] %v2408_v4  ;;  %v2419_v10 = vrot.slane %v4935_v8, 4  ;;  %v2418_v11 = vrot.slane %v4940_v9, 4 }
   0x5   :  { %2435 = vst [vmem:[#allocation2 + $0x18] sm:$0xf0] %v2411_v5  ;;  %v4947_v12 = vld [vmem:[%s8536_s0 + $0x48] sm:$0xf]  ;;  %v4952_v13 = vld [vmem:[%s8536_s0 + $0x20] sm:$0xf] }
   0x6   :  { %8669 = vst [vmem:[#allocation4_spill] sm:$0xff] %v4952_v13  ;;  %2433 = vst [vmem:[#allocation2 + $0x8] sm:$0xf0] %v2409_v7  ;;  %v2417_v14 = vrot.slane %v4947_v12, 4  ;;  %v2412_v15 = vrot.slane %v4952_v13, 4  ;;  %58 = vrot.lane.b32.xlu1 %v4917_v2, %s4859_s27  ;;  %54 = vrot.lane.b32.xlu0 %v4929_v6, %s4859_s27  ;;  %s4863_s25 = smov 127  }
   0x7   :  { %2443 = vst [vmem:[#allocation2 + $0x58] sm:$0xf0] %v2419_v10  ;;  %2442 = vst [vmem:[#allocation2 + $0x50] sm:$0xf0] %v2418_v11  ;;  %v4963_v16 = vld [vmem:[%s8536_s0 + $0x28] sm:$0xf] }
   0x8   :  { %2441 = vst [vmem:[#allocation2 + $0x48] sm:$0xf0] %v2417_v14  ;;  %2436 = vst [vmem:[#allocation2 + $0x20] sm:$0xf0] %v2412_v15  ;;  %v4968_v17 = vld [vmem:[%s8536_s0 + $0x30] sm:$0xf] }
   0x9   :  { %v2413_v18 = vrot.slane %v4963_v16, 4  ;;  %v2414_v19 = vrot.slane %v4968_v17, 4  ;;  %v4979_v20 = vld [vmem:[%s8536_s0 + $0x38] sm:$0xf]  ;;  %v5001_v22 = vld [vmem:[%s8536_s0 + $0x40] sm:$0xf] }
   0xa   :  { %74 = vrot.lane.b32.xlu1 %v4935_v8, %s4859_s27  ;;  %72 = vrot.lane.b32.xlu0 %v4940_v9, %s4859_s27  ;;  %v2415_v21 = vrot.slane %v4979_v20, 4  ;;  %v2416_v23 = vrot.slane %v5001_v22, 4  ;;  %s4864_s26 = smov 113   ;;  %s4865_s28 = smov 112   ;;  %v5204_v53 = vshrl.u32 %v76_v50, 7 }
   0xb   :  { %2437 = vst [vmem:[#allocation2 + $0x28] sm:$0xf0] %v2413_v18  ;;  %2438 = vst [vmem:[#allocation2 + $0x30] sm:$0xf0] %v2414_v19  ;;  %s4866_s29 = smov 111   ;;  %v5271_v19 = vand.u32 127, %v76_v50 }
   0xc   :  { %2439 = vst [vmem:[#allocation2 + $0x38] sm:$0xf0] %v2415_v21  ;;  %2440 = vst [vmem:[#allocation2 + $0x40] sm:$0xf0] %v2416_v23  ;;  %v5221_v58 = vsub.s32 3, %v5204_v53  ;;  %v5224_v59 = vsub.s32 1, %v5204_v53 }
   0xd   :  { %8678 = vst [vmem:[#allocation13_spill] sm:$0xff] %v5204_v53  ;;  %v47_v56 = vld [vmem:[%s8537_s1] ss:$8 sm:$0xf]  ;;  %v5227_v60 = vsub.s32 2, %v5204_v53  ;;  %v5230_v61 = vsub.s32 0, %v5204_v53 }
   0xe   :  { %173 = vrot.lane.b32.xlu1 %v4929_v6, %s4860_s20  ;;  %171 = vrot.lane.b32.xlu0 %v4912_v1, %s4860_s20  ;;  %v48_v57 = vld [vmem:[%s8537_s1] ss:$8 sm:$0xf0]  ;;  %8681 = vst [vmem:[#allocation16_spill] sm:$0xff] %v5221_v58  ;;  %8682 = vst [vmem:[#allocation17_spill] sm:$0xff] %v5224_v59  ;;  %vm195_vm0 = vcmp.lt.s32.totalorder %v5271_v19, 16 }
   0xf   :  { %8683 = vst [vmem:[#allocation18_spill] sm:$0xff] %v5227_v60  ;;  %v4621_v3 = vld [vmem:[%s8537_s1 + $0x1] ss:$8 sm:$0xf]  ;;  %v5242_v5 = vor.u32 %v48_v57, %v47_v56  ;;  %vm78_vm1 = vcmp.lt.s32.totalorder %v5271_v19, 17  ;;  %vm324_vm2 = vcmp.lt.s32.totalorder %v5271_v19, 15 }
  0x10   :  { %v4622_v4 = vld [vmem:[%s8537_s1 + $0x1] ss:$8 sm:$0xf0]  ;;  %v4624_v7 = vld [vmem:[%s8537_s1 + $0x2] ss:$8 sm:$0xf] }
  0x11   :  { %v4625_v10 = vld [vmem:[%s8537_s1 + $0x2] ss:$8 sm:$0xf0]  ;;  %v4630_v11 = vld [vmem:[%s8537_s1 + $0x4] ss:$8 sm:$0xf] }
  0x12   :  { %177 = vrot.lane.b32.xlu1 %v4917_v2, %s4860_s20  ;;  %175 = vrot.lane.b32.xlu0 %v4907_v0, %s4860_s20  ;;  %v4631_v14 = vld [vmem:[%s8537_s1 + $0x4] ss:$8 sm:$0xf0]  ;;  %v5263_v15 = vld [vmem:[%s8537_s1 + $0x40] ss:$8 sm:$0xf]  ;;  %v5280_v56 = vor.u32 %v4625_v10, %v4624_v7 }
  0x13   :  { %v5276_v21 = vld [vmem:[%s8537_s1 + $0x41] ss:$8 sm:$0xf]  ;;  %v4627_v57 = vld [vmem:[%s8537_s1 + $0x3] ss:$8 sm:$0xf]  ;;  %v5288_v50 = vor.u32 %v4631_v14, %v4630_v11 }
  0x14   :  { %8688 = vst [vmem:[#allocation23_spill] sm:$0xff] %v5276_v21  ;;  %v5313_v7 = vld [vmem:[%s8537_s1 + $0x42] ss:$8 sm:$0xf]  ;;  %vm453_vm3 = vcmp.lt.s32.totalorder %v5271_v19, 1  ;;  %vm674_vm4 = vcmp.lt.s32.totalorder %v5271_v19, 127 }
  0x15   :  { %8689 = vst [vmem:[#allocation24_spill] sm:$0xff] %v5288_v50  ;;  %8690 = vst [vmem:[#allocation25_spill] sm:$0xff] %v5313_v7  ;;  %v4632_v11 = vld [vmem:[%s8537_s1 + $0x44] ss:$8 sm:$0xf]  ;;  %vm803_vm5 = vcmp.lt.s32.totalorder %v5271_v19, 113 }
  0x16   :  { %193 = vrot.lane.b32.xlu1 %v4935_v8, %s4860_s20  ;;  %191 = vrot.lane.b32.xlu0 %v4940_v9, %s4860_s20  ;;  %v4634_v14 = vld [vmem:[%s8537_s1 + $0x5] ss:$8 sm:$0xf0]  ;;  %v4637_v53 = vld [vmem:[%s8537_s1 + $0x6] ss:$8 sm:$0xf0] }
  0x17   :  { %vm932_vm6 = vcmp.lt.s32.totalorder %v5271_v19, 112  ;;  %vm1061_vm7 = vcmp.lt.s32.totalorder %v5271_v19, 111 }
  0x1a   :  { %189 = vrot.lane.b32.xlu1 %v4947_v12, %s4860_s20  ;;  %70 = vrot.lane.b32.xlu0 %v4947_v12, %s4859_s27 }
  0x1e   :  { %302 = vrot.lane.b32.xlu1 %v4929_v6, %s4861_s23  ;;  %300 = vrot.lane.b32.xlu0 %v4912_v1, %s4861_s23 }
  0x22   :  { %306 = vrot.lane.b32.xlu1 %v4917_v2, %s4861_s23  ;;  %304 = vrot.lane.b32.xlu0 %v4907_v0, %s4861_s23 }
  0x26   :  { %322 = vrot.lane.b32.xlu1 %v4935_v8, %s4861_s23  ;;  %320 = vrot.lane.b32.xlu0 %v4940_v9, %s4861_s23 }
  0x2a   :  { %429 = vrot.lane.b32.xlu1 %v4912_v1, %s4862_s24  ;;  %318 = vrot.lane.b32.xlu0 %v4947_v12, %s4861_s23 }
  0x2e   :  { %433 = vrot.lane.b32.xlu1 %v4907_v0, %s4862_s24  ;;  %431 = vrot.lane.b32.xlu0 %v4929_v6, %s4862_s24 }
  0x32   :  { %449 = vrot.lane.b32.xlu1 %v4940_v9, %s4862_s24  ;;  %435 = vrot.lane.b32.xlu0 %v4917_v2, %s4862_s24 }
  0x36   :  { %447 = vrot.lane.b32.xlu1 %v4947_v12, %s4862_s24  ;;  %451 = vrot.lane.b32.xlu0 %v4935_v8, %s4862_s24 }
  0x3a   :  { %179 = vrot.lane.b32.xlu1 %v4952_v13, %s4860_s20  ;;  %60 = vrot.lane.b32.xlu0 %v4952_v13, %s4859_s27 }
  0x3e   :  { %652 = vrot.lane.b32.xlu1 %v4929_v6, %s4863_s25  ;;  %650 = vrot.lane.b32.xlu0 %v4912_v1, %s4863_s25 }
  0x42   :  { %656 = vrot.lane.b32.xlu1 %v4917_v2, %s4863_s25  ;;  %654 = vrot.lane.b32.xlu0 %v4907_v0, %s4863_s25 }
  0x46   :  { %672 = vrot.lane.b32.xlu1 %v4935_v8, %s4863_s25  ;;  %658 = vrot.lane.b32.xlu0 %v4952_v13, %s4863_s25 }
  0x4a   :  { %308 = vrot.lane.b32.xlu1 %v4952_v13, %s4861_s23  ;;  %670 = vrot.lane.b32.xlu0 %v4940_v9, %s4863_s25 }
  0x4e   :  { %781 = vrot.lane.b32.xlu1 %v4929_v6, %s4864_s26  ;;  %779 = vrot.lane.b32.xlu0 %v4912_v1, %s4864_s26 }
  0x52   :  { %785 = vrot.lane.b32.xlu1 %v4917_v2, %s4864_s26  ;;  %783 = vrot.lane.b32.xlu0 %v4907_v0, %s4864_s26 }
  0x56   :  { %801 = vrot.lane.b32.xlu1 %v4935_v8, %s4864_s26  ;;  %787 = vrot.lane.b32.xlu0 %v4952_v13, %s4864_s26 }
  0x5a   :  { %437 = vrot.lane.b32.xlu1 %v4952_v13, %s4862_s24  ;;  %799 = vrot.lane.b32.xlu0 %v4940_v9, %s4864_s26 }
  0x5e   :  { %910 = vrot.lane.b32.xlu1 %v4929_v6, %s4865_s28  ;;  %908 = vrot.lane.b32.xlu0 %v4912_v1, %s4865_s28 }
  0x62   :  { %914 = vrot.lane.b32.xlu1 %v4917_v2, %s4865_s28  ;;  %912 = vrot.lane.b32.xlu0 %v4907_v0, %s4865_s28 }
  0x66   :  { %930 = vrot.lane.b32.xlu1 %v4935_v8, %s4865_s28  ;;  %916 = vrot.lane.b32.xlu0 %v4952_v13, %s4865_s28 }
  0x6a   :  { %1037 = vrot.lane.b32.xlu1 %v4912_v1, %s4866_s29  ;;  %928 = vrot.lane.b32.xlu0 %v4940_v9, %s4865_s28 }
  0x6e   :  { %1041 = vrot.lane.b32.xlu1 %v4907_v0, %s4866_s29  ;;  %1039 = vrot.lane.b32.xlu0 %v4929_v6, %s4866_s29 }
  0x72   :  { %1045 = vrot.lane.b32.xlu1 %v4952_v13, %s4866_s29  ;;  %1043 = vrot.lane.b32.xlu0 %v4917_v2, %s4866_s29  ;;  %v607_v13 = vrot.slane %v4632_v11, %v5221_v58 }
  0x74   :  { %v5092_v24 = vpop.permute.xlu1 %56  ;;  %v5094_v25 = vpop.permute.xlu0 %52 }
  0x76   :  { %1057 = vrot.lane.b32.xlu1 %v4940_v9, %s4866_s29  ;;  %1059 = vrot.lane.b32.xlu0 %v4935_v8, %s4866_s29 }
  0x78   :  { %v5100_v26 = vpop.permute.xlu1 %58  ;;  %v5102_v27 = vpop.permute.xlu0 %54 }
  0x79   :  { %8670 = vst [vmem:[#allocation5_spill] sm:$0xff] %v5100_v26 }
  0x7a   :  { %181 = vrot.lane.b32.xlu1 %v4963_v16, %s4860_s20  ;;  %62 = vrot.lane.b32.xlu0 %v4963_v16, %s4859_s27 }
  0x7c   :  { %v5108_v28 = vpop.permute.xlu1 %74  ;;  %v5110_v29 = vpop.permute.xlu0 %72 }
  0x7e   :  { %64 = vrot.lane.b32.xlu1 %v4968_v17, %s4859_s27  ;;  %660 = vrot.lane.b32.xlu0 %v4963_v16, %s4863_s25 }
  0x80   :  { %v5116_v30 = vpop.permute.xlu1 %173  ;;  %v5118_v31 = vpop.permute.xlu0 %171 }
  0x82   :  { %183 = vrot.lane.b32.xlu1 %v4968_v17, %s4860_s20  ;;  %66 = vrot.lane.b32.xlu0 %v4979_v20, %s4859_s27 }
  0x84   :  { %v5124_v32 = vpop.permute.xlu1 %177  ;;  %v5126_v33 = vpop.permute.xlu0 %175 }
  0x85   :  { %8671 = vst [vmem:[#allocation6_spill] sm:$0xff] %v5124_v32 }
  0x86   :  { %310 = vrot.lane.b32.xlu1 %v4963_v16, %s4861_s23  ;;  %185 = vrot.lane.b32.xlu0 %v4979_v20, %s4860_s20 }
  0x88   :  { %v5132_v34 = vpop.permute.xlu1 %193  ;;  %v5134_v35 = vpop.permute.xlu0 %191 }
  0x8a   :  { %312 = vrot.lane.b32.xlu1 %v4968_v17, %s4861_s23  ;;  %789 = vrot.lane.b32.xlu0 %v4963_v16, %s4864_s26 }
  0x8c   :  { %v5140_v36 = vpop.permute.xlu1 %189  ;;  %v5142_v37 = vpop.permute.xlu0 %70 }
  0x8d   :  { %8672 = vst [vmem:[#allocation7_spill] sm:$0xff] %v5140_v36  ;;  %8673 = vst [vmem:[#allocation8_spill] sm:$0xff] %v5142_v37 }
  0x8e   :  { %439 = vrot.lane.b32.xlu1 %v4963_v16, %s4862_s24  ;;  %314 = vrot.lane.b32.xlu0 %v4979_v20, %s4861_s23 }
  0x90   :  { %v5148_v38 = vpop.permute.xlu1 %302  ;;  %v5150_v39 = vpop.permute.xlu0 %300 }
  0x92   :  { %441 = vrot.lane.b32.xlu1 %v4968_v17, %s4862_s24  ;;  %918 = vrot.lane.b32.xlu0 %v4963_v16, %s4865_s28 }
  0x94   :  { %v5156_v40 = vpop.permute.xlu1 %306  ;;  %v5158_v41 = vpop.permute.xlu0 %304 }
  0x96   :  { %1047 = vrot.lane.b32.xlu1 %v4963_v16, %s4866_s29  ;;  %443 = vrot.lane.b32.xlu0 %v4979_v20, %s4862_s24  ;;  %v5265_v16 = vor.u32 %v4622_v4, %v4621_v3  ;;  %v4628_v3 = vld [vmem:[%s8537_s1 + $0x3] ss:$8 sm:$0xf0] }
  0x97   :  { %v5326_v4 = vor.u32 %v4628_v3, %v4627_v57  ;;  %v567_v57 = vrot.slane %v5288_v50, %v5224_v59  ;;  %v5365_v3 = vld [vmem:[%s8537_s1 + $0x43] ss:$8 sm:$0xf] }
  0x98   :  { %v5164_v42 = vpop.permute.xlu1 %322  ;;  %v5166_v43 = vpop.permute.xlu0 %320  ;;  %8693 = vst [vmem:[#allocation28_spill] sm:$0xff] %v5365_v3 }
  0x9a   :  { %68 = vrot.lane.b32.xlu1 %v5001_v22, %s4859_s27  ;;  %662 = vrot.lane.b32.xlu0 %v4968_v17, %s4863_s25 }
  0x9c   :  { %v5172_v44 = vpop.permute.xlu1 %429  ;;  %v5174_v45 = vpop.permute.xlu0 %318 }
  0x9d   :  { %8674 = vst [vmem:[#allocation9_spill] sm:$0xff] %v5174_v45 }
  0x9e   :  { %664 = vrot.lane.b32.xlu1 %v4979_v20, %s4863_s25  ;;  %187 = vrot.lane.b32.xlu0 %v5001_v22, %s4860_s20 }
  0xa0   :  { %v5180_v46 = vpop.permute.xlu1 %433  ;;  %v5182_v47 = vpop.permute.xlu0 %431 }
  0xa2   :  { %791 = vrot.lane.b32.xlu1 %v4968_v17, %s4864_s26  ;;  %666 = vrot.lane.b32.xlu0 %v5001_v22, %s4863_s25 }
  0xa4   :  { %v5188_v48 = vpop.permute.xlu1 %449  ;;  %v5190_v49 = vpop.permute.xlu0 %435 }
  0xa5   :  { %8675 = vst [vmem:[#allocation10_spill] sm:$0xff] %v5188_v48  ;;  %8676 = vst [vmem:[#allocation11_spill] sm:$0xff] %v5190_v49 }
  0xa6   :  { %793 = vrot.lane.b32.xlu1 %v4979_v20, %s4864_s26  ;;  %316 = vrot.lane.b32.xlu0 %v5001_v22, %s4861_s23 }
  0xa8   :  { %v5196_v51 = vpop.permute.xlu1 %447  ;;  %v5198_v52 = vpop.permute.xlu0 %451 }
  0xa9   :  { %8677 = vst [vmem:[#allocation12_spill] sm:$0xff] %v5196_v51  ;;  %v204_v51 = vsel %vm195_vm0, %v5126_v33, %v5124_v32 }
  0xaa   :  { %920 = vrot.lane.b32.xlu1 %v4968_v17, %s4865_s28  ;;  %795 = vrot.lane.b32.xlu0 %v5001_v22, %s4864_s26 }
  0xac   :  { %v5206_v54 = vpop.permute.xlu1 %179  ;;  %v5208_v55 = vpop.permute.xlu0 %60 }
  0xad   :  { %8679 = vst [vmem:[#allocation14_spill] sm:$0xff] %v5206_v54  ;;  %8680 = vst [vmem:[#allocation15_spill] sm:$0xff] %v5208_v55  ;;  %v4636_v54 = vld [vmem:[%s8537_s1 + $0x6] ss:$8 sm:$0xf]  ;;  %v563_v55 = vrot.slane %v5288_v50, %v5230_v61 }
  0xae   :  { %922 = vrot.lane.b32.xlu1 %v4979_v20, %s4865_s28  ;;  %445 = vrot.lane.b32.xlu0 %v5001_v22, %s4862_s24 }
  0xb0   :  { %v5232_v62 = vpop.permute.xlu1 %652  ;;  %v5234_v63 = vpop.permute.xlu0 %650 }
  0xb1   :  { %8684 = vst [vmem:[#allocation19_spill] sm:$0xff] %v5232_v62  ;;  %8685 = vst [vmem:[#allocation20_spill] sm:$0xff] %v5234_v63  ;;  %v4639_v63 = vld [vmem:[%s8537_s1 + $0x7] ss:$8 sm:$0xf]  ;;  %v8700_v62 = vrot.slane %v5265_v16, %v5224_v59 }
  0xb2   :  { %1049 = vrot.lane.b32.xlu1 %v4968_v17, %s4866_s29  ;;  %924 = vrot.lane.b32.xlu0 %v5001_v22, %s4865_s28 }
  0xb4   :  { %v5267_v18 = vpop.permute.xlu1 %656  ;;  %v5269_v17 = vpop.permute.xlu0 %654 }
  0xb5   :  { %8686 = vst [vmem:[#allocation21_spill] sm:$0xff] %v5267_v18  ;;  %8687 = vst [vmem:[#allocation22_spill] sm:$0xff] %v5269_v17  ;;  %v603_v18 = vrot.slane %v4632_v11, %v5227_v60  ;;  %v5394_v11 = vor.u32 %v4637_v53, %v4636_v54  ;;  %v5414_v53 = vld [vmem:[%s8537_s1 + $0x45] ss:$8 sm:$0xf]  ;;  %v5418_v54 = vmul.f32 %v563_v55, %v4912_v1 }
  0xb6   :  { %1053 = vrot.lane.b32.xlu1 %v5001_v22, %s4866_s29  ;;  %1051 = vrot.lane.b32.xlu0 %v4979_v20, %s4866_s29  ;;  %v4633_v22 = vld [vmem:[%s8537_s1 + $0x5] ss:$8 sm:$0xf]  ;;  %v571_v20 = vrot.slane %v5288_v50, %v5227_v60  ;;  %8696 = vst [vmem:[#allocation31_spill] sm:$0xff] %v5414_v53 }
  0xb7   :  { %v5383_v48 = vor.u32 %v4634_v14, %v4633_v22  ;;  %v4640_v22 = vld [vmem:[%s8537_s1 + $0x7] ss:$8 sm:$0xf0]  ;;  %v4643_v55 = vld [vmem:[%s8537_s1 + $0x60] ss:$8 sm:$0xf0] }
  0xb8   :  { %v5315_v10 = vpop.permute.xlu1 %672  ;;  %v5317_v23 = vpop.permute.xlu0 %658 }
  0xb9   :  { %8691 = vst [vmem:[#allocation26_spill] sm:$0xff] %v5315_v10  ;;  %8692 = vst [vmem:[#allocation27_spill] sm:$0xff] %v5317_v23  ;;  %v575_v10 = vrot.slane %v5288_v50, %v5221_v58  ;;  %v5436_v50 = vld [vmem:[%s8537_s1 + $0x46] ss:$8 sm:$0xf] }
  0xba   :  { %797 = vrot.lane.b32.xlu1 %v4947_v12, %s4864_s26  ;;  %668 = vrot.lane.b32.xlu0 %v4947_v12, %s4863_s25  ;;  %8698 = vst [vmem:[#allocation33_spill] sm:$0xff] %v5436_v50 }
  0xbb   :  { %v5424_v14 = vmul.f32 %v575_v10, %v4917_v2  ;;  %v5472_v10 = vld [vmem:[%s8537_s1 + $0x47] ss:$8 sm:$0xf] }
  0xbc   :  { %v5372_v23 = vpop.permute.xlu1 %308  ;;  %v5375_v17 = vpop.permute.xlu0 %670  ;;  %8699 = vst [vmem:[#allocation34_spill] sm:$0xff] %v5472_v10  ;;  %v8707_v10 = vrot.slane %v5242_v5, %v5230_v61 }
  0xbd   :  { %8694 = vst [vmem:[#allocation29_spill] sm:$0xff] %v5372_v23  ;;  %8695 = vst [vmem:[#allocation30_spill] sm:$0xff] %v5375_v17  ;;  %v5388_v23 = vmul.f32 %v567_v57, %v4929_v6  ;;  %v5421_v6 = vmul.f32 %v607_v13, %v4935_v8  ;;  %v5427_v57 = vmul.f32 %v603_v18, %v4940_v9  ;;  %v4642_v13 = vld [vmem:[%s8537_s1 + $0x60] ss:$8 sm:$0xf] }
  0xbe   :  { %1055 = vrot.lane.b32.xlu1 %v4947_v12, %s4866_s29  ;;  %926 = vrot.lane.b32.xlu0 %v4947_v12, %s4865_s28  ;;  %v5409_v12 = vmul.f32 %v571_v20, %v4907_v0  ;;  %v5444_v9 = vor.u32 %v4640_v22, %v4639_v63  ;;  %v206_v63 = vsel %vm195_vm0, %v5118_v31, %v5116_v30 }
  0xbf   :  { %8697 = vst [vmem:[#allocation32_spill] sm:$0xff] %v5427_v57  ;;  %v205_v8 = vsel %vm195_vm0, %v5116_v30, %v5126_v33  ;;  %v5488_v22 = vor.u32 %v4643_v55, %v4642_v13  ;;  %v88_v13 = vsel %vm78_vm1, %v5102_v27, %v5092_v24  ;;  %v89_v55 = vsel %vm78_vm1, %v5094_v25, %v5102_v27 }
  0xc0   :  { %v5429_v0 = vpop.permute.xlu1 %781  ;;  %v5431_v20 = vpop.permute.xlu0 %779  ;;  %v87_v57 = vsel %vm78_vm1, %v5092_v24, %v5100_v26  ;;  %v90_v30 = vsel %vm78_vm1, %v5108_v28, %v5094_v25  ;;  %v271_v27 = vmul.f32 %v8700_v62, %v206_v63  ;;  %v8701_v33 = vrot.slane %v5265_v16, %v5227_v60 }
  0xc1   :  { %v79_v18 = vsel %vm78_vm1, %v5110_v29, %v5108_v28  ;;  %v8702_v24 = vrot.slane %v5265_v16, %v5221_v58  ;;  %v8705_v28 = vrot.slane %v5242_v5, %v5227_v60  ;;  %v8706_v62 = vrot.slane %v5242_v5, %v5221_v58 }
  0xc2   :  { %v272_v32 = vmul.f32 %v8701_v33, %v205_v8  ;;  %v8704_v8 = vrot.slane %v5242_v5, %v5224_v59 }
  0xc3   :  { %v273_v26 = vmul.f32 %v8702_v24, %v204_v51  ;;  %v155_v17 = vmul.f32 %v8705_v28, %v88_v13  ;;  %v207_v51 = vsel %vm195_vm0, %v5132_v34, %v5118_v31  ;;  %v156_v63 = vmul.f32 %v8706_v62, %v87_v57 }
  0xc4   :  { %v5482_v2 = vpop.permute.xlu1 %785  ;;  %v5484_v1 = vpop.permute.xlu0 %783  ;;  %v154_v33 = vmul.f32 %v8704_v8, %v89_v55  ;;  %v153_v55 = vmul.f32 %v8707_v10, %v90_v30  ;;  %v196_v13 = vsel %vm195_vm0, %v5134_v35, %v5132_v34  ;;  %v8708_v31 = vrot.slane %v5263_v15, %v5221_v58 }
  0xc5   :  { %v335_v57 = vsel %vm324_vm2, %v5150_v39, %v5148_v38  ;;  %v285_v10 = vadd.f32 %v273_v26, %v156_v63  ;;  %v8709_v34 = vrot.slane %v5265_v16, %v5230_v61  ;;  %v197_v62 = vsel %vm195_vm0, %v5140_v36, %v5134_v35 }
  0xc6   :  { %v164_v28 = vmul.f32 %v8708_v31, %v79_v18  ;;  %v283_v24 = vadd.f32 %v271_v27, %v154_v33  ;;  %v8711_v26 = vrot.slane %v5276_v21, %v5221_v58  ;;  %v333_v63 = vsel %vm324_vm2, %v5158_v41, %v5156_v40 }
  0xc7   :  { %v270_v30 = vmul.f32 %v8709_v34, %v207_v51  ;;  %v336_v35 = vsel %vm324_vm2, %v5164_v42, %v5150_v39  ;;  %v80_v33 = vsel %vm78_vm1, %v5142_v37, %v5110_v29  ;;  %v8712_v51 = vrot.slane %v5280_v56, %v5224_v59  ;;  %v8721_v37 = vld [vmem:[#allocation10_spill] sm:$0xff] }
  0xc8   :  { %v5533_v50 = vpop.permute.xlu1 %801  ;;  %v5535_v25 = vpop.permute.xlu0 %787  ;;  %v281_v27 = vmul.f32 %v8711_v26, %v196_v13  ;;  %v463_v39 = vsel %vm453_vm3, %v5182_v47, %v5180_v46  ;;  %v8713_v31 = vrot.slane %v5276_v21, %v5227_v60  ;;  %v8714_v34 = vrot.slane %v5280_v56, %v5227_v60 }
  0xc9   :  { %8703 = vst [vmem:[#allocation35_spill] sm:$0xff] %v5533_v50  ;;  %v284_v50 = vadd.f32 %v272_v32, %v155_v17  ;;  %v334_v32 = vsel %vm324_vm2, %v5148_v38, %v5158_v41  ;;  %v464_v38 = vsel %vm453_vm3, %v5172_v44, %v5182_v47  ;;  %v400_v13 = vmul.f32 %v8712_v51, %v335_v57 }
  0xca   :  { %v325_v41 = vsel %vm324_vm2, %v5166_v43, %v5164_v42  ;;  %v280_v29 = vmul.f32 %v8713_v31, %v197_v62  ;;  %v401_v57 = vmul.f32 %v8714_v34, %v334_v32  ;;  %v462_v42 = vsel %vm453_vm3, %v5180_v46, %v5190_v49 }
  0xcb   :  { %v465_v47 = vsel %vm453_vm3, %v5198_v52, %v5172_v44  ;;  %v8715_v26 = vrot.slane %v5280_v56, %v5221_v58  ;;  %v8716_v62 = vrot.slane %v5280_v56, %v5230_v61  ;;  %v326_v32 = vsel %vm324_vm2, %v5174_v45, %v5166_v43 }
  0xcc   :  { %v5584_v17 = vpop.permute.xlu1 %437  ;;  %v5586_v18 = vpop.permute.xlu0 %799  ;;  %v8717_v46 = vrot.slane %v5326_v4, %v5224_v59  ;;  %v8720_v43 = vrot.slane %v5326_v4, %v5227_v60  ;;  %v412_v36 = vadd.f32 %v400_v13, %v283_v24  ;;  %v8722_v21 = vrot.slane %v5326_v4, %v5221_v58 }
  0xcd   :  { %8710 = vst [vmem:[#allocation36_spill] sm:$0xff] %v5586_v18  ;;  %v402_v51 = vmul.f32 %v8715_v26, %v333_v63  ;;  %v399_v31 = vmul.f32 %v8716_v62, %v336_v35  ;;  %v8718_v63 = vrot.slane %v5263_v15, %v5227_v60  ;;  %v8719_v35 = vrot.slane %v5313_v7, %v5221_v58 }
  0xce   :  { %v529_v34 = vmul.f32 %v8717_v46, %v464_v38  ;;  %v530_v45 = vmul.f32 %v8720_v43, %v463_v39  ;;  %v454_v38 = vsel %vm453_vm3, %v8721_v37, %v5198_v52  ;;  %v282_v46 = vadd.f32 %v270_v30, %v153_v55 }
  0xcf   :  { %v163_v26 = vmul.f32 %v8718_v63, %v80_v33  ;;  %v410_v62 = vmul.f32 %v8719_v35, %v325_v41  ;;  %v531_v15 = vmul.f32 %v8722_v21, %v462_v42  ;;  %v8723_v33 = vrot.slane %v5326_v4, %v5230_v61 }
  0xd0   :  { %v911_v8 = vpop.permute.xlu1 %910  ;;  %v5647_v44 = vpop.permute.xlu0 %908  ;;  %v293_v41 = vadd.f32 %v281_v27, %v164_v28  ;;  %v413_v35 = vadd.f32 %v401_v57, %v284_v50  ;;  %v8724_v39 = vrot.slane %v5313_v7, %v5227_v60  ;;  %v1091_v49 = vrot.slane %v5488_v22, %v5221_v58  ;;  %v5679_v50 = vld [vmem:[%s8537_s1 + $0xa0] ss:$8 sm:$0xf] }
  0xd1   :  { %v528_v63 = vmul.f32 %v8723_v33, %v465_v47  ;;  %v414_v52 = vadd.f32 %v402_v51, %v285_v10  ;;  %v411_v55 = vadd.f32 %v399_v31, %v282_v46  ;;  %v541_v24 = vadd.f32 %v529_v34, %v412_v36  ;;  %8726 = vst [vmem:[#allocation10_spill] sm:$0xff] %v5679_v50  ;;  %v8727_v47 = vld [vmem:[#allocation12_spill] sm:$0xff]  ;;  %v8728_v31 = vld [vmem:[#allocation19_spill] sm:$0xff] }
  0xd2   :  { %v409_v43 = vmul.f32 %v8724_v39, %v326_v32  ;;  %v8725_v30 = vrot.slane %v5365_v3, %v5221_v58  ;;  %v292_v28 = vadd.f32 %v280_v29, %v163_v26  ;;  %v422_v27 = vadd.f32 %v410_v62, %v293_v41  ;;  %v8729_v32 = vld [vmem:[#allocation20_spill] sm:$0xff]  ;;  %v8731_v29 = vld [vmem:[#allocation21_spill] sm:$0xff] }
  0xd3   :  { %v542_v57 = vadd.f32 %v530_v45, %v413_v35  ;;  %v455_v10 = vsel %vm453_vm3, %v8727_v47, %v8721_v37  ;;  %v543_v36 = vadd.f32 %v531_v15, %v414_v52  ;;  %v540_v51 = vadd.f32 %v528_v63, %v411_v55  ;;  %v8733_v35 = vld [vmem:[#allocation27_spill] sm:$0xff] }
  0xd4   :  { %v539_v21 = vmul.f32 %v8725_v30, %v454_v38  ;;  %v915_v13 = vpop.permute.xlu1 %914  ;;  %v913_v42 = vpop.permute.xlu0 %912  ;;  %v685_v34 = vsel %vm674_vm4, %v8729_v32, %v8728_v31  ;;  %v8730_v38 = vld [vmem:[#allocation22_spill] sm:$0xff]  ;;  %v421_v45 = vadd.f32 %v409_v43, %v292_v28  ;;  %v1119_v26 = vrot.slane %v5679_v50, %v5227_v60 }
  0xd5   :  { %v684_v46 = vsel %vm674_vm4, %v8728_v31, %v8730_v38  ;;  %v683_v37 = vsel %vm674_vm4, %v8730_v38, %v8731_v29  ;;  %v1123_v62 = vrot.slane %v5679_v50, %v5221_v58  ;;  %v8732_v15 = vrot.slane %v5365_v3, %v5227_v60 }
  0xd6   :  { %v551_v63 = vadd.f32 %v539_v21, %v422_v27  ;;  %v633_v41 = vadd.f32 %v5388_v23, %v541_v24  ;;  %v682_v39 = vsel %vm674_vm4, %v8731_v29, %v8733_v35  ;;  %v8734_v55 = vrot.slane %v5383_v48, %v5230_v61 }
  0xd7   :  { %v538_v33 = vmul.f32 %v8732_v15, %v455_v10  ;;  %v8735_v28 = vrot.slane %v5383_v48, %v5224_v59  ;;  %v814_v23 = vsel %vm803_vm5, %v5431_v20, %v5429_v0  ;;  %v813_v24 = vsel %vm803_vm5, %v5429_v0, %v5484_v1 }
  0xd8   :  { %v5710_v43 = vpop.permute.xlu1 %930  ;;  %v5712_v52 = vpop.permute.xlu0 %916  ;;  %v749_v30 = vmul.f32 %v8734_v55, %v685_v34  ;;  %v632_v21 = vadd.f32 %v5418_v54, %v540_v51  ;;  %v634_v27 = vadd.f32 %v5409_v12, %v542_v57  ;;  %v8736_v31 = vrot.slane %v5383_v48, %v5227_v60 }
  0xd9   :  { %v750_v10 = vmul.f32 %v8735_v28, %v684_v46  ;;  %v635_v38 = vadd.f32 %v5424_v14, %v543_v36  ;;  %v8737_v46 = vld [vmem:[#allocation26_spill] sm:$0xff]  ;;  %v8738_v15 = vrot.slane %v5383_v48, %v5221_v58  ;;  %v943_v54 = vsel %vm932_vm6, %v5647_v44, %v911_v8 }
  0xda   :  { %v751_v34 = vmul.f32 %v8736_v31, %v683_v37  ;;  %v686_v29 = vsel %vm674_vm4, %v8737_v46, %v8729_v32  ;;  %v942_v12 = vsel %vm932_vm6, %v911_v8, %v913_v42  ;;  %v8739_v0 = vrot.slane %v5394_v11, %v5230_v61 }
  0xdb   :  { %v752_v55 = vmul.f32 %v8738_v15, %v682_v39  ;;  %v812_v57 = vsel %vm803_vm5, %v5484_v1, %v5482_v2  ;;  %v8740_v36 = vrot.slane %v5394_v11, %v5224_v59  ;;  %v811_v32 = vsel %vm803_vm5, %v5482_v2, %v5535_v25 }
  0xdc   :  { %v878_v14 = vmul.f32 %v8739_v0, %v814_v23  ;;  %v5760_v37 = vpop.permute.xlu1 %1037  ;;  %v5762_v8 = vpop.permute.xlu0 %928  ;;  %v550_v39 = vadd.f32 %v538_v33, %v421_v45  ;;  %v761_v28 = vadd.f32 %v749_v30, %v632_v21  ;;  %v762_v23 = vadd.f32 %v750_v10, %v633_v41 }
  0xdd   :  { %v879_v51 = vmul.f32 %v8740_v36, %v813_v24  ;;  %8741 = vst [vmem:[#allocation19_spill] sm:$0xff] %v5762_v8  ;;  %v643_v31 = vadd.f32 %v5421_v6, %v551_v63  ;;  %v8742_v1 = vrot.slane %v5444_v9, %v5230_v61  ;;  %v941_v24 = vsel %vm932_vm6, %v913_v42, %v915_v13 }
  0xde   :  { %v8743_v0 = vrot.slane %v5444_v9, %v5224_v59  ;;  %v940_v36 = vsel %vm932_vm6, %v915_v13, %v5712_v52  ;;  %v763_v45 = vadd.f32 %v751_v34, %v634_v27  ;;  %v8744_v33 = vrot.slane %v5414_v53, %v5221_v58 }
  0xdf   :  { %v1007_v15 = vmul.f32 %v8742_v1, %v943_v54  ;;  %v8745_v63 = vrot.slane %v5394_v11, %v5227_v60  ;;  %v8746_v42 = vrot.slane %v5394_v11, %v5221_v58  ;;  %v764_v10 = vadd.f32 %v752_v55, %v635_v38 }
  0xe0   :  { %v1008_v2 = vmul.f32 %v8743_v0, %v942_v12  ;;  %v760_v6 = vmul.f32 %v8744_v33, %v686_v29  ;;  %v890_v21 = vadd.f32 %v878_v14, %v761_v28  ;;  %v891_v54 = vadd.f32 %v879_v51, %v762_v23  ;;  %v8747_v12 = vld [vmem:[#allocation35_spill] sm:$0xff]  ;;  %v1042_v27 = vpop.permute.xlu1 %1041  ;;  %v1040_v34 = vpop.permute.xlu0 %1039 }
  0xe1   :  { %v880_v41 = vmul.f32 %v8745_v63, %v812_v57  ;;  %v881_v30 = vmul.f32 %v8746_v42, %v811_v32  ;;  %v815_v13 = vsel %vm803_vm5, %v8747_v12, %v5431_v20  ;;  %v8748_v29 = vrot.slane %v5444_v9, %v5227_v60  ;;  %v8753_v63 = vld [vmem:[#allocation33_spill] sm:$0xff] }
  0xe2   :  { %v8749_v57 = vrot.slane %v5444_v9, %v5221_v58  ;;  %v1071_v38 = vsel %vm1061_vm7, %v1040_v34, %v1042_v27  ;;  %v1072_v55 = vsel %vm1061_vm7, %v5760_v37, %v1040_v34  ;;  %v1019_v14 = vadd.f32 %v1007_v15, %v890_v21 }
  0xe3   :  { %v1009_v1 = vmul.f32 %v8748_v29, %v941_v24  ;;  %v1020_v51 = vadd.f32 %v1008_v2, %v891_v54  ;;  %v8750_v20 = vrot.slane %v5488_v22, %v5230_v61  ;;  %v8751_v28 = vrot.slane %v5488_v22, %v5224_v59  ;;  %v8752_v24 = vld [vmem:[#allocation30_spill] sm:$0xff] }
  0xe4   :  { %v1010_v0 = vmul.f32 %v8749_v57, %v940_v36  ;;  %v675_v36 = vsel %vm674_vm4, %v8752_v24, %v8737_v46  ;;  %v892_v33 = vadd.f32 %v880_v41, %v763_v45  ;;  %v8754_v42 = vrot.slane %v8753_v63, %v5221_v58  ;;  %v5821_v57 = vpop.permute.xlu1 %1045  ;;  %v1044_v46 = vpop.permute.xlu0 %1043 }
  0xe5   :  { %v1136_v32 = vmul.f32 %v8750_v20, %v1072_v55  ;;  %v1137_v23 = vmul.f32 %v8751_v28, %v1071_v38  ;;  %v893_v15 = vadd.f32 %v881_v30, %v764_v10  ;;  %v804_v2 = vsel %vm803_vm5, %v5586_v18, %v8747_v12  ;;  %v35_v30 = vld [vmem:[%s8536_s0] sm:$0xf0]  ;;  %v36_v10 = vld [vmem:[%s8536_s0 + $0x8] sm:$0xf0] }
  0xe6   :  { %v889_v34 = vmul.f32 %v8754_v42, %v815_v13  ;;  %v944_v21 = vsel %vm932_vm6, %v5710_v43, %v5647_v44  ;;  %v1021_v45 = vadd.f32 %v1009_v1, %v892_v33  ;;  %v1069_v12 = vsel %vm1061_vm7, %v1044_v46, %v5821_v57 }
  0xe7   :  { %v1148_v54 = vadd.f32 %v1136_v32, %v1019_v14  ;;  %v1149_v29 = vadd.f32 %v1137_v23, %v1020_v51  ;;  %v1022_v41 = vadd.f32 %v1010_v0, %v893_v15  ;;  %v1070_v44 = vsel %vm1061_vm7, %v1042_v27, %v1044_v46  ;;  %v8756_v51 = vld [vmem:[#allocation32_spill] sm:$0xff]  ;;  %v8758_v23 = vld [vmem:[#allocation34_spill] sm:$0xff] }
  0xe8   :  { %v8755_v1 = vrot.slane %v5488_v22, %v5227_v60  ;;  %v1139_v55 = vmul.f32 %v1091_v49, %v1069_v12  ;;  %v772_v14 = vadd.f32 %v760_v6, %v643_v31  ;;  %v642_v20 = vadd.f32 %v8756_v51, %v550_v39  ;;  %v5851_v46 = vpop.permute.xlu1 %1057  ;;  %v1060_v49 = vpop.permute.xlu0 %1059 }
  0xe9   :  { %v1172_v13 = vrot.slane %v1148_v54, 4  ;;  %v1173_v38 = vrot.slane %v1149_v29, 4  ;;  %v8757_v32 = vrot.slane %v5414_v53, %v5227_v60  ;;  %v8759_v27 = vrot.slane %v8758_v23, %v5221_v58  ;;  %8762 = vst [vmem:[#allocation21_spill] sm:$0xff] %v5851_v46 }
  0xea   :  { %v1138_v0 = vmul.f32 %v8755_v1, %v1070_v44  ;;  %v1151_v29 = vadd.f32 %v1139_v55, %v1022_v41  ;;  %v901_v31 = vadd.f32 %v889_v34, %v772_v14  ;;  %v8763_v39 = vrot.slane %v8753_v63, %v5227_v60 }
  0xeb   :  { %v759_v28 = vmul.f32 %v8757_v32, %v675_v36  ;;  %v1018_v33 = vmul.f32 %v8759_v27, %v944_v21  ;;  %v5847_v42 = vsub.f32 %v35_v30, %v1172_v13  ;;  %v5849_v15 = vsub.f32 %v36_v10, %v1173_v38  ;;  %v37_v21 = vld [vmem:[%s8536_s0 + $0x10] sm:$0xf0] }
  0xec   :  { %v1150_v54 = vadd.f32 %v1138_v0, %v1021_v45  ;;  %v888_v6 = vmul.f32 %v8763_v39, %v804_v2  ;;  %v933_v36 = vsel %vm932_vm6, %v5762_v8, %v5710_v43  ;;  %v38_v45 = vld [vmem:[%s8536_s0 + $0x18] sm:$0xf0]  ;;  %v1073_v34 = vsel %vm1061_vm7, %v1060_v49, %v5760_v37  ;;  %v5888_v55 = vpop.permute.xlu1 %181  ;;  %v5892_v14 = vpop.permute.xlu0 %62  ;;  %v8768_v39 = vld [vmem:[#allocation13_spill] sm:$0xff] }
  0xed   :  { %8760 = vst [vmem:[#allocation20_spill] sm:$0xff] %v5847_v42  ;;  %8761 = vst [vmem:[#allocation22_spill] sm:$0xff] %v5849_v15  ;;  %v5870_v41 = vrot.slane %v5847_v42, 4  ;;  %v5873_v2 = vrot.slane %v5849_v15, 4  ;;  %v1175_v43 = vrot.slane %v1151_v29, 4  ;;  %v771_v10 = vadd.f32 %v759_v28, %v642_v20 }
  0xee   :  { %v1174_v30 = vrot.slane %v1150_v54, 4  ;;  %v1030_v12 = vadd.f32 %v1018_v33, %v901_v31  ;;  %v1062_v44 = vsel %vm1061_vm7, %v5851_v46, %v1060_v49  ;;  %v1147_v13 = vmul.f32 %v1123_v62, %v1073_v34  ;;  %v46_v28 = vld [vmem:[%s8536_s0 + $0x58] sm:$0xf0] }
  0xef   :  { %v8764_v37 = vrot.slane %v8758_v23, %v5227_v60  ;;  %v5886_v0 = vsub.f32 %v38_v45, %v1175_v43  ;;  %1252 = vrot.lane.b32.xlu1 %v5873_v2, %s4859_s27  ;;  %1250 = vrot.lane.b32.xlu0 %v5870_v41, %s4859_s27  ;;  %v900_v62 = vadd.f32 %v888_v6, %v771_v10  ;;  %v5919_v6 = vsub.s32 4, %v8768_v39  ;;  %v8771_v10 = vld [vmem:[#allocation14_spill] sm:$0xff] }
  0xf0   :  { %v5884_v1 = vsub.f32 %v37_v21, %v1174_v30  ;;  %v1159_v51 = vadd.f32 %v1147_v13, %v1030_v12  ;;  %v1146_v27 = vmul.f32 %v1119_v26, %v1062_v44  ;;  %v5908_v29 = vpop.permute.xlu1 %64  ;;  %v5912_v49 = vpop.permute.xlu0 %660  ;;  %v8772_v12 = vld [vmem:[#allocation6_spill] sm:$0xff]  ;;  %v8773_v13 = vld [vmem:[#allocation15_spill] sm:$0xff] }
  0xf1   :  { %v1017_v38 = vmul.f32 %v8764_v37, %v933_v36  ;;  %8766 = vst [vmem:[#allocation26_spill] sm:$0xff] %v5886_v0  ;;  %v5900_v32 = vrot.slane %v5886_v0, 4  ;;  %8769 = vst [vmem:[#allocation32_spill] sm:$0xff] %v5919_v6  ;;  %v229_v34 = vrot.slane %v5265_v16, %v5919_v6  ;;  %v112_v30 = vrot.slane %v5242_v5, %v5919_v6  ;;  %v8774_v37 = vld [vmem:[#allocation5_spill] sm:$0xff] }
  0xf2   :  { %8765 = vst [vmem:[#allocation27_spill] sm:$0xff] %v5884_v1  ;;  %v5897_v20 = vrot.slane %v5884_v1, 4  ;;  %v1183_v33 = vrot.slane %v1159_v51, 4  ;;  %v203_v44 = vsel %vm195_vm0, %v8772_v12, %v8771_v10  ;;  %v45_v51 = vld [vmem:[%s8536_s0 + $0x50] sm:$0xf0]  ;;  %v85_v18 = vsel %vm78_vm1, %v8773_v13, %v5892_v14 }
  0xf3   :  { %v1029_v54 = vadd.f32 %v1017_v38, %v900_v62  ;;  %1256 = vrot.lane.b32.xlu1 %v5900_v32, %s4859_s27  ;;  %v86_v38 = vsel %vm78_vm1, %v8774_v37, %v8773_v13  ;;  %v358_v62 = vrot.slane %v5280_v56, %v5919_v6  ;;  %v487_v37 = vrot.slane %v5326_v4, %v5919_v6 }
  0xf4   :  { %1254 = vrot.lane.b32.xlu0 %v5897_v20, %s4859_s27  ;;  %v5916_v31 = vsub.f32 %v46_v28, %v1183_v33  ;;  %v5924_v21 = vpop.permute.xlu1 %183  ;;  %v5926_v45 = vpop.permute.xlu0 %66  ;;  %v8775_v33 = vld [vmem:[#allocation29_spill] sm:$0xff]  ;;  %v157_v12 = vmul.f32 %v112_v30, %v86_v38  ;;  %v708_v38 = vrot.slane %v5383_v48, %v5919_v6 }
  0xf5   :  { %v1158_v36 = vadd.f32 %v1146_v27, %v1029_v54  ;;  %8770 = vst [vmem:[#allocation13_spill] sm:$0xff] %v5926_v45  ;;  %v332_v54 = vsel %vm324_vm2, %v5156_v40, %v8775_v33 }
  0xf6   :  { %8767 = vst [vmem:[#allocation35_spill] sm:$0xff] %v5916_v31  ;;  %v5922_v26 = vrot.slane %v5916_v31, 4  ;;  %v8777_v31 = vld [vmem:[#allocation11_spill] sm:$0xff]  ;;  %v403_v15 = vmul.f32 %v358_v62, %v332_v54 }
  0xf7   :  { %1366 = vrot.lane.b32.xlu1 %v5870_v41, %s4860_s20  ;;  %v1182_v43 = vrot.slane %v1158_v36, 4  ;;  %v274_v36 = vmul.f32 %v229_v34, %v203_v44  ;;  %v461_v1 = vsel %vm453_vm3, %v8777_v31, %v5584_v17 }
  0xf8   :  { %1272 = vrot.lane.b32.xlu0 %v5922_v26, %s4859_s27  ;;  %v5949_v28 = vpop.permute.xlu1 %310  ;;  %v5951_v27 = vpop.permute.xlu0 %185  ;;  %v532_v34 = vmul.f32 %v487_v37, %v461_v1  ;;  %v681_v1 = vsel %vm674_vm4, %v8733_v35, %v5912_v49  ;;  %v966_v35 = vrot.slane %v5444_v9, %v5919_v6 }
  0xf9   :  { %v5963_v0 = vsub.f32 %v45_v51, %v1182_v43  ;;  %v286_v40 = vadd.f32 %v274_v36, %v157_v12  ;;  %v8779_v43 = vld [vmem:[#allocation24_spill] sm:$0xff]  ;;  %v837_v12 = vrot.slane %v5394_v11, %v5919_v6  ;;  %v331_v13 = vsel %vm324_vm2, %v8775_v33, %v5949_v28 }
  0xfa   :  { %v579_v44 = vrot.slane %v8779_v43, %v5919_v6  ;;  %v200_v33 = vsel %vm195_vm0, %v5924_v21, %v5951_v27 }
  0xfb   :  { %1370 = vrot.lane.b32.xlu1 %v5897_v20, %s4860_s20  ;;  %8776 = vst [vmem:[#allocation14_spill] sm:$0xff] %v5963_v0  ;;  %v5978_v30 = vrot.slane %v5963_v0, 4  ;;  %v415_v31 = vadd.f32 %v403_v15, %v286_v40  ;;  %v8780_v15 = vld [vmem:[#allocation4_spill] sm:$0xff]  ;;  %v753_v40 = vmul.f32 %v708_v38, %v681_v1 }
  0xfc   :  { %1368 = vrot.lane.b32.xlu0 %v5873_v2, %s4860_s20  ;;  %v5969_v42 = vpop.permute.xlu1 %312  ;;  %v5971_v58 = vpop.permute.xlu0 %789  ;;  %v624_v36 = vmul.f32 %v579_v44, %v8780_v15 }
  0xfd   :  { %8778 = vst [vmem:[#allocation6_spill] sm:$0xff] %v5978_v30  ;;  %v544_v54 = vadd.f32 %v532_v34, %v415_v31  ;;  %v810_v37 = vsel %vm803_vm5, %v5535_v25, %v5971_v58  ;;  %v1095_v31 = vrot.slane %v5488_v22, %v5919_v6 }
  0xfe   :  { %v882_v44 = vmul.f32 %v837_v12, %v810_v37 }
  0xff   :  { %1388 = vrot.lane.b32.xlu1 %v5922_v26, %s4860_s20  ;;  %v636_v25 = vadd.f32 %v624_v36, %v544_v54 }
 0x100   :  { %1372 = vrot.lane.b32.xlu0 %v5900_v32, %s4860_s20  ;;  %v5984_v51 = vpop.permute.xlu1 %439  ;;  %v5986_v62 = vpop.permute.xlu0 %314 }
 0x101   :  { %v765_v38 = vadd.f32 %v753_v40, %v636_v25  ;;  %v329_v7 = vsel %vm324_vm2, %v5969_v42, %v5986_v62 }
 0x103   :  { %1386 = vrot.lane.b32.xlu1 %v5978_v30, %s4860_s20  ;;  %v894_v54 = vadd.f32 %v882_v44, %v765_v38 }
 0x104   :  { %1270 = vrot.lane.b32.xlu0 %v5978_v30, %s4859_s27  ;;  %v6003_v0 = vpop.permute.xlu1 %441  ;;  %v6007_v60 = vpop.permute.xlu0 %918 }
 0x105   :  { %v939_v34 = vsel %vm932_vm6, %v5712_v52, %v6007_v60 }
 0x106   :  { %v1011_v1 = vmul.f32 %v966_v35, %v939_v34  ;;  %v39_v35 = vld [vmem:[%s8536_s0 + $0x20] sm:$0xf0] }
 0x107   :  { %1496 = vrot.lane.b32.xlu1 %v5873_v2, %s4861_s23 }
 0x108   :  { %1494 = vrot.lane.b32.xlu0 %v5870_v41, %s4861_s23  ;;  %v6019_v15 = vpop.permute.xlu1 %1047  ;;  %v1023_v12 = vadd.f32 %v1011_v1, %v894_v54  ;;  %v6033_v40 = vpop.permute.xlu0 %443 }
 0x109   :  { %v1068_v52 = vsel %vm1061_vm7, %v5821_v57, %v6019_v15 }
 0x10a   :  { %v1140_v36 = vmul.f32 %v1095_v31, %v1068_v52 }
 0x10b   :  { %1500 = vrot.lane.b32.xlu1 %v5900_v32, %s4861_s23 }
 0x10c   :  { %1498 = vrot.lane.b32.xlu0 %v5897_v20, %s4861_s23  ;;  %v1152_v37 = vadd.f32 %v1140_v36, %v1023_v12  ;;  %v6048_v25 = vpop.permute.xlu1 %68  ;;  %v6050_v44 = vpop.permute.xlu0 %662 }
 0x10d   :  { %8782 = vst [vmem:[#allocation5_spill] sm:$0xff] %v6048_v25 }
 0x10e   :  { %v1176_v57 = vrot.slane %v1152_v37, 4  ;;  %v6088_v37 = vsub.s32 5, %v8768_v39 }
 0x10f   :  { %1514 = vrot.lane.b32.xlu1 %v5978_v30, %s4861_s23 }
 0x110   :  { %1516 = vrot.lane.b32.xlu0 %v5922_v26, %s4861_s23  ;;  %v6046_v34 = vsub.f32 %v39_v35, %v1176_v57  ;;  %v6059_v38 = vpop.permute.xlu1 %664  ;;  %v6061_v1 = vpop.permute.xlu0 %187  ;;  %8784 = vst [vmem:[#allocation11_spill] sm:$0xff] %v6088_v37  ;;  %v6091_v57 = vsub.s32 6, %v8768_v39  ;;  %v6094_v35 = vsub.s32 7, %v8768_v39  ;;  %v116_v6 = vrot.slane %v5242_v5, %v6088_v37 }
 0x111   :  { %v202_v39 = vsel %vm195_vm0, %v8771_v10, %v5888_v55  ;;  %v583_v47 = vrot.slane %v8779_v43, %v6088_v37  ;;  %v362_v50 = vrot.slane %v5280_v56, %v6088_v37 }
 0x112   :  { %8781 = vst [vmem:[#allocation15_spill] sm:$0xff] %v6046_v34  ;;  %v6057_v31 = vrot.slane %v6046_v34, 4  ;;  %8785 = vst [vmem:[#allocation24_spill] sm:$0xff] %v6091_v57  ;;  %v233_v34 = vrot.slane %v5265_v16, %v6088_v37  ;;  %v237_v24 = vrot.slane %v5265_v16, %v6091_v57  ;;  %v124_v59 = vrot.slane %v5242_v5, %v6094_v35 }
 0x113   :  { %1624 = vrot.lane.b32.xlu1 %v5873_v2, %s4862_s24  ;;  %8786 = vst [vmem:[#allocation4_spill] sm:$0xff] %v6094_v35  ;;  %v241_v10 = vrot.slane %v5265_v16, %v6094_v35  ;;  %v366_v23 = vrot.slane %v5280_v56, %v6091_v57  ;;  %v370_v63 = vrot.slane %v5280_v56, %v6094_v35 }
 0x114   :  { %1622 = vrot.lane.b32.xlu0 %v5870_v41, %s4862_s24  ;;  %v6071_v52 = vpop.permute.xlu1 %791  ;;  %v6073_v54 = vpop.permute.xlu0 %666  ;;  %v587_v16 = vrot.slane %v8779_v43, %v6091_v57  ;;  %v275_v53 = vmul.f32 %v233_v34, %v202_v39  ;;  %v158_v3 = vmul.f32 %v116_v6, %v85_v18  ;;  %v460_v56 = vsel %vm453_vm3, %v5584_v17, %v5984_v51  ;;  %v4846_v18 = vld [vmem:[%s8536_s0 + $0x28] sm:$0xf] }
 0x115   :  { %v495_v25 = vrot.slane %v5326_v4, %v6091_v57  ;;  %v625_v6 = vmul.f32 %v4846_v18, %v583_v47  ;;  %v591_v34 = vrot.slane %v8779_v43, %v6094_v35  ;;  %v84_v39 = vsel %vm78_vm1, %v5892_v14, %v5908_v29 }
 0x116   :  { %v201_v17 = vsel %vm195_vm0, %v5888_v55, %v5924_v21  ;;  %v277_v14 = vmul.f32 %v241_v10, %v200_v33  ;;  %v287_v21 = vadd.f32 %v275_v53, %v158_v3  ;;  %v406_v33 = vmul.f32 %v370_v63, %v329_v7 }
 0x117   :  { %1628 = vrot.lane.b32.xlu1 %v5900_v32, %s4862_s24  ;;  %v276_v10 = vmul.f32 %v237_v24, %v201_v17  ;;  %v459_v3 = vsel %vm453_vm3, %v5984_v51, %v6003_v0  ;;  %v716_v53 = vrot.slane %v5383_v48, %v6091_v57  ;;  %v720_v51 = vrot.slane %v5383_v48, %v6094_v35 }
 0x118   :  { %1626 = vrot.lane.b32.xlu0 %v5897_v20, %s4862_s24  ;;  %v6079_v36 = vpop.permute.xlu1 %793  ;;  %v6081_v12 = vpop.permute.xlu0 %316  ;;  %v534_v17 = vmul.f32 %v495_v25, %v459_v3 }
 0x119   :  { %8783 = vst [vmem:[#allocation29_spill] sm:$0xff] %v6081_v12  ;;  %v83_v12 = vsel %vm78_vm1, %v5908_v29, %v5926_v45  ;;  %v404_v45 = vmul.f32 %v362_v50, %v331_v13  ;;  %v499_v29 = vrot.slane %v5326_v4, %v6094_v35  ;;  %v4847_v50 = vld [vmem:[%s8536_s0 + $0x30] sm:$0xf]  ;;  %v330_v13 = vsel %vm324_vm2, %v5949_v28, %v5969_v42  ;;  %v4848_v42 = vld [vmem:[%s8536_s0 + $0x38] sm:$0xf] }
 0x11a   :  { %v160_v43 = vmul.f32 %v124_v59, %v83_v12  ;;  %v6186_v55 = vmul.f32 %v4847_v50, %v587_v16  ;;  %v712_v16 = vrot.slane %v5383_v48, %v6088_v37  ;;  %v627_v28 = vmul.f32 %v4848_v42, %v591_v34 }
 0x11b   :  { %1642 = vrot.lane.b32.xlu1 %v5978_v30, %s4862_s24  ;;  %v120_v30 = vrot.slane %v5242_v5, %v6091_v57  ;;  %v491_v5 = vrot.slane %v5326_v4, %v6088_v37  ;;  %v458_v4 = vsel %vm453_vm3, %v6003_v0, %v6033_v40  ;;  %v416_v50 = vadd.f32 %v404_v45, %v287_v21 }
 0x11c   :  { %1644 = vrot.lane.b32.xlu0 %v5922_v26, %s4862_s24  ;;  %v6106_v46 = vpop.permute.xlu1 %920  ;;  %v6108_v8 = vpop.permute.xlu0 %795  ;;  %v289_v7 = vadd.f32 %v277_v14, %v160_v43  ;;  %v405_v24 = vmul.f32 %v366_v23, %v330_v13  ;;  %v535_v63 = vmul.f32 %v499_v29, %v458_v4  ;;  %v680_v45 = vsel %vm674_vm4, %v5912_v49, %v6050_v44 }
 0x11d   :  { %v533_v59 = vmul.f32 %v491_v5, %v460_v56  ;;  %v159_v12 = vmul.f32 %v120_v30, %v84_v39  ;;  %v841_v30 = vrot.slane %v5394_v11, %v6088_v37  ;;  %v845_v5 = vrot.slane %v5394_v11, %v6091_v57 }
 0x11e   :  { %v418_v39 = vadd.f32 %v406_v33, %v289_v7  ;;  %v809_v49 = vsel %vm803_vm5, %v5971_v58, %v6071_v52  ;;  %v754_v43 = vmul.f32 %v712_v16, %v680_v45  ;;  %v970_v14 = vrot.slane %v5444_v9, %v6088_v37 }
 0x11f   :  { %1374 = vrot.lane.b32.xlu1 %v6057_v31, %s4860_s20  ;;  %v545_v0 = vadd.f32 %v533_v59, %v416_v50  ;;  %v288_v34 = vadd.f32 %v276_v10, %v159_v12  ;;  %v849_v48 = vrot.slane %v5394_v11, %v6094_v35  ;;  %v974_v29 = vrot.slane %v5444_v9, %v6091_v57 }
 0x120   :  { %1258 = vrot.lane.b32.xlu0 %v6057_v31, %s4859_s27  ;;  %v6175_v47 = vpop.permute.xlu1 %922  ;;  %v6177_v18 = vpop.permute.xlu0 %445  ;;  %v547_v25 = vadd.f32 %v535_v63, %v418_v39  ;;  %v678_v58 = vsel %vm674_vm4, %v6059_v38, %v6073_v54  ;;  %v938_v13 = vsel %vm932_vm6, %v6007_v60, %v6106_v46  ;;  %v679_v59 = vsel %vm674_vm4, %v6050_v44, %v6059_v38 }
 0x121   :  { %v417_v21 = vadd.f32 %v405_v24, %v288_v34  ;;  %v637_v11 = vadd.f32 %v625_v6, %v545_v0  ;;  %v883_v4 = vmul.f32 %v841_v30, %v809_v49  ;;  %v1099_v12 = vrot.slane %v5488_v22, %v6088_v37 }
 0x122   :  { %v807_v33 = vsel %vm803_vm5, %v6079_v36, %v6108_v8  ;;  %v978_v6 = vrot.slane %v5444_v9, %v6094_v35  ;;  %v756_v50 = vmul.f32 %v720_v51, %v678_v58  ;;  %v808_v44 = vsel %vm803_vm5, %v6071_v52, %v6079_v36 }
 0x123   :  { %1880 = vrot.lane.b32.xlu1 %v5873_v2, %s4863_s25  ;;  %v546_v10 = vadd.f32 %v534_v17, %v417_v21  ;;  %v766_v16 = vadd.f32 %v754_v43, %v637_v11  ;;  %v1012_v38 = vmul.f32 %v970_v14, %v938_v13  ;;  %v755_v7 = vmul.f32 %v716_v53, %v679_v59  ;;  %v8787_v14 = vld [vmem:[#allocation23_spill] sm:$0xff]  ;;  %v8788_v13 = vld [vmem:[#allocation25_spill] sm:$0xff] }
 0x124   :  { %1878 = vrot.lane.b32.xlu0 %v5870_v41, %s4863_s25  ;;  %v1050_v23 = vpop.permute.xlu1 %1049  ;;  %v6223_v56 = vpop.permute.xlu0 %924  ;;  %v639_v24 = vadd.f32 %v627_v28, %v547_v25  ;;  %v885_v36 = vmul.f32 %v849_v48, %v807_v33  ;;  %v937_v63 = vsel %vm932_vm6, %v6106_v46, %v6175_v47  ;;  %v884_v45 = vmul.f32 %v845_v5, %v808_v44  ;;  %v6307_v25 = vld [vmem:[%s8537_s1 + $0x40] ss:$8 sm:$0xf]  ;;  %v40_v33 = vld [vmem:[%s8536_s0 + $0x28] sm:$0xf0] }
 0x125   :  { %v1067_v60 = vsel %vm1061_vm7, %v6019_v15, %v1050_v23  ;;  %v936_v9 = vsel %vm932_vm6, %v6175_v47, %v6223_v56  ;;  %v1107_v15 = vrot.slane %v5488_v22, %v6094_v35  ;;  %v895_v52 = vadd.f32 %v883_v4, %v766_v16  ;;  %v8789_v4 = vld [vmem:[#allocation5_spill] sm:$0xff]  ;;  %v8792_v16 = vld [vmem:[#allocation28_spill] sm:$0xff] }
 0x126   :  { %v1141_v53 = vmul.f32 %v1099_v12, %v1067_v60  ;;  %v638_v28 = vadd.f32 %v6186_v55, %v546_v10  ;;  %v1103_v0 = vrot.slane %v5488_v22, %v6091_v57  ;;  %v768_v51 = vadd.f32 %v756_v50, %v639_v24  ;;  %v8790_v12 = vld [vmem:[#allocation13_spill] sm:$0xff]  ;;  %v42_v24 = vld [vmem:[%s8536_s0 + $0x38] sm:$0xf0] }
 0x127   :  { %1884 = vrot.lane.b32.xlu1 %v5900_v32, %s4863_s25  ;;  %v1024_v34 = vadd.f32 %v1012_v38, %v895_v52  ;;  %v1014_v39 = vmul.f32 %v978_v6, %v936_v9  ;;  %v1013_v47 = vmul.f32 %v974_v29, %v937_v63  ;;  %v245_v48 = vrot.slane %v8787_v14, %v5230_v61  ;;  %v8791_v10 = vld [vmem:[#allocation29_spill] sm:$0xff]  ;;  %v41_v52 = vld [vmem:[%s8536_s0 + $0x30] sm:$0xf0] }
 0x128   :  { %1882 = vrot.lane.b32.xlu0 %v5897_v20, %s4863_s25  ;;  %v6266_v3 = vpop.permute.xlu1 %1053  ;;  %v1052_v42 = vpop.permute.xlu0 %1051  ;;  %v767_v46 = vadd.f32 %v755_v7, %v638_v28  ;;  %v897_v55 = vadd.f32 %v885_v36, %v768_v51  ;;  %v128_v58 = vrot.slane %v6307_v25, %v5230_v61  ;;  %v503_v50 = vrot.slane %v8792_v16, %v5230_v61  ;;  %v4852_v16 = vld [vmem:[%s8537_s1 + $0x41] ss:$8 sm:$0xf] }
 0x129   :  { %v1065_v30 = vsel %vm1061_vm7, %v1052_v42, %v6266_v3  ;;  %v1066_v17 = vsel %vm1061_vm7, %v1050_v23, %v1052_v42  ;;  %v1153_v22 = vadd.f32 %v1141_v53, %v1024_v34  ;;  %v199_v23 = vsel %vm195_vm0, %v5951_v27, %v6061_v1  ;;  %v6698_v35 = vld [vmem:[%s8537_s1 + $0xa1] ss:$8 sm:$0xf] }
 0x12a   :  { %v1143_v5 = vmul.f32 %v1107_v15, %v1065_v30  ;;  %v896_v49 = vadd.f32 %v884_v45, %v767_v46  ;;  %v1142_v43 = vmul.f32 %v1103_v0, %v1066_v17  ;;  %v1026_v21 = vadd.f32 %v1014_v39, %v897_v55  ;;  %v8795_v45 = vld [vmem:[#allocation31_spill] sm:$0xff]  ;;  %v8797_v46 = vld [vmem:[#allocation33_spill] sm:$0xff] }
 0x12b   :  { %1900 = vrot.lane.b32.xlu1 %v5922_v26, %s4863_s25  ;;  %v1177_v11 = vrot.slane %v1153_v22, 4  ;;  %v82_v27 = vsel %vm78_vm1, %v8790_v12, %v8789_v4  ;;  %v278_v6 = vmul.f32 %v245_v48, %v199_v23  ;;  %v457_v44 = vsel %vm453_vm3, %v6033_v40, %v6177_v18 }
 0x12c   :  { %1886 = vrot.lane.b32.xlu0 %v6057_v31, %s4863_s25  ;;  %v1025_v29 = vadd.f32 %v1013_v47, %v896_v49  ;;  %v1155_v59 = vadd.f32 %v1143_v5, %v1026_v21  ;;  %v6349_v36 = vpop.permute.xlu0 %668  ;;  %v724_v0 = vrot.slane %v8795_v45, %v5230_v61  ;;  %v6368_v34 = vpop.permute.xlu1 %797  ;;  %v8798_v21 = vld [vmem:[#allocation34_spill] sm:$0xff] }
 0x12d   :  { %v6334_v42 = vsub.f32 %v40_v33, %v1177_v11  ;;  %v677_v51 = vsel %vm674_vm4, %v6073_v54, %v6349_v36  ;;  %v853_v54 = vrot.slane %v8797_v46, %v5230_v61  ;;  %v806_v22 = vsel %vm803_vm5, %v6108_v8, %v6368_v34 }
 0x12e   :  { %v1154_v60 = vadd.f32 %v1142_v43, %v1025_v29  ;;  %v1179_v7 = vrot.slane %v1155_v59, 4  ;;  %v757_v47 = vmul.f32 %v724_v0, %v677_v51  ;;  %v982_v23 = vrot.slane %v8798_v21, %v5230_v61  ;;  %v8799_v29 = vld [vmem:[#allocation10_spill] sm:$0xff] }
 0x12f   :  { %2006 = vrot.lane.b32.xlu1 %v5870_v41, %s4864_s26  ;;  %8793 = vst [vmem:[#allocation23_spill] sm:$0xff] %v6334_v42  ;;  %v6356_v53 = vrot.slane %v6334_v42, 4  ;;  %v886_v43 = vmul.f32 %v853_v54, %v806_v22  ;;  %v4854_v51 = vld [vmem:[%s8537_s1 + $0x43] ss:$8 sm:$0xf] }
 0x130   :  { %1502 = vrot.lane.b32.xlu0 %v6057_v31, %s4861_s23  ;;  %v1178_v9 = vrot.slane %v1154_v60, 4  ;;  %v6358_v28 = vsub.f32 %v42_v24, %v1179_v7  ;;  %v6389_v49 = vpop.permute.xlu0 %926  ;;  %v6395_v48 = vpop.permute.xlu1 %1055  ;;  %v4853_v24 = vld [vmem:[%s8537_s1 + $0x42] ss:$8 sm:$0xf] }
 0x131   :  { %v935_v8 = vsel %vm932_vm6, %v6223_v56, %v6389_v49  ;;  %v1064_v56 = vsel %vm1061_vm7, %v6266_v3, %v6395_v48 }
 0x132   :  { %8794 = vst [vmem:[#allocation25_spill] sm:$0xff] %v6358_v28  ;;  %v6362_v30 = vsub.f32 %v41_v52, %v1178_v9  ;;  %v6378_v17 = vrot.slane %v6358_v28, 4  ;;  %v8803_v52 = vld [vmem:[#allocation8_spill] sm:$0xff]  ;;  %v8825_v28 = vld [vmem:[#allocation35_spill] sm:$0xff] }
 0x133   :  { %2010 = vrot.lane.b32.xlu1 %v5897_v20, %s4864_s26 }
 0x134   :  { %2008 = vrot.lane.b32.xlu0 %v5873_v2, %s4864_s26  ;;  %8796 = vst [vmem:[#allocation5_spill] sm:$0xff] %v6362_v30  ;;  %v6383_v55 = vrot.slane %v6362_v30, 4 }
 0x137   :  { %2014 = vrot.lane.b32.xlu1 %v6057_v31, %s4864_s26 }
 0x138   :  { %2012 = vrot.lane.b32.xlu0 %v5900_v32, %s4864_s26 }
 0x13b   :  { %1630 = vrot.lane.b32.xlu1 %v6057_v31, %s4862_s24 }
 0x13c   :  { %2028 = vrot.lane.b32.xlu0 %v5922_v26, %s4864_s26 }
 0x13f   :  { %2136 = vrot.lane.b32.xlu1 %v5873_v2, %s4865_s28 }
 0x140   :  { %2134 = vrot.lane.b32.xlu0 %v5870_v41, %s4865_s28 }
 0x143   :  { %2140 = vrot.lane.b32.xlu1 %v5900_v32, %s4865_s28 }
 0x144   :  { %2138 = vrot.lane.b32.xlu0 %v5897_v20, %s4865_s28 }
 0x147   :  { %2156 = vrot.lane.b32.xlu1 %v5922_v26, %s4865_s28 }
 0x148   :  { %2142 = vrot.lane.b32.xlu0 %v6057_v31, %s4865_s28 }
 0x14b   :  { %2264 = vrot.lane.b32.xlu1 %v5873_v2, %s4866_s29  ;;  %v374_v2 = vrot.slane %v8788_v13, %v5230_v61 }
 0x14c   :  { %2262 = vrot.lane.b32.xlu0 %v5870_v41, %s4866_s29  ;;  %v328_v41 = vsel %vm324_vm2, %v5986_v62, %v8791_v10  ;;  %v161_v62 = vmul.f32 %v128_v58, %v82_v27  ;;  %v1111_v58 = vrot.slane %v8799_v29, %v5230_v61 }
 0x14d   :  { %v407_v38 = vmul.f32 %v374_v2, %v328_v41  ;;  %v1015_v2 = vmul.f32 %v982_v23, %v935_v8 }
 0x14e   :  { %v290_v15 = vadd.f32 %v278_v6, %v161_v62  ;;  %v1144_v12 = vmul.f32 %v1111_v58, %v1064_v56  ;;  %v8802_v62 = vld [vmem:[#allocation7_spill] sm:$0xff]  ;;  %v8808_v58 = vld [vmem:[#allocation30_spill] sm:$0xff] }
 0x14f   :  { %2268 = vrot.lane.b32.xlu1 %v5900_v32, %s4866_s29  ;;  %v536_v32 = vmul.f32 %v503_v50, %v457_v44  ;;  %v8801_v50 = vld [vmem:[#allocation17_spill] sm:$0xff] }
 0x150   :  { %2266 = vrot.lane.b32.xlu0 %v5897_v20, %s4866_s29  ;;  %v6345_v20 = vld [vmem:[%s8537_s1 + $0x44] ss:$8 sm:$0xf]  ;;  %v419_v63 = vadd.f32 %v407_v38, %v290_v15  ;;  %v249_v44 = vrot.slane %v4852_v16, %v8801_v50  ;;  %v198_v38 = vsel %vm195_vm0, %v6061_v1, %v8802_v62  ;;  %v132_v7 = vrot.slane %v6307_v25, %v8801_v50 }
 0x151   :  { %v595_v40 = vrot.slane %v6345_v20, %v5230_v61  ;;  %v378_v9 = vrot.slane %v4853_v24, %v8801_v50  ;;  %v81_v1 = vsel %vm78_vm1, %v8789_v4, %v8803_v52  ;;  %v43_v25 = vld [vmem:[%s8536_s0 + $0x40] sm:$0xf0]  ;;  %v8811_v52 = vld [vmem:[#allocation19_spill] sm:$0xff] }
 0x152   :  { %v279_v0 = vmul.f32 %v249_v44, %v198_v38  ;;  %v8805_v4 = vld [vmem:[#allocation12_spill] sm:$0xff] }
 0x153   :  { %2284 = vrot.lane.b32.xlu1 %v5922_v26, %s4866_s29  ;;  %v548_v26 = vadd.f32 %v536_v32, %v419_v63  ;;  %v8810_v62 = vld [vmem:[#allocation36_spill] sm:$0xff] }
 0x154   :  { %2270 = vrot.lane.b32.xlu0 %v6057_v31, %s4866_s29  ;;  %v4851_v31 = vld [vmem:[%s8536_s0 + $0x40] sm:$0xf]  ;;  %v805_v38 = vsel %vm803_vm5, %v6368_v34, %v8810_v62  ;;  %v4858_v24 = vld [vmem:[%s8537_s1 + $0x47] ss:$8 sm:$0xf] }
 0x155   :  { %v628_v39 = vmul.f32 %v4851_v31, %v595_v40  ;;  %v8804_v40 = vld [vmem:[#allocation9_spill] sm:$0xff]  ;;  %v162_v31 = vmul.f32 %v132_v7, %v81_v1  ;;  %v934_v1 = vsel %vm932_vm6, %v6389_v49, %v8811_v52  ;;  %v8820_v52 = vld [vmem:[#allocation18_spill] sm:$0xff] }
 0x156   :  { %v327_v63 = vsel %vm324_vm2, %v8791_v10, %v8804_v40  ;;  %v456_v10 = vsel %vm453_vm3, %v6177_v18, %v8805_v4  ;;  %v8813_v49 = vld [vmem:[#allocation21_spill] sm:$0xff] }
 0x157   :  { %1260 = vrot.lane.b32.xlu1 %v6356_v53, %s4859_s27  ;;  %v640_v5 = vadd.f32 %v628_v39, %v548_v26  ;;  %v507_v26 = vrot.slane %v4854_v51, %v8801_v50  ;;  %v408_v39 = vmul.f32 %v378_v9, %v327_v63  ;;  %v291_v22 = vadd.f32 %v279_v0, %v162_v31 }
 0x158   :  { %1888 = vrot.lane.b32.xlu0 %v6356_v53, %s4863_s25  ;;  %v986_v9 = vrot.slane %v4858_v24, %v8801_v50  ;;  %v1063_v4 = vsel %vm1061_vm7, %v6395_v48, %v8813_v49  ;;  %8830 = vst [vmem:[#allocation21_spill] sm:$0xff] %v6698_v35 }
 0x159   :  { %v769_v14 = vadd.f32 %v757_v47, %v640_v5  ;;  %v537_v5 = vmul.f32 %v507_v26, %v456_v10  ;;  %v420_v18 = vadd.f32 %v408_v39, %v291_v22  ;;  %v1115_v26 = vrot.slane %v8799_v29, %v8801_v50 }
 0x15b   :  { %1264 = vrot.lane.b32.xlu1 %v6378_v17, %s4859_s27  ;;  %v898_v13 = vadd.f32 %v886_v43, %v769_v14  ;;  %v599_v43 = vrot.slane %v6345_v20, %v8801_v50  ;;  %v4855_v14 = vld [vmem:[%s8537_s1 + $0x45] ss:$8 sm:$0xf]  ;;  %v676_v20 = vsel %vm674_vm4, %v6349_v36, %v8808_v58  ;;  %v4857_v36 = vld [vmem:[%s8537_s1 + $0x46] ss:$8 sm:$0xf]  ;;  %v1145_v22 = vmul.f32 %v1115_v26, %v1063_v4 }
 0x15c   :  { %1262 = vrot.lane.b32.xlu0 %v6383_v55, %s4859_s27  ;;  %v728_v21 = vrot.slane %v4855_v14, %v8801_v50  ;;  %v857_v16 = vrot.slane %v4857_v36, %v8801_v50  ;;  %v44_v14 = vld [vmem:[%s8536_s0 + $0x48] sm:$0xf0]  ;;  %v4651_v4 = vld [vmem:[%s8537_s1 + $0x63] ss:$8 sm:$0xf] }
 0x15d   :  { %v1027_v27 = vadd.f32 %v1015_v2, %v898_v13  ;;  %v549_v13 = vadd.f32 %v537_v5, %v420_v18  ;;  %v4856_v2 = vld [vmem:[%s8536_s0 + $0x48] sm:$0xf]  ;;  %v4657_v58 = vld [vmem:[%s8537_s1 + $0x65] ss:$8 sm:$0xf] }
 0x15e   :  { %v629_v56 = vmul.f32 %v4856_v2, %v599_v43  ;;  %v887_v34 = vmul.f32 %v857_v16, %v805_v38  ;;  %v4646_v16 = vld [vmem:[%s8537_s1 + $0x61] ss:$8 sm:$0xf0]  ;;  %v6611_v38 = vld [vmem:[%s8537_s1 + $0xa5] ss:$8 sm:$0xf] }
 0x15f   :  { %1378 = vrot.lane.b32.xlu1 %v6383_v55, %s4860_s20  ;;  %v1156_v60 = vadd.f32 %v1144_v12, %v1027_v27  ;;  %v758_v12 = vmul.f32 %v728_v21, %v676_v20  ;;  %v4658_v20 = vld [vmem:[%s8537_s1 + $0x65] ss:$8 sm:$0xf0]  ;;  %8819 = vst [vmem:[#allocation12_spill] sm:$0xff] %v6611_v38 }
 0x160   :  { %1376 = vrot.lane.b32.xlu0 %v6356_v53, %s4860_s20  ;;  %v641_v44 = vadd.f32 %v629_v56, %v549_v13 }
 0x161   :  { %v6409_v11 = vpop.permute.xlu1 %1252  ;;  %v6411_v59 = vpop.permute.xlu0 %1250  ;;  %v1180_v15 = vrot.slane %v1156_v60, 4 }
 0x162   :  { %v770_v7 = vadd.f32 %v758_v12, %v641_v44  ;;  %v6588_v12 = vor.u32 %v4658_v20, %v4657_v58  ;;  %v4654_v20 = vld [vmem:[%s8537_s1 + $0x64] ss:$8 sm:$0xf] }
 0x163   :  { %2016 = vrot.lane.b32.xlu1 %v6356_v53, %s4864_s26  ;;  %v6478_v46 = vsub.f32 %v43_v25, %v1180_v15  ;;  %v1016_v25 = vmul.f32 %v986_v9, %v934_v1 }
 0x164   :  { %1380 = vrot.lane.b32.xlu0 %v6378_v17, %s4860_s20  ;;  %v899_v63 = vadd.f32 %v887_v34, %v770_v7  ;;  %8818 = vst [vmem:[#allocation9_spill] sm:$0xff] %v6588_v12  ;;  %v1755_v62 = vrot.slane %v6588_v12, %v5230_v61  ;;  %v4649_v7 = vld [vmem:[%s8537_s1 + $0x62] ss:$8 sm:$0xf0]  ;;  %v1759_v9 = vrot.slane %v6588_v12, %v8801_v50 }
 0x165   :  { %v6421_v41 = vpop.permute.xlu1 %1256  ;;  %8806 = vst [vmem:[#allocation29_spill] sm:$0xff] %v6478_v46  ;;  %v1234_v23 = vrot.slane %v6478_v46, 4  ;;  %v1763_v1 = vrot.slane %v6588_v12, %v8820_v52  ;;  %v4660_v46 = vld [vmem:[%s8537_s1 + $0x66] ss:$8 sm:$0xf] }
 0x166   :  { %8800 = vst [vmem:[#allocation13_spill] sm:$0xff] %v6421_v41  ;;  %v6423_v33 = vpop.permute.xlu0 %1254  ;;  %v1028_v10 = vadd.f32 %v1016_v25, %v899_v63  ;;  %v8821_v63 = vld [vmem:[#allocation16_spill] sm:$0xff] }
 0x167   :  { %1506 = vrot.lane.b32.xlu1 %v6383_v55, %s4861_s23  ;;  %v1799_v25 = vrot.slane %v6611_v38, %v8821_v63  ;;  %v1767_v26 = vrot.slane %v6588_v12, %v8821_v63  ;;  %v8828_v38 = vld [vmem:[#allocation26_spill] sm:$0xff] }
 0x168   :  { %1504 = vrot.lane.b32.xlu0 %v6356_v53, %s4861_s23  ;;  %v1157_v29 = vadd.f32 %v1145_v22, %v1028_v10  ;;  %v4652_v10 = vld [vmem:[%s8537_s1 + $0x63] ss:$8 sm:$0xf0]  ;;  %v4664_v12 = vld [vmem:[%s8537_s1 + $0x67] ss:$8 sm:$0xf0] }
 0x169   :  { %v6429_v3 = vpop.permute.xlu1 %1366  ;;  %v8822_v22 = vld [vmem:[#allocation20_spill] sm:$0xff]  ;;  %v6682_v30 = vmul.f32 %v1799_v25, %v8825_v28  ;;  %v6687_v42 = vmul.f32 %v1767_v26, %v8828_v38 }
 0x16a   :  { %v6431_v6 = vpop.permute.xlu0 %1272  ;;  %v1181_v48 = vrot.slane %v1157_v29, 4  ;;  %v6644_v29 = vmul.f32 %v1755_v62, %v8822_v22  ;;  %v4663_v25 = vld [vmem:[%s8537_s1 + $0x67] ss:$8 sm:$0xf] }
 0x16b   :  { %2144 = vrot.lane.b32.xlu1 %v6356_v53, %s4865_s28  ;;  %8826 = vst [vmem:[#allocation30_spill] sm:$0xff] %v6682_v30  ;;  %8829 = vst [vmem:[#allocation19_spill] sm:$0xff] %v6687_v42  ;;  %v6813_v28 = vld [vmem:[%s8537_s1 + $0xa7] ss:$8 sm:$0xf] }
 0x16c   :  { %1508 = vrot.lane.b32.xlu0 %v6378_v17, %s4861_s23  ;;  %v6582_v13 = vsub.f32 %v44_v14, %v1181_v48  ;;  %v6651_v14 = vld [vmem:[%s8537_s1 + $0xa2] ss:$8 sm:$0xf]  ;;  %8835 = vst [vmem:[#allocation41_spill] sm:$0xff] %v6813_v28 }
 0x16d   :  { %v6451_v32 = vpop.permute.xlu1 %1370  ;;  %v6832_v22 = vld [vmem:[%s8537_s1 + $0x100] ss:$8 sm:$0xf]  ;;  %v4670_v42 = vld [vmem:[%s8537_s1 + $0xc1] ss:$8 sm:$0xf0] }
 0x16e   :  { %v6464_v45 = vpop.permute.xlu0 %1368  ;;  %8815 = vst [vmem:[#allocation10_spill] sm:$0xff] %v6582_v13  ;;  %v6597_v36 = vrot.slane %v6582_v13, 4  ;;  %v6673_v13 = vor.u32 %v4652_v10, %v4651_v4  ;;  %v6724_v10 = vld [vmem:[%s8537_s1 + $0xa3] ss:$8 sm:$0xf] }
 0x16f   :  { %1634 = vrot.lane.b32.xlu1 %v6383_v55, %s4862_s24  ;;  %v1400_v4 = vsel %vm195_vm0, %v6429_v3, %v6464_v45 }
 0x170   :  { %1632 = vrot.lane.b32.xlu0 %v6356_v53, %s4862_s24 }
 0x171   :  { %v6480_v54 = vpop.permute.xlu1 %1388 }
 0x172   :  { %v6482_v47 = vpop.permute.xlu0 %1372 }
 0x173   :  { %2272 = vrot.lane.b32.xlu1 %v6356_v53, %s4866_s29 }
 0x174   :  { %1636 = vrot.lane.b32.xlu0 %v6378_v17, %s4862_s24 }
 0x175   :  { %v6495_v8 = vpop.permute.xlu1 %1386 }
 0x176   :  { %8807 = vst [vmem:[#allocation28_spill] sm:$0xff] %v6495_v8  ;;  %v6501_v53 = vpop.permute.xlu0 %1270 }
 0x177   :  { %8809 = vst [vmem:[#allocation31_spill] sm:$0xff] %v6501_v53  ;;  %1382 = vrot.lane.b32.xlu1 %v1234_v23, %s4860_s20 }
 0x178   :  { %1266 = vrot.lane.b32.xlu0 %v1234_v23, %s4859_s27 }
 0x179   :  { %v6508_v27 = vpop.permute.xlu1 %1496 }
 0x17a   :  { %v6510_v60 = vpop.permute.xlu0 %1494 }
 0x17b   :  { %1892 = vrot.lane.b32.xlu1 %v6378_v17, %s4863_s25 }
 0x17c   :  { %1890 = vrot.lane.b32.xlu0 %v6383_v55, %s4863_s25 }
 0x17d   :  { %v6528_v15 = vpop.permute.xlu1 %1500 }
 0x17e   :  { %v6534_v40 = vpop.permute.xlu0 %1498 }
 0x17f   :  { %1510 = vrot.lane.b32.xlu1 %v1234_v23, %s4861_s23 }
 0x180   :  { %1894 = vrot.lane.b32.xlu0 %v1234_v23, %s4863_s25 }
 0x181   :  { %v6538_v0 = vpop.permute.xlu1 %1514 }
 0x182   :  { %8812 = vst [vmem:[#allocation33_spill] sm:$0xff] %v6538_v0  ;;  %v6540_v51 = vpop.permute.xlu0 %1516 }
 0x183   :  { %2020 = vrot.lane.b32.xlu1 %v6378_v17, %s4864_s26 }
 0x184   :  { %2018 = vrot.lane.b32.xlu0 %v6383_v55, %s4864_s26 }
 0x185   :  { %v6552_v31 = vpop.permute.xlu1 %1624 }
 0x186   :  { %v6554_v39 = vpop.permute.xlu0 %1622 }
 0x187   :  { %1638 = vrot.lane.b32.xlu1 %v1234_v23, %s4862_s24 }
 0x188   :  { %2022 = vrot.lane.b32.xlu0 %v1234_v23, %s4864_s26 }
 0x189   :  { %v6558_v5 = vpop.permute.xlu1 %1628 }
 0x18a   :  { %v6560_v43 = vpop.permute.xlu0 %1626 }
 0x18b   :  { %2148 = vrot.lane.b32.xlu1 %v6378_v17, %s4865_s28 }
 0x18c   :  { %2146 = vrot.lane.b32.xlu0 %v6383_v55, %s4865_s28 }
 0x18d   :  { %v6566_v18 = vpop.permute.xlu1 %1642 }
 0x18e   :  { %8814 = vst [vmem:[#allocation34_spill] sm:$0xff] %v6566_v18  ;;  %v6571_v21 = vpop.permute.xlu0 %1644 }
 0x18f   :  { %2274 = vrot.lane.b32.xlu1 %v6383_v55, %s4866_s29  ;;  %v4645_v55 = vld [vmem:[%s8537_s1 + $0x61] ss:$8 sm:$0xf] }
 0x190   :  { %2150 = vrot.lane.b32.xlu0 %v1234_v23, %s4865_s28  ;;  %v6621_v24 = vor.u32 %v4646_v16, %v4645_v55  ;;  %v4655_v55 = vld [vmem:[%s8537_s1 + $0x64] ss:$8 sm:$0xf0] }
 0x191   :  { %v6584_v2 = vpop.permute.xlu1 %1374  ;;  %v8823_v16 = vld [vmem:[#allocation22_spill] sm:$0xff]  ;;  %v6709_v37 = vor.u32 %v4655_v55, %v4654_v20 }
 0x192   :  { %8816 = vst [vmem:[#allocation7_spill] sm:$0xff] %v6584_v2  ;;  %v6586_v56 = vpop.permute.xlu0 %1258  ;;  %v6664_v62 = vmul.f32 %v1759_v9, %v8823_v16  ;;  %v4661_v9 = vld [vmem:[%s8537_s1 + $0x66] ss:$8 sm:$0xf0] }
 0x193   :  { %8817 = vst [vmem:[#allocation8_spill] sm:$0xff] %v6586_v56  ;;  %2278 = vrot.lane.b32.xlu1 %v1234_v23, %s4866_s29  ;;  %v6726_v20 = vor.u32 %v4661_v9, %v4660_v46  ;;  %v6739_v56 = vld [vmem:[%s8537_s1 + $0xa4] ss:$8 sm:$0xf] }
 0x194   :  { %2276 = vrot.lane.b32.xlu0 %v6378_v17, %s4866_s29  ;;  %v4648_v17 = vld [vmem:[%s8537_s1 + $0x62] ss:$8 sm:$0xf]  ;;  %v4666_v46 = vld [vmem:[%s8537_s1 + $0xc0] ss:$8 sm:$0xf] }
 0x195   :  { %v6602_v44 = vpop.permute.xlu1 %1880  ;;  %v6635_v49 = vor.u32 %v4649_v7, %v4648_v17  ;;  %v8824_v17 = vld [vmem:[#allocation27_spill] sm:$0xff] }
 0x196   :  { %v6606_v23 = vpop.permute.xlu0 %1878  ;;  %v6667_v7 = vmul.f32 %v1763_v1, %v8824_v17  ;;  %v6753_v17 = vor.u32 %v4664_v12, %v4663_v25  ;;  %v4667_v9 = vld [vmem:[%s8537_s1 + $0xc0] ss:$8 sm:$0xf0]  ;;  %v6772_v25 = vld [vmem:[%s8537_s1 + $0xa6] ss:$8 sm:$0xf] }
 0x197   :  { %1268 = vrot.lane.b32.xlu1 %v6597_v36, %s4859_s27  ;;  %v1411_v58 = vrot.slane %v6635_v49, %v8801_v50  ;;  %v1415_v26 = vrot.slane %v6635_v49, %v8820_v52  ;;  %8834 = vst [vmem:[#allocation40_spill] sm:$0xff] %v6772_v25  ;;  %v6798_v16 = vor.u32 %v4667_v9, %v4666_v46  ;;  %v8836_v12 = vld [vmem:[#allocation6_spill] sm:$0xff] }
 0x198   :  { %1896 = vrot.lane.b32.xlu0 %v6597_v36, %s4863_s25  ;;  %8833 = vst [vmem:[#allocation39_spill] sm:$0xff] %v6753_v17  ;;  %v1284_v46 = vsel %vm78_vm1, %v6411_v59, %v6409_v11  ;;  %v1283_v9 = vsel %vm78_vm1, %v6409_v11, %v6423_v33  ;;  %8837 = vst [vmem:[#allocation6_spill] sm:$0xff] %v6832_v22  ;;  %v1282_v25 = vsel %vm78_vm1, %v6423_v33, %v6421_v41 }
 0x199   :  { %v6629_v34 = vpop.permute.xlu1 %1884  ;;  %v1285_v11 = vsel %vm78_vm1, %v6431_v6, %v6411_v59  ;;  %v8840_v41 = vrot.slane %v6621_v24, %v8820_v52  ;;  %v1401_v33 = vsel %vm195_vm0, %v6480_v54, %v6429_v3 }
 0x19a   :  { %v6646_v48 = vpop.permute.xlu0 %1882 }
 0x19b   :  { %2024 = vrot.lane.b32.xlu1 %v6597_v36, %s4864_s26 }
 0x19c   :  { %1384 = vrot.lane.b32.xlu0 %v6597_v36, %s4860_s20 }
 0x19d   :  { %v6684_v1 = vpop.permute.xlu1 %1900 }
 0x19e   :  { %8827 = vst [vmem:[#allocation36_spill] sm:$0xff] %v6684_v1  ;;  %v6701_v57 = vpop.permute.xlu0 %1886 }
 0x19f   :  { %8831 = vst [vmem:[#allocation37_spill] sm:$0xff] %v6701_v57  ;;  %2152 = vrot.lane.b32.xlu1 %v6597_v36, %s4865_s28  ;;  %v1465_v57 = vmul.f32 %v1411_v58, %v1400_v4  ;;  %v8839_v4 = vrot.slane %v6621_v24, %v8801_v50  ;;  %v8841_v58 = vrot.slane %v6621_v24, %v8821_v63 }
 0x1a0   :  { %1512 = vrot.lane.b32.xlu0 %v6597_v36, %s4861_s23 }
 0x1a1   :  { %v6743_v55 = vpop.permute.xlu1 %2006  ;;  %v1351_v28 = vmul.f32 %v8841_v58, %v1282_v25  ;;  %v1528_v25 = vsel %vm324_vm2, %v6510_v60, %v6508_v27  ;;  %v8846_v58 = vrot.slane %v6673_v13, %v8801_v50 }
 0x1a2   :  { %v6751_v2 = vpop.permute.xlu0 %1502 }
 0x1a3   :  { %8832 = vst [vmem:[#allocation38_spill] sm:$0xff] %v6751_v2  ;;  %2280 = vrot.lane.b32.xlu1 %v6597_v36, %s4866_s29  ;;  %v1399_v2 = vsel %vm195_vm0, %v6464_v45, %v6451_v32 }
 0x1a4   :  { %1640 = vrot.lane.b32.xlu0 %v6597_v36, %s4862_s24  ;;  %v1466_v30 = vmul.f32 %v1415_v26, %v1399_v2  ;;  %v4669_v36 = vld [vmem:[%s8537_s1 + $0xc1] ss:$8 sm:$0xf]  ;;  %v1349_v26 = vmul.f32 %v8839_v4, %v1284_v46  ;;  %v8842_v46 = vrot.slane %v6621_v24, %v5230_v61 }
 0x1a5   :  { %v6796_v38 = vpop.permute.xlu1 %2010  ;;  %v6886_v3 = vor.u32 %v4670_v42, %v4669_v36 }
 0x1a6   :  { %v6808_v45 = vpop.permute.xlu0 %2008  ;;  %v1348_v4 = vmul.f32 %v8842_v46, %v1285_v11  ;;  %v1527_v11 = vsel %vm324_vm2, %v6508_v27, %v6534_v40  ;;  %v1529_v27 = vsel %vm324_vm2, %v6540_v51, %v6510_v60  ;;  %v1655_v60 = vsel %vm453_vm3, %v6552_v31, %v6560_v43 }
 0x1a7   :  { %2026 = vrot.lane.b32.xlu1 %v8836_v12, %s4864_s26  ;;  %v8847_v46 = vrot.slane %v6673_v13, %v8820_v52 }
 0x1a8   :  { %1898 = vrot.lane.b32.xlu0 %v8836_v12, %s4863_s25 }
 0x1a9   :  { %v6850_v17 = vpop.permute.xlu1 %2014 }
 0x1aa   :  { %8838 = vst [vmem:[#allocation42_spill] sm:$0xff] %v6850_v17  ;;  %v1350_v17 = vmul.f32 %v8840_v41, %v1283_v9  ;;  %v6870_v59 = vpop.permute.xlu0 %2012  ;;  %v1398_v41 = vsel %vm195_vm0, %v6451_v32, %v6482_v47  ;;  %v1477_v9 = vadd.f32 %v1465_v57, %v1349_v26  ;;  %v8843_v32 = vrot.slane %v6635_v49, %v5230_v61 }
 0x1ab   :  { %2282 = vrot.lane.b32.xlu1 %v8836_v12, %s4866_s29  ;;  %v1390_v57 = vsel %vm195_vm0, %v6495_v8, %v6480_v54  ;;  %v1526_v54 = vsel %vm324_vm2, %v6534_v40, %v6528_v15  ;;  %v1593_v26 = vmul.f32 %v8846_v58, %v1528_v25  ;;  %v1594_v40 = vmul.f32 %v8847_v46, %v1527_v11 }
 0x1ac   :  { %v1478_v2 = vadd.f32 %v1466_v30, %v1350_v17  ;;  %2154 = vrot.lane.b32.xlu0 %v8836_v12, %s4865_s28  ;;  %v1464_v42 = vmul.f32 %v8843_v32, %v1401_v33  ;;  %v1274_v30 = vsel %vm78_vm1, %v6501_v53, %v6431_v6  ;;  %v8844_v12 = vrot.slane %v6635_v49, %v8821_v63 }
 0x1ad   :  { %v6913_v17 = vpop.permute.xlu1 %1630  ;;  %v1656_v6 = vsel %vm453_vm3, %v6554_v39, %v6552_v31  ;;  %v1657_v31 = vsel %vm453_vm3, %v6571_v21, %v6554_v39  ;;  %v8848_v32 = vrot.slane %v6651_v14, %v8821_v63  ;;  %v8849_v25 = vrot.slane %v6698_v35, %v8821_v63 }
 0x1ae   :  { %v1467_v36 = vmul.f32 %v8844_v12, %v1398_v41  ;;  %v6930_v33 = vpop.permute.xlu0 %2028  ;;  %v1518_v41 = vsel %vm324_vm2, %v6538_v0, %v6540_v51  ;;  %v8850_v11 = vrot.slane %v6673_v13, %v5230_v61  ;;  %v1654_v51 = vsel %vm453_vm3, %v6560_v43, %v6558_v5 }
 0x1af   :  { %8845 = vst [vmem:[#allocation43_spill] sm:$0xff] %v6930_v33  ;;  %v1475_v12 = vmul.f32 %v8848_v32, %v1390_v57  ;;  %v1359_v58 = vmul.f32 %v8849_v25, %v1274_v30  ;;  %v8851_v39 = vrot.slane %v6673_v13, %v8821_v63  ;;  %v8852_v57 = vrot.slane %v6709_v37, %v8801_v50 }
 0x1b0   :  { %v1592_v46 = vmul.f32 %v8850_v11, %v1529_v27  ;;  %v8853_v30 = vrot.slane %v6709_v37, %v8820_v52  ;;  %v1646_v27 = vsel %vm453_vm3, %v6566_v18, %v6571_v21  ;;  %v1476_v53 = vadd.f32 %v1464_v42, %v1348_v4 }
 0x1b1   :  { %v1595_v0 = vmul.f32 %v8851_v39, %v1526_v54  ;;  %v1721_v32 = vmul.f32 %v8852_v57, %v1656_v6  ;;  %v2137_v11 = vpop.permute.xlu1 %2136  ;;  %v8854_v43 = vrot.slane %v6724_v10, %v8821_v63  ;;  %v8855_v54 = vrot.slane %v6709_v37, %v5230_v61 }
 0x1b2   :  { %v1722_v25 = vmul.f32 %v8853_v30, %v1655_v60  ;;  %v6978_v6 = vpop.permute.xlu0 %2134  ;;  %v1479_v57 = vadd.f32 %v1467_v36, %v1351_v28  ;;  %v1605_v30 = vadd.f32 %v1593_v26, %v1477_v9  ;;  %v1606_v35 = vadd.f32 %v1594_v40, %v1478_v2 }
 0x1b3   :  { %v1603_v8 = vmul.f32 %v8854_v43, %v1518_v41  ;;  %v1720_v39 = vmul.f32 %v8855_v54, %v1657_v31  ;;  %v8856_v21 = vrot.slane %v6709_v37, %v8821_v63  ;;  %v1487_v42 = vadd.f32 %v1475_v12, %v1359_v58  ;;  %v6993_v54 = vld [vmem:[%s8537_s1 + $0x101] ss:$8 sm:$0xf] }
 0x1b4   :  { %v1604_v18 = vadd.f32 %v1592_v46, %v1476_v53  ;;  %v8857_v41 = vrot.slane %v6739_v56, %v8821_v63  ;;  %v2303_v31 = vrot.slane %v6886_v3, %v5230_v61  ;;  %8858 = vst [vmem:[#allocation44_spill] sm:$0xff] %v6993_v54  ;;  %v1607_v28 = vadd.f32 %v1595_v0, %v1479_v57 }
 0x1b5   :  { %v1723_v4 = vmul.f32 %v8856_v21, %v1654_v51  ;;  %v1733_v2 = vadd.f32 %v1721_v32, %v1605_v30  ;;  %v1734_v9 = vadd.f32 %v1722_v25, %v1606_v35  ;;  %v1912_v53 = vsel %vm674_vm4, %v6606_v23, %v6602_v44  ;;  %v2141_v36 = vpop.permute.xlu1 %2140 }
 0x1b6   :  { %v1731_v43 = vmul.f32 %v8857_v41, %v1646_v27  ;;  %v1615_v26 = vadd.f32 %v1603_v8, %v1487_v42  ;;  %v1732_v40 = vadd.f32 %v1720_v39, %v1604_v18  ;;  %v1911_v12 = vsel %vm674_vm4, %v6602_v44, %v6646_v48  ;;  %v2139_v58 = vpop.permute.xlu0 %2138 }
 0x1b7   :  { %v2307_v46 = vrot.slane %v6886_v3, %v8801_v50  ;;  %v1735_v0 = vadd.f32 %v1723_v4, %v1607_v28  ;;  %v2040_v35 = vsel %vm803_vm5, %v6743_v55, %v6808_v45  ;;  %v2311_v51 = vrot.slane %v6886_v3, %v8820_v52 }
 0x1b8   :  { %v1743_v18 = vadd.f32 %v1731_v43, %v1615_v26  ;;  %v8859_v44 = vrot.slane %v6726_v20, %v5230_v61  ;;  %v1910_v25 = vsel %vm674_vm4, %v6646_v48, %v6629_v34  ;;  %v8860_v39 = vrot.slane %v6664_v62, 4 }
 0x1b9   :  { %v8861_v30 = vrot.slane %v6667_v7, 4  ;;  %v8862_v4 = vrot.slane %v6726_v20, %v8801_v50  ;;  %v2168_v41 = vsel %vm932_vm6, %v6978_v6, %v2137_v11  ;;  %v7032_v43 = vpop.permute.xlu1 %2156  ;;  %v8864_v48 = vrot.slane %v6644_v29, 4 }
 0x1ba   :  { %v1976_v32 = vmul.f32 %v8859_v44, %v1912_v53  ;;  %v1861_v57 = vadd.f32 %v8860_v39, %v1733_v2  ;;  %8863 = vst [vmem:[#allocation45_spill] sm:$0xff] %v7032_v43  ;;  %v1913_v62 = vsel %vm674_vm4, %v6684_v1, %v6606_v23  ;;  %v2039_v7 = vsel %vm803_vm5, %v6808_v45, %v6796_v38  ;;  %v8865_v2 = vld [vmem:[#allocation39_spill] sm:$0xff]  ;;  %v7047_v26 = vpop.permute.xlu0 %2142  ;;  %v8909_v1 = vld [vmem:[#allocation5_spill] sm:$0xff] }
 0x1bb   :  { %v1862_v21 = vadd.f32 %v8861_v30, %v1734_v9  ;;  %v1977_v42 = vmul.f32 %v8862_v4, %v1911_v12  ;;  %v1860_v28 = vadd.f32 %v8864_v48, %v1732_v40  ;;  %v8866_v9 = vrot.slane %v8865_v2, %v5230_v61  ;;  %v8868_v12 = vld [vmem:[#allocation19_spill] sm:$0xff]  ;;  %v8870_v30 = vld [vmem:[#allocation37_spill] sm:$0xff]  ;;  %v8871_v4 = vld [vmem:[#allocation30_spill] sm:$0xff] }
 0x1bc   :  { %v8867_v29 = vrot.slane %v6726_v20, %v8820_v52  ;;  %v8869_v44 = vrot.slane %v8868_v12, 4  ;;  %v1909_v23 = vsel %vm674_vm4, %v6629_v34, %v8870_v30  ;;  %v2038_v45 = vsel %vm803_vm5, %v6796_v38, %v6870_v59 }
 0x1bd   :  { %v2104_v53 = vmul.f32 %v8866_v9, %v2040_v35  ;;  %v1988_v35 = vadd.f32 %v1976_v32, %v1860_v28  ;;  %v8872_v48 = vrot.slane %v8871_v4, 4  ;;  %v1989_v12 = vadd.f32 %v1977_v42, %v1861_v57 }
 0x1be   :  { %v1978_v40 = vmul.f32 %v8867_v29, %v1910_v25  ;;  %v1863_v39 = vadd.f32 %v8869_v44, %v1735_v0  ;;  %v8873_v25 = vrot.slane %v6798_v16, %v5230_v61  ;;  %v2167_v0 = vsel %vm932_vm6, %v2137_v11, %v2139_v58  ;;  %v8874_v44 = vld [vmem:[#allocation40_spill] sm:$0xff] }
 0x1bf   :  { %v1871_v9 = vadd.f32 %v8872_v48, %v1743_v18  ;;  %v8875_v34 = vrot.slane %v8874_v44, %v8821_v63  ;;  %v8876_v8 = vrot.slane %v8865_v2, %v8801_v50  ;;  %v2166_v32 = vsel %vm932_vm6, %v2139_v58, %v2141_v36  ;;  %v2265_v18 = vpop.permute.xlu1 %2264 }
 0x1c0   :  { %v2232_v29 = vmul.f32 %v8873_v25, %v2168_v41  ;;  %v8877_v28 = vrot.slane %v6726_v20, %v8821_v63  ;;  %v2116_v4 = vadd.f32 %v2104_v53, %v1988_v35  ;;  %v8878_v11 = vrot.slane %v8865_v2, %v8820_v52 }
 0x1c1   :  { %v1987_v27 = vmul.f32 %v8875_v34, %v1913_v62  ;;  %v2105_v38 = vmul.f32 %v8876_v8, %v2039_v7  ;;  %v2041_v42 = vsel %vm803_vm5, %v6930_v33, %v6743_v55  ;;  %v2263_v62 = vpop.permute.xlu0 %2262  ;;  %v1990_v8 = vadd.f32 %v1978_v40, %v1862_v21  ;;  %v8879_v7 = vld [vmem:[#allocation42_spill] sm:$0xff]  ;;  %v8882_v34 = vld [vmem:[#allocation41_spill] sm:$0xff] }
 0x1c2   :  { %v1979_v41 = vmul.f32 %v8877_v28, %v1909_v23  ;;  %v2106_v57 = vmul.f32 %v8878_v11, %v2038_v45  ;;  %v2037_v58 = vsel %vm803_vm5, %v6870_v59, %v8879_v7  ;;  %v8880_v23 = vrot.slane %v6798_v16, %v8801_v50 }
 0x1c3   :  { %v2296_v35 = vsel %vm1061_vm7, %v2263_v62, %v2265_v18  ;;  %v2244_v45 = vadd.f32 %v2232_v29, %v2116_v4  ;;  %v8881_v48 = vrot.slane %v6798_v16, %v8820_v52  ;;  %v2169_v55 = vsel %vm932_vm6, %v7032_v43, %v6978_v6  ;;  %v2269_v4 = vpop.permute.xlu1 %2268 }
 0x1c4   :  { %v2233_v53 = vmul.f32 %v8880_v23, %v2167_v0  ;;  %v2360_v21 = vmul.f32 %v2303_v31, %v2296_v35  ;;  %v1999_v40 = vadd.f32 %v1987_v27, %v1871_v9  ;;  %v2117_v59 = vadd.f32 %v2105_v38, %v1989_v12 }
 0x1c5   :  { %v2234_v25 = vmul.f32 %v8881_v48, %v2166_v32  ;;  %v8883_v28 = vrot.slane %v8882_v34, %v8821_v63  ;;  %v2165_v29 = vsel %vm932_vm6, %v2141_v36, %v7047_v26  ;;  %v1991_v11 = vadd.f32 %v1979_v41, %v1863_v39  ;;  %v2267_v6 = vpop.permute.xlu0 %2266 }
 0x1c6   :  { %v8884_v32 = vrot.slane %v8865_v2, %v8821_v63  ;;  %v2118_v48 = vadd.f32 %v2106_v57, %v1990_v8  ;;  %v2372_v60 = vadd.f32 %v2360_v21, %v2244_v45  ;;  %v2245_v31 = vadd.f32 %v2233_v53, %v2117_v59 }
 0x1c7   :  { %v2115_v0 = vmul.f32 %v8883_v28, %v2041_v42  ;;  %v8885_v27 = vrot.slane %v6832_v22, %v8821_v63  ;;  %v2294_v12 = vsel %vm1061_vm7, %v2267_v6, %v2269_v4  ;;  %v2295_v36 = vsel %vm1061_vm7, %v2265_v18, %v2267_v6 }
 0x1c8   :  { %v2107_v23 = vmul.f32 %v8884_v32, %v2037_v58  ;;  %v2246_v38 = vadd.f32 %v2234_v25, %v2118_v48  ;;  %v8886_v39 = vrot.slane %v6798_v16, %v8821_v63  ;;  %2384 = vst [vmem:[#allocation2] sm:$0xf] %v2372_v60  ;;  %v2361_v57 = vmul.f32 %v2307_v46, %v2295_v36  ;;  %v7122_v58 = vpop.permute.xlu1 %2284 }
 0x1c9   :  { %v2243_v9 = vmul.f32 %v8885_v27, %v2169_v55  ;;  %v2362_v42 = vmul.f32 %v2311_v51, %v2294_v12  ;;  %v2127_v8 = vadd.f32 %v2115_v0, %v1999_v40  ;;  %8887 = vst [vmem:[#allocation39_spill] sm:$0xff] %v7122_v58  ;;  %v2297_v55 = vsel %vm1061_vm7, %v7122_v58, %v2263_v62  ;;  %v7127_v21 = vpop.permute.xlu0 %2270  ;;  %v8892_v27 = vld [vmem:[#allocation27_spill] sm:$0xff] }
 0x1ca   :  { %v2235_v41 = vmul.f32 %v8886_v39, %v2165_v29  ;;  %v2119_v53 = vadd.f32 %v2107_v23, %v1991_v11  ;;  %v2373_v35 = vadd.f32 %v2361_v57, %v2245_v31  ;;  %v8888_v25 = vrot.slane %v6993_v54, %v8821_v63  ;;  %v8891_v31 = vld [vmem:[#allocation22_spill] sm:$0xff]  ;;  %v8894_v39 = vld [vmem:[#allocation7_spill] sm:$0xff]  ;;  %v8895_v57 = vld [vmem:[#allocation8_spill] sm:$0xff] }
 0x1cb   :  { %v2374_v45 = vadd.f32 %v2362_v42, %v2246_v38  ;;  %v2255_v18 = vadd.f32 %v2243_v9, %v2127_v8  ;;  %v2293_v60 = vsel %vm1061_vm7, %v2269_v4, %v7127_v21  ;;  %v8889_v51 = vrot.slane %v6886_v3, %v8821_v63  ;;  %v8890_v4 = vld [vmem:[#allocation20_spill] sm:$0xff]  ;;  %v8896_v42 = vld [vmem:[#allocation13_spill] sm:$0xff]  ;;  %v8907_v58 = vld [vmem:[#allocation23_spill] sm:$0xff] }
 0x1cc   :  { %v2371_v59 = vmul.f32 %v8888_v25, %v2297_v55  ;;  %v2247_v46 = vadd.f32 %v2235_v41, %v2119_v53  ;;  %2385 = vst [vmem:[#allocation2 + $0x8] sm:$0xf] %v2373_v35  ;;  %v7138_v62 = vpop.permute.xlu1 %1260  ;;  %v8893_v9 = vld [vmem:[#allocation32_spill] sm:$0xff]  ;;  %v1397_v41 = vsel %vm195_vm0, %v6482_v47, %v8894_v39  ;;  %v1281_v8 = vsel %vm78_vm1, %v8896_v42, %v8895_v57  ;;  %v8899_v25 = vld [vmem:[#allocation38_spill] sm:$0xff] }
 0x1cd   :  { %2386 = vst [vmem:[#allocation2 + $0x10] sm:$0xf] %v2374_v45  ;;  %v2363_v40 = vmul.f32 %v8889_v51, %v2293_v60  ;;  %v7140_v29 = vpop.permute.xlu0 %1888  ;;  %v1423_v12 = vrot.slane %v6635_v49, %v8893_v9  ;;  %v1307_v36 = vrot.slane %v6621_v24, %v8893_v9  ;;  %v1551_v45 = vrot.slane %v6673_v13, %v8893_v9 }
 0x1ce   :  { %v2383_v28 = vadd.f32 %v2371_v59, %v2255_v18  ;;  %v8898_v18 = vld [vmem:[#allocation35_spill] sm:$0xff]  ;;  %v1525_v47 = vsel %vm324_vm2, %v6528_v15, %v8899_v25  ;;  %v8900_v59 = vld [vmem:[#allocation26_spill] sm:$0xff]  ;;  %v1679_v51 = vrot.slane %v6709_v37, %v8893_v9  ;;  %v1653_v15 = vsel %vm453_vm3, %v6558_v5, %v6913_v17 }
 0x1cf   :  { %v2375_v0 = vadd.f32 %v2363_v40, %v2247_v46  ;;  %v7142_v11 = vld [vmem:[#allocation2] sm:$0xff]  ;;  %v1468_v60 = vmul.f32 %v1423_v12, %v1397_v41  ;;  %v1352_v46 = vmul.f32 %v1307_v36, %v1281_v8  ;;  %v8902_v5 = vld [vmem:[#allocation15_spill] sm:$0xff] }
 0x1d0   :  { %2395 = vst [vmem:[#allocation2 + $0x58] sm:$0xf] %v2383_v28  ;;  %2456 = vrot.lane.b32.xlu0 %v7142_v11, %s4859_s27  ;;  %4580 = vst [vmem:[#allocation2] sm:$0xf0] %v8890_v4  ;;  %v7147_v32 = vpop.permute.xlu1 %1264  ;;  %v8901_v4 = vld [vmem:[#allocation9_spill] sm:$0xff]  ;;  %v1724_v12 = vmul.f32 %v1679_v51, %v1653_v15 }
 0x1d1   :  { %2387 = vst [vmem:[#allocation2 + $0x18] sm:$0xf] %v2375_v0  ;;  %v7149_v23 = vpop.permute.xlu0 %1262  ;;  %v1596_v0 = vmul.f32 %v1551_v45, %v1525_v47  ;;  %v1935_v45 = vrot.slane %v6726_v20, %v8893_v9 }
 0x1d2   :  { %v1279_v44 = vsel %vm78_vm1, %v7138_v62, %v7149_v23 }
 0x1d3   :  { %v7151_v48 = vld [vmem:[#allocation2 + $0x8] sm:$0xff] }
 0x1d4   :  { %v7153_v6 = vld [vmem:[#allocation2 + $0x10] sm:$0xff]  ;;  %2458 = vrot.lane.b32.xlu1 %v7151_v48, %s4859_s27  ;;  %4581 = vst [vmem:[#allocation2 + $0x8] sm:$0xf0] %v8891_v31  ;;  %v7165_v38 = vpop.permute.xlu1 %1378  ;;  %v1771_v31 = vrot.slane %v8901_v4, %v8893_v9 }
 0x1d5   :  { %2460 = vrot.lane.b32.xlu0 %v7153_v6, %s4859_s27  ;;  %4582 = vst [vmem:[#allocation2 + $0x10] sm:$0xf0] %v8892_v27  ;;  %v7175_v53 = vpop.permute.xlu0 %1376  ;;  %v1480_v27 = vadd.f32 %v1468_v60, %v1352_v46 }
 0x1d6   :  { %v1816_v8 = vmul.f32 %v1771_v31, %v8902_v5 }
 0x1d7   :  { %v7177_v35 = vld [vmem:[#allocation2 + $0x58] sm:$0xff]  ;;  %v1608_v42 = vadd.f32 %v1596_v0, %v1480_v27  ;;  %v2191_v0 = vrot.slane %v6798_v16, %v8893_v9 }
 0x1d8   :  { %8897 = vst [vmem:[#allocation19_spill] sm:$0xff] %v7177_v35  ;;  %v7181_v55 = vld [vmem:[#allocation2 + $0x18] sm:$0xff]  ;;  %4591 = vst [vmem:[#allocation2 + $0x58] sm:$0xf0] %v8898_v18  ;;  %v7195_v40 = vpop.permute.xlu1 %2016  ;;  %v1908_v18 = vsel %vm674_vm4, %v8870_v30, %v7140_v29  ;;  %v1840_v30 = vrot.slane %v1816_v8, 4 }
 0x1d9   :  { %2584 = vrot.lane.b32.xlu0 %v7142_v11, %s4860_s20  ;;  %2462 = vrot.lane.b32.xlu1 %v7181_v55, %s4859_s27  ;;  %4583 = vst [vmem:[#allocation2 + $0x18] sm:$0xf0] %v8900_v59  ;;  %v7201_v28 = vpop.permute.xlu0 %1380  ;;  %v1736_v47 = vadd.f32 %v1724_v12, %v1608_v42  ;;  %v2063_v59 = vrot.slane %v8865_v2, %v8893_v9 }
 0x1da   :  { %v2036_v46 = vsel %vm803_vm5, %v8879_v7, %v7195_v40  ;;  %v1980_v15 = vmul.f32 %v1935_v45, %v1908_v18  ;;  %v2319_v18 = vrot.slane %v6886_v3, %v8893_v9  ;;  %v8906_v9 = vld [vmem:[#allocation4_spill] sm:$0xff] }
 0x1db   :  { %v1864_v27 = vadd.f32 %v1840_v30, %v1736_v47  ;;  %v2108_v7 = vmul.f32 %v2063_v59, %v2036_v46  ;;  %v8904_v46 = vld [vmem:[#allocation11_spill] sm:$0xff]  ;;  %v1691_v22 = vrot.slane %v6709_v37, %v8906_v9 }
 0x1dc   :  { %v7209_v36 = vpop.permute.xlu1 %1506  ;;  %v1775_v30 = vrot.slane %v8901_v4, %v8904_v46  ;;  %v1427_v54 = vrot.slane %v6635_v49, %v8904_v46 }
 0x1dd   :  { %2588 = vrot.lane.b32.xlu0 %v7153_v6, %s4860_s20  ;;  %2586 = vrot.lane.b32.xlu1 %v7151_v48, %s4860_s20  ;;  %v7211_v41 = vpop.permute.xlu0 %1504  ;;  %v1992_v8 = vadd.f32 %v1980_v15, %v1864_v27 }
 0x1de   :  { %v1524_v52 = vsel %vm324_vm2, %v8899_v25, %v7211_v41  ;;  %v1523_v25 = vsel %vm324_vm2, %v7211_v41, %v7209_v36 }
 0x1e0   :  { %v7226_v60 = vpop.permute.xlu1 %2144 }
 0x1e1   :  { %2478 = vrot.lane.b32.xlu0 %v7177_v35, %s4859_s27  ;;  %2590 = vrot.lane.b32.xlu1 %v7181_v55, %s4860_s20  ;;  %v7232_v51 = vpop.permute.xlu0 %1508  ;;  %v2164_v31 = vsel %vm932_vm6, %v7047_v26, %v7226_v60  ;;  %v2120_v26 = vadd.f32 %v2108_v7, %v1992_v8  ;;  %v1783_v7 = vrot.slane %v8901_v4, %v8906_v9 }
 0x1e2   :  { %v2236_v45 = vmul.f32 %v2191_v0, %v2164_v31  ;;  %v8905_v31 = vld [vmem:[#allocation24_spill] sm:$0xff] }
 0x1e3   :  { %v1779_v27 = vrot.slane %v8901_v4, %v8905_v31  ;;  %v1311_v4 = vrot.slane %v6621_v24, %v8904_v46 }
 0x1e4   :  { %v7244_v12 = vpop.permute.xlu1 %1634  ;;  %v2248_v15 = vadd.f32 %v2236_v45, %v2120_v26  ;;  %v7277_v45 = vmul.f32 %v1775_v30, %v8907_v58  ;;  %v1319_v30 = vrot.slane %v6621_v24, %v8906_v9  ;;  %v1431_v26 = vrot.slane %v6635_v49, %v8905_v31 }
 0x1e5   :  { %2712 = vrot.lane.b32.xlu0 %v7142_v11, %s4861_s23  ;;  %2606 = vrot.lane.b32.xlu1 %v7177_v35, %s4860_s20  ;;  %v7246_v42 = vpop.permute.xlu0 %1632  ;;  %v7286_v33 = vmul.f32 %v1779_v27, %v8909_v1  ;;  %v1435_v27 = vrot.slane %v6635_v49, %v8906_v9  ;;  %v1396_v1 = vsel %vm195_vm0, %v8894_v39, %v7175_v53 }
 0x1e6   :  { %v1683_v58 = vrot.slane %v6709_v37, %v8904_v46  ;;  %v1687_v49 = vrot.slane %v6709_v37, %v8905_v31  ;;  %v1280_v37 = vsel %vm78_vm1, %v8895_v57, %v7138_v62  ;;  %v1469_v57 = vmul.f32 %v1427_v54, %v1396_v1 }
 0x1e7   :  { %v1394_v39 = vsel %vm195_vm0, %v7165_v38, %v7201_v28  ;;  %v1652_v1 = vsel %vm453_vm3, %v6913_v17, %v7246_v42  ;;  %v1353_v50 = vmul.f32 %v1311_v4, %v1280_v37  ;;  %v1522_v4 = vsel %vm324_vm2, %v7209_v36, %v7232_v51 }
 0x1e8   :  { %v7254_v63 = vpop.permute.xlu1 %2272  ;;  %v1841_v37 = vrot.slane %v7277_v45, 4  ;;  %v2071_v45 = vrot.slane %v8865_v2, %v8905_v31 }
 0x1e9   :  { %2716 = vrot.lane.b32.xlu0 %v7153_v6, %s4861_s23  ;;  %2714 = vrot.lane.b32.xlu1 %v7151_v48, %s4861_s23  ;;  %8903 = vst [vmem:[#allocation37_spill] sm:$0xff] %v7254_v63  ;;  %v2292_v47 = vsel %vm1061_vm7, %v7127_v21, %v7254_v63  ;;  %v7260_v59 = vpop.permute.xlu0 %1636 }
 0x1ea   :  { %v2364_v0 = vmul.f32 %v2319_v18, %v2292_v47  ;;  %v1315_v47 = vrot.slane %v6621_v24, %v8905_v31  ;;  %v1559_v24 = vrot.slane %v6673_v13, %v8905_v31  ;;  %v1939_v18 = vrot.slane %v6726_v20, %v8904_v46 }
 0x1eb   :  { %v1650_v36 = vsel %vm453_vm3, %v7244_v12, %v7260_v59 }
 0x1ec   :  { %v2376_v21 = vadd.f32 %v2364_v0, %v2248_v15  ;;  %v7272_v8 = vpop.permute.xlu1 %1382  ;;  %v8910_v15 = vld [vmem:[#allocation25_spill] sm:$0xff]  ;;  %v1354_v17 = vmul.f32 %v1315_v47, %v1279_v44  ;;  %v1598_v54 = vmul.f32 %v1559_v24, %v1523_v25  ;;  %v2067_v44 = vrot.slane %v8865_v2, %v8904_v46 }
 0x1ed   :  { %2840 = vrot.lane.b32.xlu0 %v7142_v11, %s4862_s24  ;;  %2718 = vrot.lane.b32.xlu1 %v7181_v55, %s4861_s23  ;;  %v7274_v43 = vpop.permute.xlu0 %1266  ;;  %v7289_v0 = vmul.f32 %v1783_v7, %v8910_v15  ;;  %v1555_v7 = vrot.slane %v6673_v13, %v8904_v46 }
 0x1ee   :  { %2388 = vst [vmem:[#allocation2 + $0x20] sm:$0xf] %v2376_v21  ;;  %v1563_v21 = vrot.slane %v6673_v13, %v8906_v9  ;;  %v1395_v13 = vsel %vm195_vm0, %v7175_v53, %v7165_v38  ;;  %v1651_v38 = vsel %vm453_vm3, %v7246_v42, %v7244_v12  ;;  %v1725_v42 = vmul.f32 %v1683_v58, %v1652_v1 }
 0x1ef   :  { %v1470_v63 = vmul.f32 %v1431_v26, %v1395_v13  ;;  %v1278_v26 = vsel %vm78_vm1, %v7149_v23, %v7147_v32  ;;  %v1597_v13 = vmul.f32 %v1555_v7, %v1524_v52  ;;  %v1481_v52 = vadd.f32 %v1469_v57, %v1353_v50 }
 0x1f0   :  { %v7309_v15 = vpop.permute.xlu1 %1892  ;;  %v1471_v23 = vmul.f32 %v1435_v27, %v1394_v39  ;;  %v1726_v47 = vmul.f32 %v1687_v49, %v1651_v38  ;;  %v1355_v25 = vmul.f32 %v1319_v30, %v1278_v26  ;;  %v1599_v50 = vmul.f32 %v1563_v21, %v1522_v4 }
 0x1f1   :  { %2844 = vrot.lane.b32.xlu0 %v7153_v6, %s4862_s24  ;;  %2842 = vrot.lane.b32.xlu1 %v7151_v48, %s4862_s24  ;;  %v7321_v34 = vpop.permute.xlu0 %1890  ;;  %v1695_v58 = vrot.slane %v6739_v56, %v5230_v61  ;;  %v1842_v39 = vrot.slane %v7286_v33, 4  ;;  %v2075_v12 = vrot.slane %v8865_v2, %v8906_v9  ;;  %v1727_v49 = vmul.f32 %v1691_v22, %v1650_v36 }
 0x1f2   :  { %v1483_v30 = vadd.f32 %v1471_v23, %v1355_v25  ;;  %v2195_v33 = vrot.slane %v6798_v16, %v8904_v46  ;;  %v2199_v26 = vrot.slane %v6798_v16, %v8905_v31  ;;  %v2323_v2 = vrot.slane %v6886_v3, %v8904_v46 }
 0x1f3   :  { %v1906_v22 = vsel %vm674_vm4, %v7321_v34, %v7309_v15  ;;  %v2203_v38 = vrot.slane %v6798_v16, %v8906_v9  ;;  %v1277_v23 = vsel %vm78_vm1, %v7147_v32, %v7274_v43  ;;  %v8913_v36 = vrot.slane %v6651_v14, %v5230_v61 }
 0x1f4   :  { %v7357_v53 = vpop.permute.xlu1 %1510 }
 0x1f5   :  { %2734 = vrot.lane.b32.xlu0 %v7177_v35, %s4861_s23  ;;  %2846 = vrot.lane.b32.xlu1 %v7181_v55, %s4862_s24  ;;  %v7369_v62 = vpop.permute.xlu0 %1894  ;;  %v7371_v41 = vld [vmem:[#allocation2 + $0x20] sm:$0xff] }
 0x1f6   :  { %4584 = vst [vmem:[#allocation2 + $0x20] sm:$0xf0] %v8902_v5  ;;  %v1482_v5 = vadd.f32 %v1470_v63, %v1354_v17  ;;  %v1907_v63 = vsel %vm674_vm4, %v7140_v29, %v7321_v34  ;;  %v1843_v17 = vrot.slane %v7289_v0, 4  ;;  %v2327_v34 = vrot.slane %v6886_v3, %v8905_v31 }
 0x1f8   :  { %v2021_v7 = vpop.permute.xlu1 %2020  ;;  %v1610_v27 = vadd.f32 %v1598_v54, %v1482_v5  ;;  %v8912_v5 = vrot.slane %v6726_v20, %v8905_v31 }
 0x1f9   :  { %2982 = vrot.lane.b32.xlu0 %v7151_v48, %s4863_s25  ;;  %2862 = vrot.lane.b32.xlu1 %v7177_v35, %s4862_s24  ;;  %v2019_v24 = vpop.permute.xlu0 %2018  ;;  %v1609_v35 = vadd.f32 %v1597_v13, %v1481_v52  ;;  %v1981_v13 = vmul.f32 %v1939_v18, %v1907_v63  ;;  %v2331_v18 = vrot.slane %v6886_v3, %v8906_v9  ;;  %v8915_v63 = vld [vmem:[#allocation21_spill] sm:$0xff] }
 0x1fa   :  { %v1738_v1 = vadd.f32 %v1726_v47, %v1610_v27  ;;  %v2035_v29 = vsel %vm803_vm5, %v7195_v40, %v2019_v24  ;;  %v1393_v40 = vsel %vm195_vm0, %v7201_v28, %v7272_v8  ;;  %v1905_v28 = vsel %vm674_vm4, %v7309_v15, %v7369_v62 }
 0x1fb   :  { %v1737_v21 = vadd.f32 %v1725_v42, %v1609_v35  ;;  %v1611_v35 = vadd.f32 %v1599_v50, %v1483_v30  ;;  %v2109_v0 = vmul.f32 %v2067_v44, %v2035_v29  ;;  %v1982_v47 = vmul.f32 %v8912_v5, %v1906_v22 }
 0x1fc   :  { %v7412_v57 = vpop.permute.xlu1 %1638  ;;  %v1866_v42 = vadd.f32 %v1842_v39, %v1738_v1  ;;  %v2034_v3 = vsel %vm803_vm5, %v2019_v24, %v2021_v7  ;;  %v1472_v15 = vmul.f32 %v8913_v36, %v1393_v40  ;;  %v8914_v50 = vrot.slane %v6726_v20, %v8906_v9 }
 0x1fd   :  { %2986 = vrot.lane.b32.xlu0 %v7181_v55, %s4863_s25  ;;  %2984 = vrot.lane.b32.xlu1 %v7153_v6, %s4863_s25  ;;  %v7419_v54 = vpop.permute.xlu0 %2022  ;;  %v1739_v16 = vadd.f32 %v1727_v49, %v1611_v35  ;;  %v1865_v4 = vadd.f32 %v1841_v37, %v1737_v21  ;;  %v8917_v35 = vld [vmem:[#allocation37_spill] sm:$0xff]  ;;  %v8920_v5 = vrot.slane %v6724_v10, %v5230_v61 }
 0x1fe   :  { %v2033_v25 = vsel %vm803_vm5, %v2021_v7, %v7419_v54  ;;  %v1983_v27 = vmul.f32 %v8914_v50, %v1905_v28  ;;  %v8916_v7 = vrot.slane %v8915_v63, %v5230_v61  ;;  %v1994_v20 = vadd.f32 %v1982_v47, %v1866_v42 }
 0x1ff   :  { %v1993_v44 = vadd.f32 %v1981_v13, %v1865_v4  ;;  %v1867_v21 = vadd.f32 %v1843_v17, %v1739_v16  ;;  %v2111_v29 = vmul.f32 %v2075_v12, %v2033_v25 }
 0x200   :  { %v2149_v52 = vpop.permute.xlu1 %2148  ;;  %v1356_v30 = vmul.f32 %v8916_v7, %v1277_v23  ;;  %v8919_v23 = vld [vmem:[#allocation12_spill] sm:$0xff] }
 0x201   :  { %2980 = vrot.lane.b32.xlu0 %v7142_v11, %s4863_s25  ;;  %2988 = vrot.lane.b32.xlu1 %v7371_v41, %s4863_s25  ;;  %v2147_v37 = vpop.permute.xlu0 %2146  ;;  %v2121_v49 = vadd.f32 %v2109_v0, %v1993_v44  ;;  %v1995_v17 = vadd.f32 %v1983_v27, %v1867_v21  ;;  %v8918_v0 = vld [vmem:[#allocation18_spill] sm:$0xff]  ;;  %v8923_v21 = vld [vmem:[#allocation40_spill] sm:$0xff] }
 0x202   :  { %v2163_v32 = vsel %vm932_vm6, %v7226_v60, %v2147_v37  ;;  %v2162_v24 = vsel %vm932_vm6, %v2147_v37, %v2149_v52  ;;  %v2110_v60 = vmul.f32 %v2071_v45, %v2034_v3  ;;  %v1484_v42 = vadd.f32 %v1472_v15, %v1356_v30  ;;  %v8921_v3 = vld [vmem:[#allocation29_spill] sm:$0xff] }
 0x203   :  { %v2237_v39 = vmul.f32 %v2195_v33, %v2163_v32  ;;  %v1521_v33 = vsel %vm324_vm2, %v7232_v51, %v7357_v53  ;;  %v2238_v40 = vmul.f32 %v2199_v26, %v2162_v24  ;;  %v1649_v51 = vsel %vm453_vm3, %v7260_v59, %v7412_v57 }
 0x204   :  { %v2275_v1 = vpop.permute.xlu1 %2274  ;;  %v2122_v26 = vadd.f32 %v2110_v60, %v1994_v20  ;;  %v1600_v47 = vmul.f32 %v8920_v5, %v1521_v33  ;;  %v2123_v59 = vadd.f32 %v2111_v29, %v1995_v17  ;;  %v8922_v37 = vrot.slane %v8919_v23, %v5230_v61  ;;  %v8925_v29 = vld [vmem:[#allocation41_spill] sm:$0xff] }
 0x205   :  { %3112 = vrot.lane.b32.xlu0 %v7153_v6, %s4864_s26  ;;  %3110 = vrot.lane.b32.xlu1 %v7151_v48, %s4864_s26  ;;  %v2291_v22 = vsel %vm1061_vm7, %v8917_v35, %v2275_v1  ;;  %v7485_v13 = vpop.permute.xlu0 %2150  ;;  %v2249_v4 = vadd.f32 %v2237_v39, %v2121_v49  ;;  %v1728_v44 = vmul.f32 %v1695_v58, %v1649_v51 }
 0x206   :  { %v2365_v28 = vmul.f32 %v2323_v2, %v2291_v22  ;;  %v2161_v45 = vsel %vm932_vm6, %v2149_v52, %v7485_v13  ;;  %v1795_v52 = vrot.slane %v8919_v23, %v8918_v0  ;;  %v1820_v36 = vmul.f32 %v8922_v37, %v8921_v3  ;;  %v8926_v22 = vld [vmem:[#allocation14_spill] sm:$0xff] }
 0x207   :  { %v2239_v12 = vmul.f32 %v2203_v38, %v2161_v45  ;;  %v2250_v25 = vadd.f32 %v2238_v40, %v2122_v26  ;;  %v1612_v58 = vadd.f32 %v1600_v47, %v1484_v42  ;;  %v1951_v60 = vrot.slane %v8923_v21, %v5230_v61 }
 0x208   :  { %v2377_v16 = vadd.f32 %v2365_v28, %v2249_v4  ;;  %v7498_v2 = vpop.permute.xlu1 %2278  ;;  %v1844_v33 = vrot.slane %v1820_v36, 4  ;;  %v2079_v35 = vrot.slane %v8925_v29, %v5230_v61  ;;  %v7538_v40 = vmul.f32 %v1795_v52, %v8926_v22 }
 0x209   :  { %3116 = vrot.lane.b32.xlu0 %v7371_v41, %s4864_s26  ;;  %3114 = vrot.lane.b32.xlu1 %v7181_v55, %s4864_s26  ;;  %v2277_v38 = vpop.permute.xlu0 %2276  ;;  %v2251_v50 = vadd.f32 %v2239_v12, %v2123_v59  ;;  %v1740_v20 = vadd.f32 %v1728_v44, %v1612_v58  ;;  %v1331_v4 = vrot.slane %v8915_v63, %v8918_v0  ;;  %v8929_v59 = vld [vmem:[#allocation23_spill] sm:$0xff] }
 0x20a   :  { %2389 = vst [vmem:[#allocation2 + $0x28] sm:$0xf] %v2377_v16  ;;  %v2289_v15 = vsel %vm1061_vm7, %v2277_v38, %v7498_v2  ;;  %v2290_v32 = vsel %vm1061_vm7, %v2275_v1, %v2277_v38  ;;  %v1447_v17 = vrot.slane %v6651_v14, %v8918_v0  ;;  %v8927_v16 = vld [vmem:[#allocation6_spill] sm:$0xff]  ;;  %v1575_v47 = vrot.slane %v6724_v10, %v8918_v0  ;;  %v8930_v38 = vld [vmem:[#allocation31_spill] sm:$0xff] }
 0x20b   :  { %v2366_v27 = vmul.f32 %v2327_v34, %v2290_v32  ;;  %v2367_v24 = vmul.f32 %v2331_v18, %v2289_v15  ;;  %v8924_v18 = vld [vmem:[#allocation17_spill] sm:$0xff]  ;;  %v1868_v36 = vadd.f32 %v1844_v33, %v1740_v20  ;;  %v1703_v32 = vrot.slane %v6739_v56, %v8918_v0 }
 0x20c   :  { %v1269_v39 = vpop.permute.xlu1 %1268  ;;  %v1791_v1 = vrot.slane %v8919_v23, %v8924_v18  ;;  %v1443_v45 = vrot.slane %v6651_v14, %v8924_v18  ;;  %v2207_v23 = vrot.slane %v8927_v16, %v5230_v61  ;;  %v8928_v14 = vld [vmem:[#allocation28_spill] sm:$0xff]  ;;  %v1699_v15 = vrot.slane %v6739_v56, %v8924_v18 }
 0x20d   :  { %3240 = vrot.lane.b32.xlu0 %v7153_v6, %s4865_s28  ;;  %3238 = vrot.lane.b32.xlu1 %v7151_v48, %s4865_s28  ;;  %v2378_v7 = vadd.f32 %v2366_v27, %v2250_v25  ;;  %v2379_v30 = vadd.f32 %v2367_v24, %v2251_v50  ;;  %v7523_v49 = vpop.permute.xlu0 %1896  ;;  %v1276_v42 = vsel %vm78_vm1, %v7274_v43, %v1269_v39 }
 0x20e   :  { %v1904_v34 = vsel %vm674_vm4, %v7369_v62, %v7523_v49  ;;  %v1327_v62 = vrot.slane %v8915_v63, %v8924_v18  ;;  %v1571_v63 = vrot.slane %v6724_v10, %v8924_v18  ;;  %v1275_v37 = vsel %vm78_vm1, %v1269_v39, %v8930_v38 }
 0x20f   :  { %2390 = vst [vmem:[#allocation2 + $0x30] sm:$0xf] %v2378_v7  ;;  %2391 = vst [vmem:[#allocation2 + $0x38] sm:$0xf] %v2379_v30  ;;  %v1984_v51 = vmul.f32 %v1951_v60, %v1904_v34  ;;  %v1358_v7 = vmul.f32 %v1331_v4, %v1275_v37  ;;  %v8932_v60 = vld [vmem:[#allocation33_spill] sm:$0xff] }
 0x210   :  { %v7544_v28 = vpop.permute.xlu1 %2024  ;;  %v1357_v50 = vmul.f32 %v1327_v62, %v1276_v42  ;;  %v8934_v4 = vld [vmem:[#allocation25_spill] sm:$0xff] }
 0x211   :  { %3244 = vrot.lane.b32.xlu0 %v7371_v41, %s4865_s28  ;;  %3242 = vrot.lane.b32.xlu1 %v7181_v55, %s4865_s28  ;;  %v2032_v12 = vsel %vm803_vm5, %v7419_v54, %v7544_v28  ;;  %v1385_v26 = vpop.permute.xlu0 %1384  ;;  %v7558_v52 = vld [vmem:[#allocation2 + $0x28] sm:$0xff]  ;;  %v1996_v27 = vadd.f32 %v1984_v51, %v1868_v36 }
 0x212   :  { %v1391_v5 = vsel %vm195_vm0, %v1385_v26, %v8928_v14  ;;  %v1392_v54 = vsel %vm195_vm0, %v7272_v8, %v1385_v26  ;;  %4585 = vst [vmem:[#allocation2 + $0x28] sm:$0xf0] %v8929_v59  ;;  %v2112_v44 = vmul.f32 %v2079_v35, %v2032_v12  ;;  %v8931_v8 = vld [vmem:[#allocation44_spill] sm:$0xff]  ;;  %v1955_v26 = vrot.slane %v8923_v21, %v8924_v18  ;;  %v8936_v59 = vld [vmem:[#allocation34_spill] sm:$0xff] }
 0x213   :  { %v1473_v43 = vmul.f32 %v1443_v45, %v1392_v54  ;;  %v2335_v10 = vrot.slane %v8931_v8, %v5230_v61  ;;  %v1474_v24 = vmul.f32 %v1447_v17, %v1391_v5  ;;  %v1959_v5 = vrot.slane %v8923_v21, %v8918_v0 }
 0x214   :  { %v7579_v25 = vpop.permute.xlu1 %2152  ;;  %v2124_v35 = vadd.f32 %v2112_v44, %v1996_v27 }
 0x215   :  { %3236 = vrot.lane.b32.xlu0 %v7142_v11, %s4865_s28  ;;  %3108 = vrot.lane.b32.xlu1 %v7142_v11, %s4864_s26  ;;  %v2160_v39 = vsel %vm932_vm6, %v7485_v13, %v7579_v25  ;;  %v1513_v58 = vpop.permute.xlu0 %1512  ;;  %v8933_v13 = vld [vmem:[#allocation5_spill] sm:$0xff]  ;;  %v1485_v17 = vadd.f32 %v1473_v43, %v1357_v50  ;;  %v2083_v43 = vrot.slane %v8925_v29, %v8924_v18 }
 0x216   :  { %v2240_v30 = vmul.f32 %v2207_v23, %v2160_v39  ;;  %v1519_v34 = vsel %vm324_vm2, %v1513_v58, %v8932_v60  ;;  %v1520_v20 = vsel %vm324_vm2, %v7357_v53, %v1513_v58  ;;  %v7597_v56 = vld [vmem:[#allocation2 + $0x30] sm:$0xff]  ;;  %v7599_v33 = vld [vmem:[#allocation2 + $0x38] sm:$0xff]  ;;  %v1486_v23 = vadd.f32 %v1474_v24, %v1358_v7  ;;  %v8938_v7 = vld [vmem:[#allocation36_spill] sm:$0xff] }
 0x217   :  { %v1601_v62 = vmul.f32 %v1571_v63, %v1520_v20  ;;  %v1602_v45 = vmul.f32 %v1575_v47, %v1519_v34  ;;  %4586 = vst [vmem:[#allocation2 + $0x30] sm:$0xf0] %v8933_v13  ;;  %4587 = vst [vmem:[#allocation2 + $0x38] sm:$0xf0] %v8934_v4  ;;  %v8935_v53 = vld [vmem:[#allocation10_spill] sm:$0xff]  ;;  %v2211_v39 = vrot.slane %v8927_v16, %v8924_v18 }
 0x218   :  { %v2281_v51 = vpop.permute.xlu1 %2280  ;;  %v1821_v12 = vmul.f32 %v1791_v1, %v8935_v53  ;;  %v2252_v63 = vadd.f32 %v2240_v30, %v2124_v35 }
 0x219   :  { %2464 = vrot.lane.b32.xlu1 %v7371_v41, %s4859_s27  ;;  %2466 = vrot.lane.b32.xlu0 %v7558_v52, %s4859_s27  ;;  %v2288_v42 = vsel %vm1061_vm7, %v7498_v2, %v2281_v51  ;;  %v1641_v14 = vpop.permute.xlu0 %1640  ;;  %v1613_v54 = vadd.f32 %v1601_v62, %v1485_v17  ;;  %v1614_v37 = vadd.f32 %v1602_v45, %v1486_v23  ;;  %v1846_v2 = vrot.slane %v7538_v40, 4  ;;  %v8937_v40 = vld [vmem:[#allocation43_spill] sm:$0xff] }
 0x21a   :  { %v2368_v47 = vmul.f32 %v2335_v10, %v2288_v42  ;;  %v1647_v38 = vsel %vm453_vm3, %v1641_v14, %v8936_v59  ;;  %v1648_v1 = vsel %vm453_vm3, %v7412_v57, %v1641_v14  ;;  %v2087_v10 = vrot.slane %v8925_v29, %v8918_v0  ;;  %v8939_v23 = vld [vmem:[#allocation39_spill] sm:$0xff]  ;;  %v8940_v42 = vld [vmem:[#allocation45_spill] sm:$0xff] }
 0x21b   :  { %v1729_v36 = vmul.f32 %v1699_v15, %v1648_v1  ;;  %v1730_v44 = vmul.f32 %v1703_v32, %v1647_v38  ;;  %v1845_v57 = vrot.slane %v1821_v12, 4  ;;  %v2339_v45 = vrot.slane %v8931_v8, %v8924_v18 }
 0x21c   :  { %v2380_v21 = vadd.f32 %v2368_v47, %v2252_v63  ;;  %v2027_v50 = vpop.permute.xlu1 %2026 }
 0x21d   :  { %2468 = vrot.lane.b32.xlu1 %v7597_v56, %s4859_s27  ;;  %2470 = vrot.lane.b32.xlu0 %v7599_v33, %s4859_s27  ;;  %v1741_v27 = vadd.f32 %v1729_v36, %v1613_v54  ;;  %v1742_v15 = vadd.f32 %v1730_v44, %v1614_v37  ;;  %v2031_v32 = vsel %vm803_vm5, %v7544_v28, %v2027_v50  ;;  %v1899_v24 = vpop.permute.xlu0 %1898  ;;  %v8664_v44 = vmov 0.0  }
 0x21e   :  { %2392 = vst [vmem:[#allocation2 + $0x40] sm:$0xf] %v2380_v21  ;;  %v2030_v58 = vsel %vm803_vm5, %v2027_v50, %v8937_v40  ;;  %v1902_v29 = vsel %vm674_vm4, %v1899_v24, %v8938_v7  ;;  %v1903_v30 = vsel %vm674_vm4, %v7523_v49, %v1899_v24  ;;  %v2215_v28 = vrot.slane %v8927_v16, %v8918_v0  ;;  %v4676_v50 = vld [vmem:[%s8537_s1 + $0xc3] ss:$8 sm:$0xf0] }
 0x21f   :  { %v1869_v60 = vadd.f32 %v1845_v57, %v1741_v27  ;;  %v1870_v34 = vadd.f32 %v1846_v2, %v1742_v15  ;;  %v1985_v20 = vmul.f32 %v1955_v26, %v1903_v30  ;;  %v1986_v35 = vmul.f32 %v1959_v5, %v1902_v29  ;;  %3762 = vmatprep.mubr.f32.mxu1 %v8664_v44 }
 0x220   :  { %v2113_v62 = vmul.f32 %v2083_v43, %v2031_v32  ;;  %v2343_v49 = vrot.slane %v8931_v8, %v8918_v0  ;;  %v2283_v13 = vpop.permute.xlu1 %2282  ;;  %v2114_v4 = vmul.f32 %v2087_v10, %v2030_v58  ;;  %3685 = vmatprep.mubr.f32.mxu0 %v8664_v44  ;;  %v4673_v43 = vld [vmem:[%s8537_s1 + $0xc2] ss:$8 sm:$0xf0]  ;;  %v4675_v10 = vld [vmem:[%s8537_s1 + $0xc3] ss:$8 sm:$0xf] }
 0x221   :  { %2592 = vrot.lane.b32.xlu1 %v7371_v41, %s4860_s20  ;;  %2594 = vrot.lane.b32.xlu0 %v7558_v52, %s4860_s20  ;;  %v1997_v16 = vadd.f32 %v1985_v20, %v1869_v60  ;;  %v1998_v17 = vadd.f32 %v1986_v35, %v1870_v34  ;;  %v2287_v12 = vsel %vm1061_vm7, %v2281_v51, %v2283_v13  ;;  %v2155_v26 = vpop.permute.xlu0 %2154  ;;  %v8941_v34 = vld [vmem:[#allocation16_spill] sm:$0xff] }
 0x222   :  { %v2286_v63 = vsel %vm1061_vm7, %v2283_v13, %v8939_v23  ;;  %v2158_v14 = vsel %vm932_vm6, %v2155_v26, %v8940_v42  ;;  %v2159_v8 = vsel %vm932_vm6, %v7579_v25, %v2155_v26  ;;  %v2369_v51 = vmul.f32 %v2339_v45, %v2287_v12 }
 0x223   :  { %v2125_v5 = vadd.f32 %v2113_v62, %v1997_v16  ;;  %v2126_v54 = vadd.f32 %v2114_v4, %v1998_v17  ;;  %v2241_v47 = vmul.f32 %v2211_v39, %v2159_v8  ;;  %v2242_v59 = vmul.f32 %v2215_v28, %v2158_v14 }
 0x224   :  { %v2370_v38 = vmul.f32 %v2343_v49, %v2286_v63  ;;  %v7728_v32 = vor.u32 %v4676_v50, %v4675_v10  ;;  %v4682_v10 = vld [vmem:[%s8537_s1 + $0xc5] ss:$8 sm:$0xf0] }
 0x225   :  { %2596 = vrot.lane.b32.xlu1 %v7597_v56, %s4860_s20  ;;  %2598 = vrot.lane.b32.xlu0 %v7599_v33, %s4860_s20  ;;  %v2253_v1 = vadd.f32 %v2241_v47, %v2125_v5  ;;  %v2254_v37 = vadd.f32 %v2242_v59, %v2126_v54  ;;  %v7669_v36 = vld [vmem:[#allocation2 + $0x40] sm:$0xff] }
 0x226   :  { %4588 = vst [vmem:[#allocation2 + $0x40] sm:$0xf0] %v8921_v3  ;;  %v2635_v58 = vrot.slane %v7728_v32, %v8924_v18  ;;  %v2639_v60 = vrot.slane %v7728_v32, %v8918_v0  ;;  %v2643_v49 = vrot.slane %v7728_v32, %v8941_v34  ;;  %v2631_v14 = vrot.slane %v7728_v32, %v5230_v61 }
 0x227   :  { %v2381_v25 = vadd.f32 %v2369_v51, %v2253_v1  ;;  %v2382_v2 = vadd.f32 %v2370_v38, %v2254_v37 }
 0x229   :  { %3366 = vrot.lane.b32.xlu1 %v7151_v48, %s4866_s29  ;;  %3368 = vrot.lane.b32.xlu0 %v7153_v6, %s4866_s29  ;;  %2393 = vst [vmem:[#allocation2 + $0x48] sm:$0xf] %v2381_v25  ;;  %2394 = vst [vmem:[#allocation2 + $0x50] sm:$0xf] %v2382_v2 }
 0x22d   :  { %3370 = vrot.lane.b32.xlu1 %v7181_v55, %s4866_s29  ;;  %3372 = vrot.lane.b32.xlu0 %v7371_v41, %s4866_s29 }
 0x230   :  { %v7686_v3 = vld [vmem:[#allocation2 + $0x48] sm:$0xff]  ;;  %v7688_v21 = vld [vmem:[#allocation2 + $0x50] sm:$0xff] }
 0x231   :  { %3364 = vrot.lane.b32.xlu1 %v7142_v11, %s4866_s29  ;;  %2720 = vrot.lane.b32.xlu0 %v7371_v41, %s4861_s23  ;;  %4589 = vst [vmem:[#allocation2 + $0x48] sm:$0xf0] %v8935_v53  ;;  %4590 = vst [vmem:[#allocation2 + $0x50] sm:$0xf0] %v8926_v22 }
 0x232   :  { %v4672_v53 = vld [vmem:[%s8537_s1 + $0xc2] ss:$8 sm:$0xf] }
 0x233   :  { %v7724_v15 = vor.u32 %v4673_v43, %v4672_v53  ;;  %v4679_v53 = vld [vmem:[%s8537_s1 + $0xc4] ss:$8 sm:$0xf0]  ;;  %v4681_v43 = vld [vmem:[%s8537_s1 + $0xc5] ss:$8 sm:$0xf] }
 0x235   :  { %2722 = vrot.lane.b32.xlu1 %v7558_v52, %s4861_s23  ;;  %2724 = vrot.lane.b32.xlu0 %v7597_v56, %s4861_s23  ;;  %v2507_v40 = vrot.slane %v7724_v15, %v8924_v18  ;;  %v2515_v20 = vrot.slane %v7724_v15, %v8941_v34  ;;  %v2511_v13 = vrot.slane %v7724_v15, %v8918_v0 }
 0x236   :  { %v2503_v42 = vrot.slane %v7724_v15, %v5230_v61 }
 0x239   :  { %2726 = vrot.lane.b32.xlu1 %v7599_v33, %s4861_s23  ;;  %2848 = vrot.lane.b32.xlu0 %v7371_v41, %s4862_s24 }
 0x23d   :  { %2850 = vrot.lane.b32.xlu1 %v7558_v52, %s4862_s24  ;;  %2852 = vrot.lane.b32.xlu0 %v7597_v56, %s4862_s24 }
 0x241   :  { %2854 = vrot.lane.b32.xlu1 %v7599_v33, %s4862_s24  ;;  %2990 = vrot.lane.b32.xlu0 %v7558_v52, %s4863_s25 }
 0x242   :  { %v2457_v22 = vpop.permute.xlu0 %2456 }
 0x245   :  { %2992 = vrot.lane.b32.xlu1 %v7597_v56, %s4863_s25  ;;  %2994 = vrot.lane.b32.xlu0 %v7599_v33, %s4863_s25 }
 0x246   :  { %v2459_v57 = vpop.permute.xlu1 %2458 }
 0x247   :  { %v2461_v27 = vpop.permute.xlu0 %2460  ;;  %v2490_v7 = vsel %vm78_vm1, %v2457_v22, %v2459_v57 }
 0x248   :  { %v2561_v62 = vmul.f32 %v2507_v40, %v2490_v7  ;;  %v2489_v16 = vsel %vm78_vm1, %v2459_v57, %v2461_v27  ;;  %v7808_v40 = vor.u32 %v4682_v10, %v4681_v43 }
 0x249   :  { %2996 = vrot.lane.b32.xlu1 %v7669_v36, %s4863_s25  ;;  %3118 = vrot.lane.b32.xlu0 %v7558_v52, %s4864_s26  ;;  %v2562_v54 = vmul.f32 %v2511_v13, %v2489_v16 }
 0x24a   :  { %v2899_v16 = vrot.slane %v7808_v40, %v8941_v34 }
 0x24b   :  { %v7732_v24 = vpop.permute.xlu1 %2462  ;;  %v2585_v39 = vpop.permute.xlu0 %2584 }
 0x24c   :  { %v2488_v4 = vsel %vm78_vm1, %v2461_v27, %v7732_v24 }
 0x24d   :  { %3120 = vrot.lane.b32.xlu1 %v7597_v56, %s4864_s26  ;;  %3122 = vrot.lane.b32.xlu0 %v7599_v33, %s4864_s26  ;;  %v2563_v8 = vmul.f32 %v2515_v20, %v2488_v4 }
 0x24f   :  { %v2587_v29 = vpop.permute.xlu1 %2586  ;;  %v2589_v30 = vpop.permute.xlu0 %2588 }
 0x250   :  { %v2618_v28 = vsel %vm195_vm0, %v2585_v39, %v2587_v29  ;;  %v2617_v35 = vsel %vm195_vm0, %v2587_v29, %v2589_v30 }
 0x251   :  { %3124 = vrot.lane.b32.xlu1 %v7669_v36, %s4864_s26  ;;  %v2689_v45 = vmul.f32 %v2635_v58, %v2618_v28  ;;  %3246 = vrot.lane.b32.xlu0 %v7558_v52, %s4865_s28  ;;  %v2690_v23 = vmul.f32 %v2639_v60, %v2617_v35 }
 0x253   :  { %v7765_v17 = vpop.permute.xlu1 %2590  ;;  %v7767_v12 = vpop.permute.xlu0 %2478  ;;  %v4714_v26 = vpack.c.bf16 %v2689_v45, %v2561_v62  ;;  %v4732_v37 = vpack.c.bf16 %v2690_v23, %v2562_v54  ;;  %v2895_v45 = vrot.slane %v7808_v40, %v8918_v0 }
 0x254   :  { %v2616_v63 = vsel %vm195_vm0, %v2589_v30, %v7765_v17  ;;  %v2491_v47 = vsel %vm78_vm1, %v7767_v12, %v2457_v22  ;;  %v4678_v22 = vld [vmem:[%s8537_s1 + $0xc4] ss:$8 sm:$0xf]  ;;  %v2891_v30 = vrot.slane %v7808_v40, %v8924_v18 }
 0x255   :  { %3248 = vrot.lane.b32.xlu1 %v7597_v56, %s4865_s28  ;;  %4715 = vmatprep.subr.bf16.mxu0 %v4714_v26  ;;  %v2691_v5 = vmul.f32 %v2643_v49, %v2616_v63  ;;  %v2560_v25 = vmul.f32 %v2503_v42, %v2491_v47  ;;  %v4684_v63 = vld [vmem:[%s8537_s1 + $0xc7] ss:$8 sm:$0xf] }
 0x256   :  { %3250 = vrot.lane.b32.xlu0 %v7599_v33, %s4865_s28  ;;  %v4685_v42 = vld [vmem:[%s8537_s1 + $0xc7] ss:$8 sm:$0xf0] }
 0x257   :  { %v7783_v59 = vpop.permute.xlu1 %2606  ;;  %v2713_v51 = vpop.permute.xlu0 %2712  ;;  %v4730_v38 = vpack.c.bf16 %v2691_v5, %v2563_v8 }
 0x258   :  { %v2619_v1 = vsel %vm195_vm0, %v7783_v59, %v2585_v39  ;;  %v7804_v39 = vor.u32 %v4679_v53, %v4678_v22  ;;  %v7864_v22 = vor.u32 %v4685_v42, %v4684_v63 }
 0x259   :  { %v2688_v2 = vmul.f32 %v2631_v14, %v2619_v1  ;;  %3252 = vrot.lane.b32.xlu1 %v7669_v36, %s4865_s28  ;;  %4731 = vmatprep.subr.bf16.mxu1 %v4730_v38 }
 0x25a   :  { %2472 = vrot.lane.b32.xlu0 %v7669_v36, %s4859_s27  ;;  %4733 = vmatpush1.bf16.msra.mxu1 %v4732_v37  ;;  %v2763_v29 = vrot.slane %v7804_v39, %v8924_v18  ;;  %v2771_v35 = vrot.slane %v7804_v39, %v8941_v34  ;;  %v2767_v26 = vrot.slane %v7804_v39, %v8918_v0 }
 0x25b   :  { %v2715_v50 = vpop.permute.xlu1 %2714  ;;  %v2717_v57 = vpop.permute.xlu0 %2716  ;;  %v4716_v27 = vpack.c.bf16 %v2688_v2, %v2560_v25  ;;  %v2759_v1 = vrot.slane %v7804_v39, %v5230_v61  ;;  %v2887_v37 = vrot.slane %v7808_v40, %v5230_v61 }
 0x25c   :  { %v2746_v28 = vsel %vm324_vm2, %v2713_v51, %v2715_v50  ;;  %v2745_v14 = vsel %vm324_vm2, %v2715_v50, %v2717_v57 }
 0x25d   :  { %2474 = vrot.lane.b32.xlu1 %v7686_v3, %s4859_s27  ;;  %4717 = vmatpush1.bf16.msra.mxu0 %v4716_v27  ;;  %v2817_v49 = vmul.f32 %v2763_v29, %v2746_v28  ;;  %v2818_v53 = vmul.f32 %v2767_v26, %v2745_v14 }
 0x25e   :  { %2476 = vrot.lane.b32.xlu0 %v7688_v21, %s4859_s27 }
 0x25f   :  { %v7812_v58 = vpop.permute.xlu1 %2718  ;;  %v2841_v7 = vpop.permute.xlu0 %2840 }
 0x260   :  { %v2744_v23 = vsel %vm324_vm2, %v2717_v57, %v7812_v58 }
 0x261   :  { %2600 = vrot.lane.b32.xlu1 %v7669_v36, %s4860_s20  ;;  %v2819_v25 = vmul.f32 %v2771_v35, %v2744_v23 }
 0x262   :  { %2602 = vrot.lane.b32.xlu0 %v7686_v3, %s4860_s20 }
 0x263   :  { %v2843_v60 = vpop.permute.xlu1 %2842  ;;  %v2845_v20 = vpop.permute.xlu0 %2844 }
 0x264   :  { %v2874_v62 = vsel %vm453_vm3, %v2841_v7, %v2843_v60  ;;  %v2873_v4 = vsel %vm453_vm3, %v2843_v60, %v2845_v20 }
 0x265   :  { %v2945_v13 = vmul.f32 %v2891_v30, %v2874_v62  ;;  %2604 = vrot.lane.b32.xlu1 %v7688_v21, %s4860_s20  ;;  %v2946_v47 = vmul.f32 %v2895_v45, %v2873_v4  ;;  %v3035_v62 = vrot.slane %v7864_v22, %v8918_v0 }
 0x266   :  { %3374 = vrot.lane.b32.xlu0 %v7558_v52, %s4866_s29 }
 0x267   :  { %v7851_v8 = vpop.permute.xlu1 %2846  ;;  %v7853_v5 = vpop.permute.xlu0 %2734  ;;  %v4718_v54 = vpack.c.bf16 %v2945_v13, %v2817_v49  ;;  %v4736_v29 = vpack.c.bf16 %v2946_v47, %v2818_v53  ;;  %v3039_v49 = vrot.slane %v7864_v22, %v8941_v34  ;;  %v3027_v13 = vrot.slane %v7864_v22, %v5230_v61 }
 0x268   :  { %v2872_v38 = vsel %vm453_vm3, %v2845_v20, %v7851_v8  ;;  %v2747_v43 = vsel %vm324_vm2, %v7853_v5, %v2713_v51  ;;  %v3031_v51 = vrot.slane %v7864_v22, %v8924_v18 }
 0x269   :  { %v2947_v2 = vmul.f32 %v2899_v16, %v2872_v38  ;;  %3376 = vrot.lane.b32.xlu1 %v7597_v56, %s4866_s29  ;;  %4719 = vmatprep.subr.bf16.mxu0 %v4718_v54  ;;  %v2816_v30 = vmul.f32 %v2759_v1, %v2747_v43  ;;  %v4687_v38 = vld [vmem:[%s8537_s1 + $0x120] ss:$8 sm:$0xf]  ;;  %v4690_v1 = vld [vmem:[%s8537_s1 + $0x121] ss:$8 sm:$0xf] }
 0x26a   :  { %3378 = vrot.lane.b32.xlu0 %v7599_v33, %s4866_s29 }
 0x26b   :  { %v7871_v10 = vpop.permute.xlu1 %2862  ;;  %v2983_v50 = vpop.permute.xlu0 %2982  ;;  %v4734_v57 = vpack.c.bf16 %v2947_v2, %v2819_v25 }
 0x26c   :  { %v2875_v27 = vsel %vm453_vm3, %v7871_v10, %v2841_v7 }
 0x26d   :  { %v2944_v28 = vmul.f32 %v2887_v37, %v2875_v27  ;;  %3380 = vrot.lane.b32.xlu1 %v7669_v36, %s4866_s29  ;;  %4735 = vmatprep.subr.bf16.mxu1 %v4734_v57  ;;  %v4691_v37 = vld [vmem:[%s8537_s1 + $0x121] ss:$8 sm:$0xf0] }
 0x26e   :  { %2728 = vrot.lane.b32.xlu0 %v7669_v36, %s4861_s23  ;;  %4737 = vmatpush1.bf16.msra.mxu1 %v4736_v29  ;;  %v7930_v27 = vor.u32 %v4691_v37, %v4690_v1 }
 0x26f   :  { %v2985_v60 = vpop.permute.xlu1 %2984  ;;  %v2987_v20 = vpop.permute.xlu0 %2986  ;;  %v4720_v35 = vpack.c.bf16 %v2944_v28, %v2816_v30  ;;  %v8942_v28 = vld [vmem:[#allocation19_spill] sm:$0xff] }
 0x270   :  { %v3013_v7 = vsel %vm674_vm4, %v2983_v50, %v2985_v60  ;;  %v3012_v4 = vsel %vm674_vm4, %v2985_v60, %v2987_v20  ;;  %v3283_v37 = vrot.slane %v7930_v27, %v5230_v61 }
 0x271   :  { %v3085_v45 = vmul.f32 %v3031_v51, %v3013_v7  ;;  %2730 = vrot.lane.b32.xlu1 %v7686_v3, %s4861_s23  ;;  %4721 = vmatpush1.bf16.msra.mxu0 %v4720_v35  ;;  %v3086_v14 = vmul.f32 %v3035_v62, %v3012_v4  ;;  %v3291_v62 = vrot.slane %v7930_v27, %v8918_v0 }
 0x272   :  { %2732 = vrot.lane.b32.xlu0 %v7688_v21, %s4861_s23 }
 0x273   :  { %v7896_v16 = vpop.permute.xlu1 %2988  ;;  %v7898_v26 = vpop.permute.xlu0 %2980  ;;  %v4722_v23 = vpack.c.bf16 %v3085_v45, %v7151_v48  ;;  %v4688_v48 = vld [vmem:[%s8537_s1 + $0x120] ss:$8 sm:$0xf0]  ;;  %v4740_v57 = vpack.c.bf16 %v3086_v14, %v7153_v6  ;;  %v3295_v45 = vrot.slane %v7930_v27, %v8941_v34 }
 0x274   :  { %v3011_v63 = vsel %vm674_vm4, %v2987_v20, %v7896_v16  ;;  %v3014_v42 = vsel %vm674_vm4, %v7898_v26, %v2983_v50  ;;  %v7925_v50 = vor.u32 %v4688_v48, %v4687_v38 }
 0x275   :  { %v3087_v54 = vmul.f32 %v3039_v49, %v3011_v63  ;;  %v3084_v47 = vmul.f32 %v3027_v13, %v3014_v42  ;;  %2856 = vrot.lane.b32.xlu1 %v7669_v36, %s4862_s24  ;;  %4723 = vmatprep.subr.bf16.mxu0 %v4722_v23  ;;  %v4868_v23 = vmov 0  }
 0x276   :  { %2858 = vrot.lane.b32.xlu0 %v7686_v3, %s4862_s24  ;;  %v3163_v51 = vrot.slane %v7925_v50, %v8918_v0  ;;  %v3167_v60 = vrot.slane %v7925_v50, %v8941_v34  ;;  %4845 = vset.pattern.permute.xlu1 %v4868_v23 }
 0x277   :  { %v3111_v25 = vpop.permute.xlu1 %3110  ;;  %v3113_v2 = vpop.permute.xlu0 %3112  ;;  %v4724_v53 = vpack.c.bf16 %v3084_v47, %v7142_v11  ;;  %v4738_v43 = vpack.c.bf16 %v3087_v54, %v7181_v55  ;;  %v3159_v11 = vrot.slane %v7925_v50, %v8924_v18  ;;  %v3287_v55 = vrot.slane %v7930_v27, %v8924_v18  ;;  %4844 = vset.pattern.permute.xlu0 %v4868_v23 }
 0x278   :  { %v3141_v6 = vsel %vm803_vm5, %v3111_v25, %v3113_v2  ;;  %v3155_v47 = vrot.slane %v7925_v50, %v5230_v61 }
 0x279   :  { %2860 = vrot.lane.b32.xlu1 %v7688_v21, %s4862_s24  ;;  %4725 = vmatpush1.bf16.msra.mxu0 %v4724_v53  ;;  %v3213_v49 = vmul.f32 %v3159_v11, %v3141_v6 }
 0x27a   :  { %2998 = vrot.lane.b32.xlu0 %v7686_v3, %s4863_s25  ;;  %4739 = vmatprep.subr.bf16.mxu1 %v4738_v43 }
 0x27b   :  { %4741 = vmatpush1.bf16.msra.mxu1 %v4740_v57  ;;  %v3115_v29 = vpop.permute.xlu1 %3114  ;;  %v7934_v30 = vpop.permute.xlu0 %3116 }
 0x27c   :  { %v3140_v13 = vsel %vm803_vm5, %v3113_v2, %v3115_v29  ;;  %v3139_v63 = vsel %vm803_vm5, %v3115_v29, %v7934_v30 }
 0x27d   :  { %3000 = vrot.lane.b32.xlu1 %v7688_v21, %s4863_s25  ;;  %v3214_v38 = vmul.f32 %v3163_v51, %v3140_v13  ;;  %v3215_v2 = vmul.f32 %v3167_v60, %v3139_v63  ;;  %v8945_v13 = vld [vmem:[#allocation32_spill] sm:$0xff] }
 0x27e   :  { %3002 = vrot.lane.b32.xlu0 %v8942_v28, %s4863_s25  ;;  %v2647_v23 = vrot.slane %v7728_v32, %v8945_v13 }
 0x27f   :  { %v3239_v20 = vpop.permute.xlu1 %3238  ;;  %v3241_v35 = vpop.permute.xlu0 %3240 }
 0x280   :  { %v3269_v7 = vsel %vm932_vm6, %v3239_v20, %v3241_v35 }
 0x281   :  { %v3341_v4 = vmul.f32 %v3287_v55, %v3269_v7  ;;  %3126 = vrot.lane.b32.xlu1 %v7686_v3, %s4864_s26 }
 0x282   :  { %3128 = vrot.lane.b32.xlu0 %v7688_v21, %s4864_s26 }
 0x283   :  { %v3243_v42 = vpop.permute.xlu1 %3242  ;;  %v7965_v14 = vpop.permute.xlu0 %3244  ;;  %v4726_v54 = vpack.c.bf16 %v3341_v4, %v3213_v49  ;;  %v3602_v49 = vld [vmem:[%s8538_s3] sm:$0xff]  ;;  %v2519_v4 = vrot.slane %v7724_v15, %v8945_v13 }
 0x284   :  { %v3268_v48 = vsel %vm932_vm6, %v3241_v35, %v3243_v42  ;;  %v3267_v1 = vsel %vm932_vm6, %v3243_v42, %v7965_v14  ;;  %v3603_v42 = vld [vmem:[%s8538_s3 + $0x8] sm:$0xff] }
 0x285   :  { %v3342_v53 = vmul.f32 %v3291_v62, %v3268_v48  ;;  %v3343_v43 = vmul.f32 %v3295_v45, %v3267_v1  ;;  %3130 = vrot.lane.b32.xlu1 %v8942_v28, %s4864_s26  ;;  %4727 = vmatprep.subr.bf16.mxu0 %v4726_v54 }
 0x286   :  { %3254 = vrot.lane.b32.xlu0 %v7686_v3, %s4865_s28 }
 0x287   :  { %v7980_v57 = vpop.permute.xlu1 %3108  ;;  %v7982_v29 = vpop.permute.xlu0 %3236  ;;  %v4742_v11 = vpack.c.bf16 %v3343_v43, %v3215_v2  ;;  %v4744_v55 = vpack.c.bf16 %v3342_v53, %v3214_v38  ;;  %v4694_v38 = vld [vmem:[%s8537_s1 + $0x122] ss:$8 sm:$0xf0] }
 0x288   :  { %8943 = vst [vmem:[#allocation30_spill] sm:$0xff] %v7980_v57  ;;  %8944 = vst [vmem:[#allocation42_spill] sm:$0xff] %v7982_v29  ;;  %v3142_v6 = vsel %vm803_vm5, %v7980_v57, %v3111_v25  ;;  %v3270_v51 = vsel %vm932_vm6, %v7982_v29, %v3239_v20  ;;  %v4108_v53 = vld [vmem:[%s8539_s5] sm:$0xf] }
 0x289   :  { %v3212_v60 = vmul.f32 %v3155_v47, %v3142_v6  ;;  %v3340_v35 = vmul.f32 %v3283_v37, %v3270_v51  ;;  %3256 = vrot.lane.b32.xlu1 %v7688_v21, %s4865_s28  ;;  %4743 = vmatprep.subr.bf16.mxu1 %v4742_v11  ;;  %v4693_v47 = vld [vmem:[%s8537_s1 + $0x122] ss:$8 sm:$0xf]  ;;  %v2659_v51 = vrot.slane %v7728_v32, %v8906_v9 }
 0x28a   :  { %3258 = vrot.lane.b32.xlu0 %v8942_v28, %s4865_s28  ;;  %4745 = vmatpush1.bf16.msra.mxu1 %v4744_v55  ;;  %v8028_v2 = vor.u32 %v4694_v38, %v4693_v47  ;;  %v2523_v38 = vrot.slane %v7724_v15, %v8904_v46 }
 0x28b   :  { %v2465_v7 = vpop.permute.xlu1 %2464  ;;  %v2467_v62 = vpop.permute.xlu0 %2466  ;;  %v4728_v45 = vpack.c.bf16 %v3340_v35, %v3212_v60  ;;  %v2655_v35 = vrot.slane %v7728_v32, %v8905_v31 }
 0x28c   :  { %v2487_v63 = vsel %vm78_vm1, %v7732_v24, %v2465_v7  ;;  %v3423_v47 = vrot.slane %v8028_v2, %v8941_v34 }
 0x28d   :  { %3382 = vrot.lane.b32.xlu1 %v7686_v3, %s4866_s29  ;;  %4729 = vmatpush1.bf16.msra.mxu0 %v4728_v45  ;;  %v8024_v24 = vmul.f32 %v2519_v4, %v2487_v63  ;;  %v3419_v4 = vrot.slane %v8028_v2, %v8918_v0 }
 0x28e   :  { %3384 = vrot.lane.b32.xlu0 %v7688_v21, %s4866_s29 }
 0x28f   :  { %v2469_v25 = vpop.permute.xlu1 %2468  ;;  %v7998_v20 = vpop.permute.xlu0 %2470 }
 0x291   :  { %3386 = vrot.lane.b32.xlu1 %v8942_v28, %s4866_s29  ;;  %v3411_v28 = vrot.slane %v8028_v2, %v5230_v61 }
 0x292   :  { %3606 = vperm.xlu0 %4844, %v3602_v49  }
 0x293   :  { %v2593_v54 = vpop.permute.xlu1 %2592  ;;  %v2595_v1 = vpop.permute.xlu0 %2594 }
 0x294   :  { %v2615_v48 = vsel %vm195_vm0, %v7765_v17, %v2593_v54  ;;  %v3415_v17 = vrot.slane %v8028_v2, %v8924_v18 }
 0x295   :  { %v8026_v37 = vmul.f32 %v2647_v23, %v2615_v48  ;;  %3611 = vperm.xlu1 %4845, %v3603_v42   ;;  %v2531_v23 = vrot.slane %v7724_v15, %v8906_v9  ;;  %v2527_v48 = vrot.slane %v7724_v15, %v8905_v31 }
 0x297   :  { %v4748_v43 = vpack.c.bf16 %v8026_v37, %v8024_v24  ;;  %v2597_v11 = vpop.permute.xlu1 %2596  ;;  %v8035_v55 = vpop.permute.xlu0 %2598  ;;  %v2484_v24 = vsel %vm78_vm1, %v2469_v25, %v7998_v20  ;;  %v2651_v37 = vrot.slane %v7728_v32, %v8904_v46 }
 0x298   :  { %v2612_v45 = vsel %vm195_vm0, %v2597_v11, %v8035_v55  ;;  %v2613_v63 = vsel %vm195_vm0, %v2595_v1, %v2597_v11  ;;  %v2485_v11 = vsel %vm78_vm1, %v2467_v62, %v2469_v25  ;;  %v2486_v25 = vsel %vm78_vm1, %v2465_v7, %v2467_v62 }
 0x299   :  { %4111 = vperm.xlu1 %4845, %v4108_v53   ;;  %v2694_v29 = vmul.f32 %v2655_v35, %v2613_v63  ;;  %v2565_v7 = vmul.f32 %v2523_v38, %v2486_v25 }
 0x29b   :  { %v3367_v6 = vpop.permute.xlu1 %3366  ;;  %v3369_v60 = vpop.permute.xlu0 %3368 }
 0x29c   :  { %v3397_v49 = vsel %vm1061_vm7, %v3367_v6, %v3369_v60 }
 0x29d   :  { %v3469_v42 = vmul.f32 %v3415_v17, %v3397_v49  ;;  %v2614_v17 = vsel %vm195_vm0, %v2593_v54, %v2595_v1  ;;  %v2695_v49 = vmul.f32 %v2659_v51, %v2612_v45  ;;  %v2567_v54 = vmul.f32 %v2531_v23, %v2484_v24 }
 0x29e   :  { %v2566_v51 = vmul.f32 %v2527_v48, %v2485_v11  ;;  %v2693_v45 = vmul.f32 %v2651_v37, %v2614_v17  ;;  %v8095_v48 = vld [vmem:[%s8540_s2 + $0x8] sm:$0xff]  ;;  %v2779_v24 = vrot.slane %v7804_v39, %v8904_v46 }
 0x29f   :  { %v3371_v53 = vpop.permute.xlu1 %3370  ;;  %3637 = vmatprep.subr.mxu0 %v3469_v42  ;;  %v8071_v15 = vpop.permute.xlu0 %3372  ;;  %v4762_v63 = vpack.c.bf16 %v2695_v49, %v2567_v54  ;;  %v2911_v54 = vrot.slane %v7808_v40, %v8905_v31 }
 0x2a0   :  { %v3396_v44 = vsel %vm1061_vm7, %v3369_v60, %v3371_v53  ;;  %v3395_v32 = vsel %vm1061_vm7, %v3371_v53, %v8071_v15  ;;  %v4764_v62 = vpack.c.bf16 %v2694_v29, %v2566_v51  ;;  %v8946_v29 = vmov 0.0  }
 0x2a1   :  { %v3470_v57 = vmul.f32 %v3419_v4, %v3396_v44  ;;  %v3471_v1 = vmul.f32 %v3423_v47, %v3395_v32  ;;  %v8085_v44 = vld [vmem:[%s8540_s2] sm:$0xff]  ;;  %v4746_v47 = vpack.c.bf16 %v2693_v45, %v2565_v7  ;;  %v2775_v53 = vrot.slane %v7804_v39, %v8945_v13 }
 0x2a2   :  { %v2787_v32 = vrot.slane %v7804_v39, %v8906_v9 }
 0x2a3   :  { %v8080_v60 = vpop.permute.xlu1 %3364  ;;  %3714 = vmatprep.subr.mxu1 %v3471_v1  ;;  %v2721_v4 = vpop.permute.xlu0 %2720 }
 0x2a4   :  { %v3398_v35 = vsel %vm1061_vm7, %v8080_v60, %v3367_v6  ;;  %3715 = vmatpush1.msra.mxu1 %v3470_v57  ;;  %v2903_v57 = vrot.slane %v7808_v40, %v8945_v13  ;;  %v2743_v17 = vsel %vm324_vm2, %v7812_v58, %v2721_v4  ;;  %v2915_v58 = vrot.slane %v7808_v40, %v8906_v9 }
 0x2a5   :  { %v3468_v23 = vmul.f32 %v3411_v28, %v3398_v35  ;;  %4698 = vmatmul.mubr.msk.f32.vlgmr.msra.gmra.mrb[0].mxu1 %vm3614_vm8, %v8085_v44  ;;  %4763 = vmatprep.subr.bf16.mxu1 %v4762_v63  ;;  %v2783_v63 = vrot.slane %v7804_v39, %v8905_v31 }
 0x2a6   :  { %4765 = vmatpush1.bf16.msra.mxu1 %v4764_v62  ;;  %3768 = vmatprep.mubr.f32.mxu1 %v8946_v29 }
 0x2a7   :  { %v2723_v42 = vpop.permute.xlu1 %2722  ;;  %3638 = vmatpush1.msra.mxu0 %v3468_v23  ;;  %v2725_v6 = vpop.permute.xlu0 %2724 }
 0x2a8   :  { %4696 = vmatmul.mubr.msk.f32.vlgmr.msra.gmra.mrb[0].mxu0 %vm3614_vm8, %v8085_v44  ;;  %4747 = vmatprep.subr.bf16.mxu0 %v4746_v47  ;;  %v2742_v11 = vsel %vm324_vm2, %v2721_v4, %v2723_v42  ;;  %v2820_v4 = vmul.f32 %v2775_v53, %v2743_v17  ;;  %v2741_v62 = vsel %vm324_vm2, %v2723_v42, %v2725_v6 }
 0x2a9   :  { %3691 = vmatprep.mubr.f32.mxu0 %v8946_v29  ;;  %4699 = vmatmul.mubr.msk.f32.gmra.mrb[2].mxu1 %vm3614_vm8, %v8095_v48  ;;  %v2821_v51 = vmul.f32 %v2779_v24, %v2742_v11  ;;  %v3043_v24 = vrot.slane %v7864_v22, %v8945_v13  ;;  %v3047_v42 = vrot.slane %v7864_v22, %v8904_v46 }
 0x2aa   :  { %4749 = vmatpush1.bf16.msra.mxu0 %v4748_v43  ;;  %3916 = vmatprep.mubr.f32.mxu1 %v8946_v29  ;;  %v2907_v43 = vrot.slane %v7808_v40, %v8904_v46 }
 0x2ab   :  { %v8103_v28 = vpop.permute.xlu1 %2726  ;;  %v2849_v38 = vpop.permute.xlu0 %2848 }
 0x2ac   :  { %4697 = vmatmul.mubr.msk.f32.gmra.mrb[2].mxu0 %vm3614_vm8, %v8095_v48  ;;  %v2871_v37 = vsel %vm453_vm3, %v7851_v8, %v2849_v38  ;;  %v2740_v7 = vsel %vm324_vm2, %v2725_v6, %v8103_v28  ;;  %v2822_v6 = vmul.f32 %v2783_v63, %v2741_v62 }
 0x2ad   :  { %3839 = vmatprep.mubr.f32.mxu0 %v8946_v29  ;;  %v2948_v8 = vmul.f32 %v2903_v57, %v2871_v37  ;;  %v2823_v37 = vmul.f32 %v2787_v32, %v2740_v7  ;;  %v3051_v32 = vrot.slane %v7864_v22, %v8905_v31 }
 0x2af   :  { %v2851_v49 = vpop.permute.xlu1 %2850  ;;  %v2853_v1 = vpop.permute.xlu0 %2852  ;;  %v4752_v57 = vpack.c.bf16 %v2948_v8, %v2820_v4 }
 0x2b0   :  { %v2870_v25 = vsel %vm453_vm3, %v2849_v38, %v2851_v49  ;;  %v2869_v35 = vsel %vm453_vm3, %v2851_v49, %v2853_v1 }
 0x2b1   :  { %v2949_v45 = vmul.f32 %v2907_v43, %v2870_v25  ;;  %v2950_v38 = vmul.f32 %v2911_v54, %v2869_v35 }
 0x2b3   :  { %v8142_v23 = vpop.permute.xlu1 %2854  ;;  %v4750_v47 = vpack.c.bf16 %v2949_v45, %v2821_v51  ;;  %v2991_v39 = vpop.permute.xlu0 %2990  ;;  %v4768_v49 = vpack.c.bf16 %v2950_v38, %v2822_v6  ;;  %v3055_v51 = vrot.slane %v7864_v22, %v8906_v9 }
 0x2b4   :  { %v2868_v40 = vsel %vm453_vm3, %v2853_v1, %v8142_v23  ;;  %v3010_v53 = vsel %vm674_vm4, %v7896_v16, %v2991_v39 }
 0x2b5   :  { %v2951_v43 = vmul.f32 %v2915_v58, %v2868_v40  ;;  %4751 = vmatprep.subr.bf16.mxu0 %v4750_v47  ;;  %v3088_v8 = vmul.f32 %v3043_v24, %v3010_v53  ;;  %v3175_v24 = vrot.slane %v7925_v50, %v8904_v46 }
 0x2b6   :  { %4753 = vmatpush1.bf16.msra.mxu0 %v4752_v57 }
 0x2b7   :  { %v2993_v11 = vpop.permute.xlu1 %2992  ;;  %v4766_v17 = vpack.c.bf16 %v2951_v43, %v2823_v37  ;;  %v2995_v54 = vpop.permute.xlu0 %2994  ;;  %v4756_v58 = vpack.c.bf16 %v3088_v8, %v7371_v41  ;;  %v3299_v41 = vrot.slane %v7930_v27, %v8945_v13 }
 0x2b8   :  { %v3009_v25 = vsel %vm674_vm4, %v2991_v39, %v2993_v11  ;;  %v3008_v16 = vsel %vm674_vm4, %v2993_v11, %v2995_v54  ;;  %v3307_v11 = vrot.slane %v7930_v27, %v8905_v31 }
 0x2b9   :  { %v3089_v1 = vmul.f32 %v3047_v42, %v3009_v25  ;;  %4767 = vmatprep.subr.bf16.mxu1 %v4766_v17  ;;  %v3090_v4 = vmul.f32 %v3051_v32, %v3008_v16  ;;  %v3183_v42 = vrot.slane %v7925_v50, %v8906_v9 }
 0x2ba   :  { %4769 = vmatpush1.bf16.msra.mxu1 %v4768_v49 }
 0x2bb   :  { %v8162_v45 = vpop.permute.xlu1 %2996  ;;  %v4754_v35 = vpack.c.bf16 %v3089_v1, %v7558_v52  ;;  %v3119_v7 = vpop.permute.xlu0 %3118  ;;  %v4772_v22 = vpack.c.bf16 %v3090_v4, %v7597_v56  ;;  %v3171_v56 = vrot.slane %v7925_v50, %v8945_v13 }
 0x2bc   :  { %v3007_v63 = vsel %vm674_vm4, %v2995_v54, %v8162_v45  ;;  %v3138_v43 = vsel %vm803_vm5, %v7934_v30, %v3119_v7  ;;  %v3311_v30 = vrot.slane %v7930_v27, %v8906_v9  ;;  %v3179_v54 = vrot.slane %v7925_v50, %v8905_v31 }
 0x2bd   :  { %v3091_v62 = vmul.f32 %v3055_v51, %v3007_v63  ;;  %4755 = vmatprep.subr.bf16.mxu0 %v4754_v35  ;;  %v3216_v32 = vmul.f32 %v3171_v56, %v3138_v43 }
 0x2be   :  { %4757 = vmatpush1.bf16.msra.mxu0 %v4756_v58 }
 0x2bf   :  { %v3121_v47 = vpop.permute.xlu1 %3120  ;;  %v4770_v57 = vpack.c.bf16 %v3091_v62, %v7599_v33  ;;  %v3123_v38 = vpop.permute.xlu0 %3122  ;;  %v3303_v33 = vrot.slane %v7930_v27, %v8904_v46 }
 0x2c0   :  { %v3137_v37 = vsel %vm803_vm5, %v3119_v7, %v3121_v47  ;;  %v3136_v16 = vsel %vm803_vm5, %v3121_v47, %v3123_v38  ;;  %v4677_v47 = vld [vmem:[%s8537_s1 + $0x103] ss:$8 sm:$0xf] }
 0x2c1   :  { %4771 = vmatprep.subr.bf16.mxu1 %v4770_v57  ;;  %v3217_v49 = vmul.f32 %v3175_v24, %v3137_v37  ;;  %v3218_v50 = vmul.f32 %v3179_v54, %v3136_v16  ;;  %v8214_v57 = vld [vmem:[%s8537_s1 + $0x102] ss:$8 sm:$0xf]  ;;  %v2675_v16 = vrot.slane %v4677_v47, %v8941_v34 }
 0x2c2   :  { %4773 = vmatpush1.bf16.msra.mxu1 %v4772_v22  ;;  %v2535_v24 = vrot.slane %v8214_v57, %v5230_v61 }
 0x2c3   :  { %v8171_v52 = vpop.permute.xlu1 %3124  ;;  %v3247_v40 = vpop.permute.xlu0 %3246 }
 0x2c4   :  { %v3266_v39 = vsel %vm932_vm6, %v7965_v14, %v3247_v40  ;;  %v3135_v1 = vsel %vm803_vm5, %v3123_v38, %v8171_v52 }
 0x2c5   :  { %v3344_v6 = vmul.f32 %v3299_v41, %v3266_v39  ;;  %v3219_v7 = vmul.f32 %v3183_v42, %v3135_v1  ;;  %v2663_v39 = vrot.slane %v4677_v47, %v5230_v61  ;;  %v2671_v1 = vrot.slane %v4677_v47, %v8918_v0 }
 0x2c7   :  { %v3249_v53 = vpop.permute.xlu1 %3248  ;;  %v4760_v58 = vpack.c.bf16 %v3344_v6, %v3216_v32 }
 0x2c8   :  { %v3265_v14 = vsel %vm932_vm6, %v3247_v40, %v3249_v53  ;;  %v3251_v17 = vpop.permute.xlu0 %3250 }
 0x2c9   :  { %v3345_v8 = vmul.f32 %v3303_v33, %v3265_v14  ;;  %v3264_v25 = vsel %vm932_vm6, %v3249_v53, %v3251_v17  ;;  %v2667_v14 = vrot.slane %v4677_v47, %v8924_v18 }
 0x2ca   :  { %v3346_v4 = vmul.f32 %v3307_v11, %v3264_v25  ;;  %v3427_v25 = vrot.slane %v8028_v2, %v8945_v13 }
 0x2cb   :  { %v8206_v51 = vpop.permute.xlu1 %3252  ;;  %v4758_v35 = vpack.c.bf16 %v3345_v8, %v3217_v49  ;;  %v3431_v8 = vrot.slane %v8028_v2, %v8904_v46 }
 0x2cc   :  { %v3263_v27 = vsel %vm932_vm6, %v3251_v17, %v8206_v51  ;;  %v2473_v63 = vpop.permute.xlu0 %2472  ;;  %v4776_v41 = vpack.c.bf16 %v3346_v4, %v3218_v50  ;;  %v2543_v50 = vrot.slane %v8214_v57, %v8918_v0 }
 0x2cd   :  { %v3347_v62 = vmul.f32 %v3311_v30, %v3263_v27  ;;  %4759 = vmatprep.subr.bf16.mxu0 %v4758_v35  ;;  %v2483_v33 = vsel %vm78_vm1, %v7998_v20, %v2473_v63  ;;  %v2539_v20 = vrot.slane %v8214_v57, %v8924_v18  ;;  %v3439_v27 = vrot.slane %v8028_v2, %v8906_v9 }
 0x2ce   :  { %4761 = vmatpush1.bf16.msra.mxu0 %v4760_v58  ;;  %v2568_v53 = vmul.f32 %v2535_v24, %v2483_v33 }
 0x2cf   :  { %v2475_v22 = vpop.permute.xlu1 %2474  ;;  %v4774_v38 = vpack.c.bf16 %v3347_v62, %v3219_v7  ;;  %v3435_v62 = vrot.slane %v8028_v2, %v8905_v31 }
 0x2d0   :  { %v2477_v40 = vpop.permute.xlu0 %2476 }
 0x2d1   :  { %4775 = vmatprep.subr.bf16.mxu1 %v4774_v38 }
 0x2d2   :  { %4777 = vmatpush1.bf16.msra.mxu1 %v4776_v41  ;;  %v2481_v41 = vsel %vm78_vm1, %v2475_v22, %v2477_v40 }
 0x2d3   :  { %v2601_v56 = vpop.permute.xlu1 %2600 }
 0x2d4   :  { %v2611_v37 = vsel %vm195_vm0, %v8035_v55, %v2601_v56  ;;  %v2603_v43 = vpop.permute.xlu0 %2602  ;;  %v2482_v55 = vsel %vm78_vm1, %v2473_v63, %v2475_v22  ;;  %v4683_v22 = vld [vmem:[%s8537_s1 + $0x105] ss:$8 sm:$0xf] }
 0x2d5   :  { %v2696_v42 = vmul.f32 %v2663_v39, %v2611_v37  ;;  %v2610_v17 = vsel %vm195_vm0, %v2601_v56, %v2603_v43  ;;  %v2569_v58 = vmul.f32 %v2539_v20, %v2482_v55  ;;  %v4680_v56 = vld [vmem:[%s8537_s1 + $0x104] ss:$8 sm:$0xf] }
 0x2d6   :  { %v2697_v30 = vmul.f32 %v2667_v14, %v2610_v17  ;;  %v2791_v14 = vrot.slane %v4680_v56, %v5230_v61  ;;  %v2795_v17 = vrot.slane %v4680_v56, %v8924_v18 }
 0x2d7   :  { %v4780_v6 = vpack.c.bf16 %v2696_v42, %v2568_v53  ;;  %v2605_v11 = vpop.permute.xlu1 %2604 }
 0x2d8   :  { %v3375_v49 = vpop.permute.xlu0 %3374  ;;  %v2608_v4 = vsel %vm195_vm0, %v2605_v11, %v7783_v59  ;;  %v2609_v63 = vsel %vm195_vm0, %v2603_v43, %v2605_v11  ;;  %v2480_v59 = vsel %vm78_vm1, %v2477_v40, %v7767_v12  ;;  %v4778_v38 = vpack.c.bf16 %v2697_v30, %v2569_v58 }
 0x2d9   :  { %v3394_v32 = vsel %vm1061_vm7, %v8071_v15, %v3375_v49  ;;  %v2547_v15 = vrot.slane %v8214_v57, %v8941_v34  ;;  %v2699_v24 = vmul.f32 %v2675_v16, %v2608_v4  ;;  %v2698_v57 = vmul.f32 %v2671_v1, %v2609_v63  ;;  %v4686_v1 = vld [vmem:[%s8537_s1 + $0x107] ss:$8 sm:$0xf] }
 0x2da   :  { %v3472_v7 = vmul.f32 %v3427_v25, %v3394_v32  ;;  %v2570_v40 = vmul.f32 %v2543_v50, %v2481_v41  ;;  %v2803_v25 = vrot.slane %v4680_v56, %v8941_v34  ;;  %v2927_v32 = vrot.slane %v4683_v22, %v8918_v0 }
 0x2db   :  { %v3377_v54 = vpop.permute.xlu1 %3376  ;;  %v2571_v12 = vmul.f32 %v2547_v15, %v2480_v59  ;;  %v3059_v63 = vrot.slane %v4686_v1, %v5230_v61 }
 0x2dc   :  { %v3393_v35 = vsel %vm1061_vm7, %v3375_v49, %v3377_v54  ;;  %v3379_v46 = vpop.permute.xlu0 %3378  ;;  %v4796_v42 = vpack.c.bf16 %v2698_v57, %v2570_v40  ;;  %v2923_v49 = vrot.slane %v4683_v22, %v8924_v18  ;;  %v3071_v57 = vrot.slane %v4686_v1, %v8941_v34 }
 0x2dd   :  { %v3473_v13 = vmul.f32 %v3431_v8, %v3393_v35  ;;  %v3392_v9 = vsel %vm1061_vm7, %v3377_v54, %v3379_v46  ;;  %v4794_v53 = vpack.c.bf16 %v2699_v24, %v2571_v12  ;;  %v2799_v8 = vrot.slane %v4680_v56, %v8918_v0 }
 0x2de   :  { %v3474_v33 = vmul.f32 %v3435_v62, %v3392_v9  ;;  %v2931_v54 = vrot.slane %v4683_v22, %v8941_v34 }
 0x2df   :  { %v8264_v47 = vpop.permute.xlu1 %3380  ;;  %3791 = vmatprep.subr.mxu0 %v3473_v13 }
 0x2e0   :  { %v3391_v31 = vsel %vm1061_vm7, %v3379_v46, %v8264_v47  ;;  %v2729_v2 = vpop.permute.xlu0 %2728  ;;  %3792 = vmatpush1.msra.mxu0 %v3472_v7  ;;  %v3063_v7 = vrot.slane %v4686_v1, %v8924_v18 }
 0x2e1   :  { %v3475_v39 = vmul.f32 %v3439_v27, %v3391_v31  ;;  %4700 = vmatmul.mubr.msk.f32.vlgmr.msra.gmra.mrb[4].mxu0 %vm3614_vm8, %v8085_v44  ;;  %4779 = vmatprep.subr.bf16.mxu0 %v4778_v38  ;;  %v2739_v11 = vsel %vm324_vm2, %v8103_v28, %v2729_v2 }
 0x2e2   :  { %4781 = vmatpush1.bf16.msra.mxu0 %v4780_v6  ;;  %3845 = vmatprep.mubr.f32.mxu0 %v8946_v29  ;;  %v2919_v6 = vrot.slane %v4683_v22, %v5230_v61  ;;  %v2824_v16 = vmul.f32 %v2791_v14, %v2739_v11 }
 0x2e3   :  { %v2731_v37 = vpop.permute.xlu1 %2730  ;;  %3868 = vmatprep.subr.mxu1 %v3475_v39 }
 0x2e4   :  { %v2733_v43 = vpop.permute.xlu0 %2732  ;;  %3869 = vmatpush1.msra.mxu1 %v3474_v33  ;;  %v2738_v20 = vsel %vm324_vm2, %v2729_v2, %v2731_v37  ;;  %v3067_v2 = vrot.slane %v4686_v1, %v8918_v0  ;;  %v4695_v1 = vld [vmem:[%s8537_s1 + $0x162] ss:$8 sm:$0xf] }
 0x2e5   :  { %4701 = vmatmul.mubr.msk.f32.gmra.mrb[6].mxu0 %vm3614_vm8, %v8095_v48  ;;  %4702 = vmatmul.mubr.msk.f32.vlgmr.msra.gmra.mrb[4].mxu1 %vm3614_vm8, %v8085_v44  ;;  %v2737_v35 = vsel %vm324_vm2, %v2731_v37, %v2733_v43  ;;  %v2736_v4 = vsel %vm324_vm2, %v2733_v43, %v7853_v5 }
 0x2e6   :  { %4795 = vmatprep.subr.bf16.mxu1 %v4794_v53  ;;  %3922 = vmatprep.mubr.f32.mxu1 %v8946_v29  ;;  %v2826_v62 = vmul.f32 %v2799_v8, %v2737_v35  ;;  %v2827_v5 = vmul.f32 %v2803_v25, %v2736_v4  ;;  %v4689_v8 = vld [vmem:[%s8537_s1 + $0x160] ss:$8 sm:$0xf] }
 0x2e7   :  { %4797 = vmatpush1.bf16.msra.mxu1 %v4796_v42  ;;  %v2857_v55 = vpop.permute.xlu1 %2856  ;;  %3993 = vmatprep.mubr.f32.mxu0 %v8946_v29  ;;  %v3199_v35 = vrot.slane %v4689_v8, %v8941_v34 }
 0x2e8   :  { %v2867_v28 = vsel %vm453_vm3, %v8142_v23, %v2857_v55  ;;  %v2859_v30 = vpop.permute.xlu0 %2858  ;;  %v2825_v23 = vmul.f32 %v2795_v17, %v2738_v20 }
 0x2e9   :  { %v2952_v46 = vmul.f32 %v2919_v6, %v2867_v28  ;;  %v2866_v58 = vsel %vm453_vm3, %v2857_v55, %v2859_v30  ;;  %4703 = vmatmul.mubr.msk.f32.gmra.mrb[6].mxu1 %vm3614_vm8, %v8095_v48 }
 0x2ea   :  { %v2953_v13 = vmul.f32 %v2923_v49, %v2866_v58  ;;  %4070 = vmatprep.mubr.f32.mxu1 %v8946_v29  ;;  %v8947_v49 = vld [vmem:[#allocation19_spill] sm:$0xff] }
 0x2eb   :  { %v4784_v27 = vpack.c.bf16 %v2952_v46, %v2824_v16  ;;  %v2861_v15 = vpop.permute.xlu1 %2860 }
 0x2ec   :  { %v2864_v50 = vsel %vm453_vm3, %v2861_v15, %v7871_v10  ;;  %v2865_v59 = vsel %vm453_vm3, %v2859_v30, %v2861_v15  ;;  %v2999_v9 = vpop.permute.xlu0 %2998  ;;  %v4782_v38 = vpack.c.bf16 %v2953_v13, %v2825_v23  ;;  %v3195_v30 = vrot.slane %v4689_v8, %v8918_v0  ;;  %v8948_v23 = vld [vmem:[#allocation30_spill] sm:$0xff] }
 0x2ed   :  { %v2954_v41 = vmul.f32 %v2927_v32, %v2865_v59  ;;  %v2955_v24 = vmul.f32 %v2931_v54, %v2864_v50  ;;  %v3006_v31 = vsel %vm674_vm4, %v8162_v45, %v2999_v9 }
 0x2ee   :  { %4783 = vmatprep.subr.bf16.mxu0 %v4782_v38  ;;  %v3092_v33 = vmul.f32 %v3059_v63, %v3006_v31 }
 0x2ef   :  { %v4800_v39 = vpack.c.bf16 %v2954_v41, %v2826_v62  ;;  %4785 = vmatpush1.bf16.msra.mxu0 %v4784_v27  ;;  %v3001_v10 = vpop.permute.xlu1 %3000  ;;  %v4798_v12 = vpack.c.bf16 %v2955_v24, %v2827_v5 }
 0x2f0   :  { %v3005_v56 = vsel %vm674_vm4, %v2999_v9, %v3001_v10  ;;  %v3003_v22 = vpop.permute.xlu0 %3002  ;;  %v4788_v6 = vpack.c.bf16 %v3092_v33, %v7669_v36  ;;  %v3187_v36 = vrot.slane %v4689_v8, %v5230_v61  ;;  %v8949_v9 = vld [vmem:[#allocation42_spill] sm:$0xff] }
 0x2f1   :  { %v3093_v40 = vmul.f32 %v3063_v7, %v3005_v56  ;;  %v3004_v37 = vsel %vm674_vm4, %v3001_v10, %v3003_v22  ;;  %v3015_v45 = vsel %vm674_vm4, %v3003_v22, %v7898_v26  ;;  %4799 = vmatprep.subr.bf16.mxu1 %v4798_v12  ;;  %v4692_v26 = vld [vmem:[%s8537_s1 + $0x161] ss:$8 sm:$0xf]  ;;  %v3447_v7 = vrot.slane %v4695_v1, %v8924_v18 }
 0x2f2   :  { %v3094_v43 = vmul.f32 %v3067_v2, %v3004_v37  ;;  %v3095_v53 = vmul.f32 %v3071_v57, %v3015_v45  ;;  %4801 = vmatpush1.bf16.msra.mxu1 %v4800_v39  ;;  %v3315_v55 = vrot.slane %v4692_v26, %v5230_v61  ;;  %v3319_v54 = vrot.slane %v4692_v26, %v8924_v18 }
 0x2f3   :  { %v3127_v42 = vpop.permute.xlu1 %3126  ;;  %v4786_v14 = vpack.c.bf16 %v3093_v40, %v7686_v3  ;;  %v3323_v46 = vrot.slane %v4692_v26, %v8918_v0  ;;  %v3443_v12 = vrot.slane %v4695_v1, %v5230_v61  ;;  %v3451_v40 = vrot.slane %v4695_v1, %v8918_v0 }
 0x2f4   :  { %v4804_v11 = vpack.c.bf16 %v3094_v43, %v7688_v21  ;;  %v3129_v17 = vpop.permute.xlu0 %3128  ;;  %v4802_v20 = vpack.c.bf16 %v3095_v53, %v8947_v49  ;;  %v3191_v21 = vrot.slane %v4689_v8, %v8924_v18  ;;  %v3134_v28 = vsel %vm803_vm5, %v8171_v52, %v3127_v42 }
 0x2f5   :  { %4787 = vmatprep.subr.bf16.mxu0 %v4786_v14  ;;  %v3133_v16 = vsel %vm803_vm5, %v3127_v42, %v3129_v17  ;;  %v3327_v52 = vrot.slane %v4692_v26, %v8941_v34  ;;  %v3220_v13 = vmul.f32 %v3187_v36, %v3134_v28  ;;  %v3455_v37 = vrot.slane %v4695_v1, %v8941_v34 }
 0x2f6   :  { %4803 = vmatprep.subr.bf16.mxu1 %v4802_v20  ;;  %4789 = vmatpush1.bf16.msra.mxu0 %v4788_v6  ;;  %v3221_v62 = vmul.f32 %v3191_v21, %v3133_v16 }
 0x2f7   :  { %4805 = vmatpush1.bf16.msra.mxu1 %v4804_v11  ;;  %v3131_v3 = vpop.permute.xlu1 %3130 }
 0x2f8   :  { %v3255_v25 = vpop.permute.xlu0 %3254  ;;  %v3132_v58 = vsel %vm803_vm5, %v3129_v17, %v3131_v3 }
 0x2f9   :  { %v3262_v32 = vsel %vm932_vm6, %v8206_v51, %v3255_v25  ;;  %v3143_v51 = vsel %vm803_vm5, %v3131_v3, %v8948_v23  ;;  %v3222_v5 = vmul.f32 %v3195_v30, %v3132_v58 }
 0x2fa   :  { %v3348_v27 = vmul.f32 %v3315_v55, %v3262_v32  ;;  %v3223_v41 = vmul.f32 %v3199_v35, %v3143_v51 }
 0x2fb   :  { %v3257_v4 = vpop.permute.xlu1 %3256 }
 0x2fc   :  { %v3261_v15 = vsel %vm932_vm6, %v3255_v25, %v3257_v4  ;;  %v3259_v63 = vpop.permute.xlu0 %3258  ;;  %v4792_v39 = vpack.c.bf16 %v3348_v27, %v3220_v13 }
 0x2fd   :  { %v3349_v50 = vmul.f32 %v3319_v54, %v3261_v15  ;;  %v3260_v59 = vsel %vm932_vm6, %v3257_v4, %v3259_v63  ;;  %v3271_v38 = vsel %vm932_vm6, %v3259_v63, %v8949_v9  ;;  %v8416_v4 = vld [vmem:[%s8541_s4] sm:$0xf] }
 0x2fe   :  { %v3350_v24 = vmul.f32 %v3323_v46, %v3260_v59  ;;  %v3351_v31 = vmul.f32 %v3327_v52, %v3271_v38 }
 0x2ff   :  { %v3383_v2 = vpop.permute.xlu1 %3382  ;;  %v4790_v57 = vpack.c.bf16 %v3349_v50, %v3221_v62 }
 0x300   :  { %v4808_v10 = vpack.c.bf16 %v3350_v24, %v3222_v5  ;;  %v3385_v18 = vpop.permute.xlu0 %3384  ;;  %v4806_v33 = vpack.c.bf16 %v3351_v31, %v3223_v41  ;;  %v3390_v56 = vsel %vm1061_vm7, %v8264_v47, %v3383_v2 }
 0x301   :  { %v3389_v22 = vsel %vm1061_vm7, %v3383_v2, %v3385_v18  ;;  %4791 = vmatprep.subr.bf16.mxu0 %v4790_v57  ;;  %v3476_v61 = vmul.f32 %v3443_v12, %v3390_v56 }
 0x302   :  { %v3477_v45 = vmul.f32 %v3447_v7, %v3389_v22  ;;  %4807 = vmatprep.subr.bf16.mxu1 %v4806_v33  ;;  %4793 = vmatpush1.bf16.msra.mxu0 %v4792_v39 }
 0x303   :  { %4809 = vmatpush1.bf16.msra.mxu1 %v4808_v10  ;;  %v3387_v43 = vpop.permute.xlu1 %3386 }
 0x304   :  { %v3388_v53 = vsel %vm1061_vm7, %v3385_v18, %v3387_v43  ;;  %v3399_v47 = vsel %vm1061_vm7, %v3387_v43, %v8080_v60  ;;  %3945 = vmatprep.subr.mxu0 %v3477_v45 }
 0x305   :  { %v3478_v42 = vmul.f32 %v3451_v40, %v3388_v53  ;;  %v3479_v14 = vmul.f32 %v3455_v37, %v3399_v47 }
 0x306   :  { %3946 = vmatpush1.msra.mxu0 %v3476_v61 }
 0x307   :  { %4704 = vmatmul.mubr.msk.f32.vlgmr.msra.gmra.mrb[8].mxu0 %vm3614_vm8, %v8085_v44  ;;  %4022 = vmatprep.subr.mxu1 %v3479_v14 }
 0x308   :  { %4023 = vmatpush1.msra.mxu1 %v3478_v42  ;;  %3999 = vmatprep.mubr.f32.mxu0 %v8946_v29 }
 0x309   :  { %4706 = vmatmul.mubr.msk.f32.vlgmr.msra.gmra.mrb[8].mxu1 %vm3614_vm8, %v8085_v44 }
 0x30a   :  { %4076 = vmatprep.mubr.f32.mxu1 %v8946_v29 }
 0x30b   :  { %4705 = vmatmul.mubr.msk.f32.gmra.mrb[10].mxu0 %vm3614_vm8, %v8095_v48 }
 0x30c   :  { %4182 = vmatprep.mubr.f32.mxu0 %v8946_v29 }
 0x30d   :  { %4707 = vmatmul.mubr.msk.f32.gmra.mrb[10].mxu1 %vm3614_vm8, %v8095_v48 }
 0x30e   :  { %4253 = vmatprep.mubr.f32.mxu1 %v8946_v29 }
 0x311   :  { %v8401_v19 = vpop.permute.xlu0 %3606 }
 0x314   :  { %v8404_v6 = vpop.permute.xlu1 %3611 }
 0x378   :  { %v3764_v0 = vpop.f32.mrb[0].mxu1 }
 0x379   :  { %v3766_v34 = vpop.f32.mrb[1].mxu1  ;;  %v3765_v60 = vadd.f32 %v3764_v0, %v8401_v19 }
 0x37a   :  { %v3767_v11 = vadd.f32 %v3766_v34, %v8401_v19 }
 0x37b   :  { %v3687_v44 = vpop.f32.mrb[0].mxu0  ;;  %v4085_v3 = vmax.f32 %v3765_v60, 0.0 }
 0x37c   :  { %v3689_v17 = vpop.f32.mrb[1].mxu0  ;;  %v3688_v49 = vadd.f32 %v3687_v44, %v8401_v19  ;;  %v3770_v20 = vpop.f32.mrb[2].mxu1  ;;  %v4086_v55 = vmax.f32 %v3767_v11, 0.0 }
 0x37d   :  { %v3690_v8 = vadd.f32 %v3689_v17, %v8401_v19  ;;  %v3772_v48 = vpop.f32.mrb[3].mxu1  ;;  %v3771_v26 = vadd.f32 %v3770_v20, %v8404_v6 }
 0x37e   :  { %v3773_v36 = vadd.f32 %v3772_v48, %v8404_v6  ;;  %v4083_v28 = vmax.f32 %v3688_v49, 0.0 }
 0x37f   :  { %v3693_v21 = vpop.f32.mrb[2].mxu0  ;;  %v4097_v32 = vmax.f32 %v3771_v26, 0.0  ;;  %v4084_v1 = vmax.f32 %v3690_v8, 0.0 }
 0x380   :  { %v3694_v25 = vadd.f32 %v3693_v21, %v8404_v6  ;;  %v3695_v30 = vpop.f32.mrb[3].mxu0  ;;  %v4098_v54 = vmax.f32 %v3773_v36, 0.0 }
 0x381   :  { %v3696_v16 = vadd.f32 %v3695_v30, %v8404_v6  ;;  %v4816_v46 = vpack.c.bf16 %v4097_v32, %v4085_v3 }
 0x382   :  { %v4095_v35 = vmax.f32 %v3694_v25, 0.0  ;;  %v4814_v58 = vpack.c.bf16 %v4098_v54, %v4086_v55 }
 0x383   :  { %v4096_v52 = vmax.f32 %v3696_v16, 0.0 }
 0x384   :  { %v4812_v23 = vpack.c.bf16 %v4095_v35, %v4083_v28  ;;  %4815 = vmatprep.subr.bf16.mxu1 %v4814_v58  ;;  %v8450_v35 = vpop.permute.xlu1 %4111 }
 0x385   :  { %v4810_v51 = vpack.c.bf16 %v4096_v52, %v4084_v1  ;;  %4817 = vmatpush1.bf16.msra.mxu1 %v4816_v46  ;;  %v4546_v46 = vld [vmem:[%s8536_s0 + $0x10] sm:$0xf] }
 0x387   :  { %4811 = vmatprep.subr.bf16.mxu0 %v4810_v51 }
 0x388   :  { %4813 = vmatpush1.bf16.msra.mxu0 %v4812_v23  ;;  %4709 = vmatmul.mubr.msk.f32.vlgmr.msra.gmra.mrb[12].mxu1 %vm4114_vm9, %v8416_v4  ;;  %v4547_v23 = vld [vmem:[%s8536_s0 + $0x18] sm:$0xf] }
 0x389   :  { %4395 = vmatprep.mubr.f32.mxu1 %v8946_v29 }
 0x38b   :  { %4708 = vmatmul.mubr.msk.f32.vlgmr.msra.gmra.mrb[12].mxu0 %vm4114_vm9, %v8416_v4 }
 0x38c   :  { %4324 = vmatprep.mubr.f32.mxu0 %v8946_v29 }
 0x3b4   :  { %v3841_v13 = vpop.f32.mrb[4].mxu0 }
 0x3b5   :  { %v3842_v27 = vadd.f32 %v3841_v13, %v8401_v19  ;;  %v3843_v15 = vpop.f32.mrb[5].mxu0 }
 0x3b6   :  { %v3844_v63 = vadd.f32 %v3843_v15, %v8401_v19 }
 0x3b7   :  { %v4087_v50 = vmax.f32 %v3842_v27, 0.0 }
 0x3b8   :  { %v3847_v7 = vpop.f32.mrb[6].mxu0  ;;  %v3918_v62 = vpop.f32.mrb[4].mxu1  ;;  %v4088_v41 = vmax.f32 %v3844_v63, 0.0 }
 0x3b9   :  { %v3848_v59 = vadd.f32 %v3847_v7, %v8404_v6  ;;  %v3849_v9 = vpop.f32.mrb[7].mxu0  ;;  %v3919_v38 = vadd.f32 %v3918_v62, %v8401_v19  ;;  %v3920_v5 = vpop.f32.mrb[5].mxu1  ;;  %v4545_v7 = vld [vmem:[%s8536_s0 + $0x8] sm:$0xf] }
 0x3ba   :  { %v3850_v24 = vadd.f32 %v3849_v9, %v8404_v6  ;;  %v3921_v31 = vadd.f32 %v3920_v5, %v8401_v19 }
 0x3bb   :  { %v4099_v2 = vmax.f32 %v3848_v59, 0.0  ;;  %v4089_v12 = vmax.f32 %v3919_v38, 0.0 }
 0x3bc   :  { %v4100_v57 = vmax.f32 %v3850_v24, 0.0  ;;  %v3924_v39 = vpop.f32.mrb[6].mxu1  ;;  %v4090_v22 = vmax.f32 %v3921_v31, 0.0 }
 0x3bd   :  { %v4820_v10 = vpack.c.bf16 %v4099_v2, %v4087_v50  ;;  %v3925_v18 = vadd.f32 %v3924_v39, %v8404_v6  ;;  %v3926_v33 = vpop.f32.mrb[7].mxu1 }
 0x3be   :  { %v4818_v56 = vpack.c.bf16 %v4100_v57, %v4088_v41  ;;  %v3927_v40 = vadd.f32 %v3926_v33, %v8404_v6 }
 0x3bf   :  { %v4101_v37 = vmax.f32 %v3925_v18, 0.0 }
 0x3c0   :  { %v4102_v45 = vmax.f32 %v3927_v40, 0.0  ;;  %4819 = vmatprep.subr.bf16.mxu0 %v4818_v56 }
 0x3c1   :  { %v4824_v43 = vpack.c.bf16 %v4101_v37, %v4089_v12  ;;  %4821 = vmatpush1.bf16.msra.mxu0 %v4820_v10 }
 0x3c2   :  { %v4822_v61 = vpack.c.bf16 %v4102_v45, %v4090_v22 }
 0x3c4   :  { %4710 = vmatmul.mubr.msk.f32.vlgmr.msra.gmra.mrb[14].mxu0 %vm4114_vm9, %v8416_v4  ;;  %4823 = vmatprep.subr.bf16.mxu1 %v4822_v61 }
 0x3c5   :  { %4825 = vmatpush1.bf16.msra.mxu1 %v4824_v43  ;;  %4466 = vmatprep.mubr.f32.mxu0 %v8946_v29 }
 0x3c8   :  { %4711 = vmatmul.mubr.msk.f32.vlgmr.msra.gmra.mrb[14].mxu1 %vm4114_vm9, %v8416_v4 }
 0x3c9   :  { %4537 = vmatprep.mubr.f32.mxu1 %v8946_v29 }
 0x3da   :  { %v3995_v53 = vpop.f32.mrb[8].mxu0 }
 0x3db   :  { %v3997_v47 = vpop.f32.mrb[9].mxu0  ;;  %v3996_v14 = vadd.f32 %v3995_v53, %v8401_v19 }
 0x3dc   :  { %v4072_v42 = vpop.f32.mrb[8].mxu1  ;;  %v3998_v34 = vadd.f32 %v3997_v47, %v8401_v19 }
 0x3dd   :  { %v4074_v0 = vpop.f32.mrb[9].mxu1  ;;  %v4073_v44 = vadd.f32 %v4072_v42, %v8401_v19  ;;  %v4091_v29 = vmax.f32 %v3996_v14, 0.0 }
 0x3de   :  { %v4001_v60 = vpop.f32.mrb[10].mxu0  ;;  %v4075_v49 = vadd.f32 %v4074_v0, %v8401_v19  ;;  %v4092_v36 = vmax.f32 %v3998_v34, 0.0 }
 0x3df   :  { %v4002_v11 = vadd.f32 %v4001_v60, %v8404_v6  ;;  %v4003_v17 = vpop.f32.mrb[11].mxu0  ;;  %v4093_v25 = vmax.f32 %v4073_v44, 0.0 }
 0x3e0   :  { %v4004_v20 = vadd.f32 %v4003_v17, %v8404_v6  ;;  %v4078_v8 = vpop.f32.mrb[10].mxu1  ;;  %v4094_v32 = vmax.f32 %v4075_v49, 0.0 }
 0x3e1   :  { %v4103_v48 = vmax.f32 %v4002_v11, 0.0  ;;  %v4079_v26 = vadd.f32 %v4078_v8, %v8404_v6  ;;  %v4080_v3 = vpop.f32.mrb[11].mxu1 }
 0x3e2   :  { %v4104_v21 = vmax.f32 %v4004_v20, 0.0  ;;  %v4081_v55 = vadd.f32 %v4080_v3, %v8404_v6 }
 0x3e3   :  { %v4828_v28 = vpack.c.bf16 %v4103_v48, %v4091_v29  ;;  %v4105_v30 = vmax.f32 %v4079_v26, 0.0 }
 0x3e4   :  { %v4826_v54 = vpack.c.bf16 %v4104_v21, %v4092_v36  ;;  %v4106_v1 = vmax.f32 %v4081_v55, 0.0 }
 0x3e5   :  { %v4832_v16 = vpack.c.bf16 %v4105_v30, %v4093_v25 }
 0x3e6   :  { %v4830_v19 = vpack.c.bf16 %v4106_v1, %v4094_v32  ;;  %4827 = vmatprep.subr.bf16.mxu0 %v4826_v54 }
 0x3e7   :  { %4829 = vmatpush1.bf16.msra.mxu0 %v4828_v28 }
 0x3e8   :  { %4831 = vmatprep.subr.bf16.mxu1 %v4830_v19 }
 0x3e9   :  { %4833 = vmatpush1.bf16.msra.mxu1 %v4832_v16 }
 0x3ea   :  { %4712 = vmatmul.mubr.msk.f32.vlgmr.msra.gmra.mrb[16].mxu0 %vm4114_vm9, %v8416_v4 }
 0x3ec   :  { %4713 = vmatmul.mubr.msk.f32.vlgmr.msra.gmra.mrb[16].mxu1 %vm4114_vm9, %v8416_v4  ;;  %v4544_v4 = vld [vmem:[%s8536_s0] sm:$0xf] }
 0x45b   :  { %v4255_v6 = vpop.f32.mrb[12].mxu1 }
 0x45c   :  { %v4256_v52 = vadd.f32 %v4255_v6, %v8450_v35  ;;  %v4257_v58 = vpop.f32.mrb[13].mxu1 }
 0x45d   :  { %v4258_v51 = vadd.f32 %v4257_v58, %v8450_v35 }
 0x45e   :  { %v4184_v13 = vpop.f32.mrb[12].mxu0  ;;  %v4558_v27 = vadd.f32 %v4546_v46, %v4256_v52 }
 0x45f   :  { %v4185_v15 = vadd.f32 %v4184_v13, %v8450_v35  ;;  %v4186_v63 = vpop.f32.mrb[13].mxu0  ;;  %v4559_v62 = vadd.f32 %v4547_v23, %v4258_v51 }
 0x460   :  { %v4187_v50 = vadd.f32 %v4186_v63, %v8450_v35  ;;  %4570 = vst [vmem:[#allocation2 + $0x10] sm:$0xf] %v4558_v27 }
 0x461   :  { %v4556_v59 = vadd.f32 %v4544_v4, %v4185_v15  ;;  %4571 = vst [vmem:[#allocation2 + $0x18] sm:$0xf] %v4559_v62 }
 0x462   :  { %v4557_v9 = vadd.f32 %v4545_v7, %v4187_v50 }
 0x463   :  { %4568 = vst [vmem:[#allocation2] sm:$0xf] %v4556_v59 }
 0x464   :  { %4569 = vst [vmem:[#allocation2 + $0x8] sm:$0xf] %v4557_v9 }
 0x467   :  { %v4594_v38 = vld [vmem:[#allocation2 + $0x10] sm:$0xff] }
 0x468   :  { %4606 = vst [vmem:[%s8542_s6 + $0x10] sm:$0xff] %v4594_v38  ;;  %v4595_v5 = vld [vmem:[#allocation2 + $0x18] sm:$0xff] }
 0x469   :  { %4607 = vst [vmem:[%s8542_s6 + $0x18] sm:$0xff] %v4595_v5 }
 0x46a   :  { %v4592_v41 = vld [vmem:[#allocation2] sm:$0xff] }
 0x46b   :  { %4604 = vst [vmem:[%s8542_s6] sm:$0xff] %v4592_v41  ;;  %v4593_v24 = vld [vmem:[#allocation2 + $0x8] sm:$0xff] }
 0x46c   :  { %4605 = vst [vmem:[%s8542_s6 + $0x8] sm:$0xff] %v4593_v24 }
 0x473   :  { %v4548_v2 = vld [vmem:[%s8536_s0 + $0x20] sm:$0xf]  ;;  %v4549_v10 = vld [vmem:[%s8536_s0 + $0x28] sm:$0xf]  ;;  %v4550_v22 = vld [vmem:[%s8536_s0 + $0x30] sm:$0xf] }
 0x474   :  { %v4551_v45 = vld [vmem:[%s8536_s0 + $0x38] sm:$0xf] }
 0x497   :  { %v4326_v31 = vpop.f32.mrb[14].mxu0 }
 0x498   :  { %v4327_v57 = vadd.f32 %v4326_v31, %v8450_v35  ;;  %v4328_v39 = vpop.f32.mrb[15].mxu0 }
 0x499   :  { %v4329_v12 = vadd.f32 %v4328_v39, %v8450_v35 }
 0x49a   :  { %v4560_v18 = vadd.f32 %v4548_v2, %v4327_v57 }
 0x49b   :  { %v4561_v33 = vadd.f32 %v4549_v10, %v4329_v12  ;;  %v4397_v56 = vpop.f32.mrb[14].mxu1 }
 0x49c   :  { %4572 = vst [vmem:[#allocation2 + $0x20] sm:$0xf] %v4560_v18  ;;  %v4398_v40 = vadd.f32 %v4397_v56, %v8450_v35  ;;  %v4399_v37 = vpop.f32.mrb[15].mxu1 }
 0x49d   :  { %4573 = vst [vmem:[#allocation2 + $0x28] sm:$0xf] %v4561_v33  ;;  %v4400_v43 = vadd.f32 %v4399_v37, %v8450_v35 }
 0x49e   :  { %v4562_v61 = vadd.f32 %v4550_v22, %v4398_v40 }
 0x49f   :  { %v4563_v53 = vadd.f32 %v4551_v45, %v4400_v43 }
 0x4a0   :  { %4574 = vst [vmem:[#allocation2 + $0x30] sm:$0xf] %v4562_v61 }
 0x4a1   :  { %4575 = vst [vmem:[#allocation2 + $0x38] sm:$0xf] %v4563_v53 }
 0x4a3   :  { %v4596_v47 = vld [vmem:[#allocation2 + $0x20] sm:$0xff] }
 0x4a4   :  { %4608 = vst [vmem:[%s8542_s6 + $0x20] sm:$0xff] %v4596_v47  ;;  %v4597_v42 = vld [vmem:[#allocation2 + $0x28] sm:$0xff] }
 0x4a5   :  { %4609 = vst [vmem:[%s8542_s6 + $0x28] sm:$0xff] %v4597_v42 }
 0x4a7   :  { %v4598_v14 = vld [vmem:[#allocation2 + $0x30] sm:$0xff] }
 0x4a8   :  { %4610 = vst [vmem:[%s8542_s6 + $0x30] sm:$0xff] %v4598_v14  ;;  %v4599_v0 = vld [vmem:[#allocation2 + $0x38] sm:$0xff] }
 0x4a9   :  { %4611 = vst [vmem:[%s8542_s6 + $0x38] sm:$0xff] %v4599_v0 }
 0x4b0   :  { %v4552_v60 = vld [vmem:[%s8536_s0 + $0x40] sm:$0xf]  ;;  %v4553_v17 = vld [vmem:[%s8536_s0 + $0x48] sm:$0xf]  ;;  %v4554_v8 = vld [vmem:[%s8536_s0 + $0x50] sm:$0xf] }
 0x4b1   :  { %v4555_v3 = vld [vmem:[%s8536_s0 + $0x58] sm:$0xf] }
 0x4bd   :  { %v4468_v34 = vpop.f32.mrb[16].mxu0 }
 0x4be   :  { %v4469_v44 = vadd.f32 %v4468_v34, %v8450_v35  ;;  %v4470_v11 = vpop.f32.mrb[17].mxu0 }
 0x4bf   :  { %v4471_v49 = vadd.f32 %v4470_v11, %v8450_v35  ;;  %v4539_v20 = vpop.f32.mrb[16].mxu1 }
 0x4c0   :  { %v4564_v29 = vadd.f32 %v4552_v60, %v4469_v44  ;;  %v4540_v48 = vadd.f32 %v4539_v20, %v8450_v35  ;;  %v4541_v26 = vpop.f32.mrb[17].mxu1 }
 0x4c1   :  { %v4565_v36 = vadd.f32 %v4553_v17, %v4471_v49  ;;  %v4542_v21 = vadd.f32 %v4541_v26, %v8450_v35 }
 0x4c2   :  { %4576 = vst [vmem:[#allocation2 + $0x40] sm:$0xf] %v4564_v29  ;;  %v4566_v55 = vadd.f32 %v4554_v8, %v4540_v48 }
 0x4c3   :  { %4577 = vst [vmem:[#allocation2 + $0x48] sm:$0xf] %v4565_v36  ;;  %v4567_v25 = vadd.f32 %v4555_v3, %v4542_v21 }
 0x4c4   :  { %4578 = vst [vmem:[#allocation2 + $0x50] sm:$0xf] %v4566_v55 }
 0x4c5   :  { %4579 = vst [vmem:[#allocation2 + $0x58] sm:$0xf] %v4567_v25 }
 0x4c9   :  { %v4600_v28 = vld [vmem:[#allocation2 + $0x40] sm:$0xff] }
 0x4ca   :  { %4612 = vst [vmem:[%s8542_s6 + $0x40] sm:$0xff] %v4600_v28  ;;  %v4601_v30 = vld [vmem:[#allocation2 + $0x48] sm:$0xff] }
 0x4cb   :  { %4613 = vst [vmem:[%s8542_s6 + $0x48] sm:$0xff] %v4601_v30  ;;  %v4602_v32 = vld [vmem:[#allocation2 + $0x50] sm:$0xff] }
 0x4cc   :  { %4614 = vst [vmem:[%s8542_s6 + $0x50] sm:$0xff] %v4602_v32  ;;  %v4603_v54 = vld [vmem:[#allocation2 + $0x58] sm:$0xff] }
 0x4cd   :  { %4615 = vst [vmem:[%s8542_s6 + $0x58] sm:$0xff] %v4603_v54 }

</bundles_post_ra>
